<compile_context>
chip_gen: v7x
topology: tpu7x:2x2x1
jax: 0.10.0
libtpu: 0.0.40
codegen_flags: <defaults>
</compile_context>

<pallas_src>
import jax
import jax.numpy as jnp
from jax import lax
from jax.experimental import pallas as pl
from jax.experimental.pallas import tpu as pltpu

H = 8                          # spatial size implied by fc1 = 32 * 4 * 4
W = 8
MAX_TILE_B = 128               # batch-tile cap (lane width of the slabs)
COMPUTE_DTYPE = jnp.bfloat16   # MXU operand dtype; accumulation is float32


# ------------------------------ slab helpers --------------------------------


def _pad_rows_flat(a, tb, h, w):
    """(C, h*w*tb) -> (C, (h+2)*(w+2)*tb): zero 1-pixel spatial border.

    Lane layout: padded pixel (r, c) occupies the tb lanes starting at
    (r*(w+2) + c)*tb.  Every piece is a tb-aligned lane slice / concat, so at
    tb=128 this is pure tile-granular copying (no cross-lane shuffles).
    """
    cdim = a.shape[0]
    zc = jnp.zeros((cdim, tb), a.dtype)
    zrow = jnp.zeros((cdim, (w + 2) * tb), a.dtype)
    rows = [zrow]
    for r in range(h):
        rows.append(jnp.concatenate(
            [zc, a[:, r * w * tb:(r + 1) * w * tb], zc], axis=1))
    rows.append(zrow)
    return jnp.concatenate(rows, axis=1)


def _tap_flat(ap, kh, kw, tb, h, w):
    """Extract 3x3 tap (kh, kw) from a padded flat slab.

    ap: (C, (h+2)*(w+2)*tb) -> (C, h*w*tb); output pixel (r, c) holds the
    original image at (r+kh-1, c+kw-1) with zeros outside, i.e. exactly the
    'same'-padded conv tap.
    """
    wp = w + 2
    pieces = [ap[:, ((r + kh) * wp + kw) * tb:((r + kh) * wp + kw + w) * tb]
              for r in range(h)]
    return jnp.concatenate(pieces, axis=1)


# ------------------------------ fused kernel --------------------------------


def net_fused_kernel(x_ref, w1_ref, b1_ref, w2_ref, b2_ref,
                     wf1_ref, bf1_ref, wf2_ref, bf2_ref, o_ref):
    """conv1+ReLU -> conv2+ReLU -> maxpool2x2 -> fc1+ReLU -> fc2 -> tanh.

    Activations are 2-D lane-dense slabs (C, H*W*B): channels in sublanes,
    (spatial x batch) in lanes.  All matmuls are plain 2-D dots.

    x_ref  : (1, H*W*B)  f32   flattened input tile, lane = (h*W + w)*B + b
    w1_ref : (16, 9)     f32   conv1 weights, column t = 3x3 tap index
    b1_ref : (16, 1)     f32
    w2_ref : (288, 16)   bf16  conv2 weights, row t*32 + co, col ci
    b2_ref : (32, 1)     f32
    wf1_ref: (1024, 32)  bf16  fc1 weights, row p*64 + o (p = pool position)
    bf1_ref: (64, 1)     f32
    wf2_ref: (1, 64)     bf16
    bf2_ref: (1, 1)      f32
    o_ref  : (1, B)      f32   lane-dense output tile
    """
    f32 = jnp.float32
    cdt = w2_ref.dtype                       # bf16 operands for the MXU
    tb = o_ref.shape[-1]
    hwb = H * W * tb

    # ---- conv1 (1 -> 16) + ReLU: 9 lane-dense VPU FMAs (no patch packing) --
    xp = _pad_rows_flat(x_ref[...], tb, H, W)              # (1, 100*B) f32
    acc1 = jnp.broadcast_to(b1_ref[...], (16, hwb))        # bias init, f32
    for t in range(9):
        kh, kw = divmod(t, 3)
        tap = _tap_flat(xp, kh, kw, tb, H, W)              # (1, H*W*B)
        acc1 = acc1 + w1_ref[:, t:t + 1] * tap             # (16, H*W*B)
    y1 = jnp.maximum(acc1, 0.0).astype(cdt)                # (16, H*W*B) bf16

    # ---- conv2 (16 -> 32) + ReLU: 9 accumulating (32,16)@(16,M) MXU dots ---
    y1p = _pad_rows_flat(y1, tb, H, W)                     # bf16 padded slab
    acc2 = jnp.broadcast_to(b2_ref[...], (32, hwb))        # bias init, f32
    for t in range(9):
        kh, kw = divmod(t, 3)
        tap = _tap_flat(y1p, kh, kw, tb, H, W)             # (16, H*W*B) bf16
        acc2 = acc2 + jnp.dot(w2_ref[t * 32:(t + 1) * 32, :], tap,
                              preferred_element_type=f32)
    y2 = jnp.maximum(acc2, 0.0)                            # (32, H*W*B) f32

    # ---- MaxPool 2x2 fused into fc1: 16 accumulating (64,32)@(32,B) dots ---
    accf = jnp.broadcast_to(bf1_ref[...], (64, tb))        # bias init, f32
    for i in range(H // 2):
        for j in range(W // 2):
            q00 = (2 * i * W + 2 * j) * tb
            q01 = (2 * i * W + 2 * j + 1) * tb
            q10 = ((2 * i + 1) * W + 2 * j) * tb
            q11 = ((2 * i + 1) * W + 2 * j + 1) * tb
            blk = jnp.maximum(
                jnp.maximum(y2[:, q00:q00 + tb], y2[:, q01:q01 + tb]),
                jnp.maximum(y2[:, q10:q10 + tb], y2[:, q11:q11 + tb]))
            p = i * (W // 2) + j
            accf = accf + jnp.dot(wf1_ref[p * 64:(p + 1) * 64, :],
                                  blk.astype(cdt),
                                  preferred_element_type=f32)
    h1 = jnp.maximum(accf, 0.0)                            # (64, B) f32

    # ---- fc2 + tanh, lane-dense (1, B) output ------------------------------
    out = jnp.dot(wf2_ref[...], h1.astype(cdt), preferred_element_type=f32)
    o_ref[...] = jnp.tanh(out + bf2_ref[...])              # (1, B) f32


# -------------------------------- wrapper ------------------------------------


def _full_spec(a):
    nd = a.ndim
    return pl.BlockSpec(a.shape, lambda i, _nd=nd: (0,) * _nd)


def net_forward(x_nchw, params):
    """x_nchw: (N, 1, 8, 8) float32 (PyTorch layout). Returns (N, 1) float32."""
    n = x_nchw.shape[0]
    n8 = -(-n // 8) * 8
    tile_b = min(n8, MAX_TILE_B)              # adaptive, always a multiple of 8
    n_pad = -(-n // tile_b) * tile_b
    num_tiles = n_pad // tile_b
    hwb = H * W * tile_b

    # NCHW -> one flat lane-dense row: sample (t*tile_b + b), pixel (h, w)
    # lands at lane t*hwb + (h*W + w)*tile_b + b.
    x = x_nchw[:, 0].astype(jnp.float32)                     # (N, H, W)
    if n_pad != n:
        x = jnp.pad(x, ((0, n_pad - n), (0, 0), (0, 0)))
    x = x.reshape(num_tiles, tile_b, H, W).transpose(0, 2, 3, 1)
    x = x.reshape(1, num_tiles * hwb)

    w1, b1 = params["w_conv1"], params["b_conv1"]
    w2, b2 = params["w_conv2"], params["b_conv2"]
    wf1, bf1 = params["w_fc1"], params["b_fc1"]
    wf2, bf2 = params["w_fc2"], params["b_fc2"]

    out = pl.pallas_call(
        net_fused_kernel,
        out_shape=jax.ShapeDtypeStruct((1, n_pad), jnp.float32),
        grid=(num_tiles,),
        in_specs=[
            pl.BlockSpec((1, hwb), lambda i: (0, i)),
            _full_spec(w1), _full_spec(b1),
            _full_spec(w2), _full_spec(b2),
            _full_spec(wf1), _full_spec(bf1),
            _full_spec(wf2), _full_spec(bf2),
        ],
        out_specs=pl.BlockSpec((1, tile_b), lambda i: (0, i)),
        compiler_params=pltpu.CompilerParams(
            dimension_semantics=("parallel",),
            vmem_limit_bytes=32 * 1024 * 1024),
    )(x, w1, b1, w2, b2, wf1, bf1, wf2, bf2)

    return out[0, :n].reshape(n, 1)                          # (N, 1)


# --------------------------- parameters & reference --------------------------


def init_torch_params(key):
    """Parameters in the native PyTorch layouts (float32)."""
    ks = jax.random.split(key, 8)

    def u(k, shape, fan_in):
        bound = 1.0 / jnp.sqrt(jnp.float32(fan_in))
        return jax.random.uniform(k, shape, jnp.float32, -bound, bound)

    return {
        "conv1.weight": u(ks[0], (16, 1, 3, 3), 1 * 9),
        "conv1.bias":   u(ks[1], (16,), 1 * 9),
        "conv2.weight": u(ks[2], (32, 16, 3, 3), 16 * 9),
        "conv2.bias":   u(ks[3], (32,), 16 * 9),
        "fc1.weight":   u(ks[4], (64, 512), 512),
        "fc1.bias":     u(ks[5], (64,), 512),
        "fc2.weight":   u(ks[6], (1, 64), 64),
        "fc2.bias":     u(ks[7], (1,), 64),
    }


def convert_params(tp, compute_dtype=COMPUTE_DTYPE):
    """PyTorch layouts -> kernel (channel-in-sublane slab) layouts."""
    # conv1 (16,1,3,3) -> (16, 9): column t = kh*3 + kw.  Kept f32 (VPU FMAs).
    w_c1 = tp["conv1.weight"].reshape(16, 9)
    # conv2 (32,16,3,3) -> (kh,kw,co,ci) -> (288, 16): row t*32 + co, col ci.
    w_c2 = jnp.transpose(tp["conv2.weight"], (2, 3, 0, 1)).reshape(288, 16)
    # fc1 (64, 512); torch feature index = c*16 + i*4 + j
    #   -> (i,j,o,c) -> (1024, 32): row p*64 + o with p = i*4 + j, col c.
    w_f1 = jnp.transpose(tp["fc1.weight"].reshape(64, 32, 4, 4),
                         (2, 3, 0, 1)).reshape(1024, 32)
    return {
        "w_conv1": w_c1.astype(jnp.float32),
        "b_conv1": tp["conv1.bias"].reshape(16, 1).astype(jnp.float32),
        "w_conv2": w_c2.astype(compute_dtype),
        "b_conv2": tp["conv2.bias"].reshape(32, 1).astype(jnp.float32),
        "w_fc1":   w_f1.astype(compute_dtype),
        "b_fc1":   tp["fc1.bias"].reshape(64, 1).astype(jnp.float32),
        "w_fc2":   tp["fc2.weight"].astype(compute_dtype),        # (1, 64)
        "b_fc2":   tp["fc2.bias"].reshape(1, 1).astype(jnp.float32),
    }


def net_reference(x_nchw, tp):
    """Pure-JAX float32 reference that mirrors the PyTorch module exactly."""
    dn = ("NCHW", "OIHW", "NCHW")
    y = lax.conv_general_dilated(x_nchw, tp["conv1.weight"], (1, 1),
                                 ((1, 1), (1, 1)), dimension_numbers=dn)
    y = jnp.maximum(y + tp["conv1.bias"][None, :, None, None], 0.0)
    y = lax.conv_general_dilated(y, tp["conv2.weight"], (1, 1),
                                 ((1, 1), (1, 1)), dimension_numbers=dn)
    y = jnp.maximum(y + tp["conv2.bias"][None, :, None, None], 0.0)
    y = lax.reduce_window(y, -jnp.inf, lax.max,
                          (1, 1, 2, 2), (1, 1, 2, 2), "VALID")
    y = y.reshape(y.shape[0], -1)                                # (N, 512)
    y = jnp.maximum(y @ tp["fc1.weight"].T + tp["fc1.bias"], 0.0)
    y = y @ tp["fc2.weight"].T + tp["fc2.bias"]
    return jnp.tanh(y)


if __name__ == "__main__":
    key = jax.random.PRNGKey(0)
    kp, kx1, kx2 = jax.random.split(key, 3)
    torch_params = init_torch_params(kp)
    params = convert_params(torch_params)

    fwd = jax.jit(net_forward)

    # Small inference batch (adaptive tile_b = 8, single grid step).
    x_small = jax.random.normal(kx1, (2, 1, 8, 8), jnp.float32)   # NCHW
    y_small = fwd(x_small, params)
    jax.block_until_ready(y_small)
    assert y_small.shape == (2, 1) and y_small.dtype == jnp.float32
    assert bool(jnp.all(jnp.isfinite(y_small)))
    y_ref_small = net_reference(x_small, torch_params)
    assert bool(jnp.allclose(y_small, y_ref_small, atol=5e-2)), (
        y_small, y_ref_small)

    # Larger batch: exercises the lane-dense tile_b = 128 path with a 2-step
    # "parallel" grid (keeps both v7x TensorCores busy).
    x_big = jax.random.normal(kx2, (200, 1, 8, 8), jnp.float32)
    y_big = fwd(x_big, params)
    jax.block_until_ready(y_big)
    assert y_big.shape == (200, 1)
    y_ref_big = net_reference(x_big, torch_params)
    assert bool(jnp.allclose(y_big, y_ref_big, atol=5e-2))

    print("KERNEL_OK")
</pallas_src>

<mosaic_0001>
module attributes {stable_mosaic.version = 11 : i64} {
  func.func @net_fused_kernel(%arg0: i32, %arg1: memref<1x512xf32, #tpu.memory_space<vmem>>, %arg2: memref<16x9xf32, #tpu.memory_space<vmem>>, %arg3: memref<16x1xf32, #tpu.memory_space<vmem>>, %arg4: memref<288x16xbf16, #tpu.memory_space<vmem>>, %arg5: memref<32x1xf32, #tpu.memory_space<vmem>>, %arg6: memref<1024x32xbf16, #tpu.memory_space<vmem>>, %arg7: memref<64x1xf32, #tpu.memory_space<vmem>>, %arg8: memref<1x64xbf16, #tpu.memory_space<vmem>>, %arg9: memref<1x1xf32, #tpu.memory_space<vmem>>, %arg10: memref<1x8xf32, #tpu.memory_space<vmem>>) attributes {dimension_semantics = [#tpu.dimension_semantics<parallel>], iteration_bounds = array<i64: 1>, scalar_prefetch = 0 : i64, scratch_operands = 0 : i64, tpu.core_type = #tpu.core_type<tc>, window_params = [{transform_indices = @transform_0, window_bounds = array<i64: 1, 512>}, {pipeline_mode = #tpu.pipeline_mode<synchronous>, transform_indices = @transform_1, window_bounds = array<i64: 16, 9>}, {pipeline_mode = #tpu.pipeline_mode<synchronous>, transform_indices = @transform_2, window_bounds = array<i64: 16, 1>}, {pipeline_mode = #tpu.pipeline_mode<synchronous>, transform_indices = @transform_3, window_bounds = array<i64: 288, 16>}, {pipeline_mode = #tpu.pipeline_mode<synchronous>, transform_indices = @transform_4, window_bounds = array<i64: 32, 1>}, {pipeline_mode = #tpu.pipeline_mode<synchronous>, transform_indices = @transform_5, window_bounds = array<i64: 1024, 32>}, {pipeline_mode = #tpu.pipeline_mode<synchronous>, transform_indices = @transform_6, window_bounds = array<i64: 64, 1>}, {pipeline_mode = #tpu.pipeline_mode<synchronous>, transform_indices = @transform_7, window_bounds = array<i64: 1, 64>}, {pipeline_mode = #tpu.pipeline_mode<synchronous>, transform_indices = @transform_8, window_bounds = array<i64: 1, 1>}, {transform_indices = @transform_9, window_bounds = array<i64: 1, 8>}]} {
    %c0 = arith.constant 0 : index
    %c0_0 = arith.constant 0 : index
    %0 = vector.load %arg1[%c0, %c0_0] : memref<1x512xf32, #tpu.memory_space<vmem>>, vector<1x512xf32>
    %cst = arith.constant 0.000000e+00 : f32
    %1 = vector.broadcast %cst : f32 to vector<1x8xf32>
    %cst_1 = arith.constant 0.000000e+00 : f32
    %2 = vector.broadcast %cst_1 : f32 to vector<1x80xf32>
    %3 = vector.extract_strided_slice %0 {offsets = [0, 0], sizes = [1, 64], strides = [1, 1]} : vector<1x512xf32> to vector<1x64xf32>
    %4 = tpu.concatenate %1, %3, %1 in 1 : vector<1x8xf32>, vector<1x64xf32>, vector<1x8xf32> -> vector<1x80xf32>
    %5 = vector.extract_strided_slice %0 {offsets = [0, 64], sizes = [1, 64], strides = [1, 1]} : vector<1x512xf32> to vector<1x64xf32>
    %6 = tpu.concatenate %1, %5, %1 in 1 : vector<1x8xf32>, vector<1x64xf32>, vector<1x8xf32> -> vector<1x80xf32>
    %7 = vector.extract_strided_slice %0 {offsets = [0, 128], sizes = [1, 64], strides = [1, 1]} : vector<1x512xf32> to vector<1x64xf32>
    %8 = tpu.concatenate %1, %7, %1 in 1 : vector<1x8xf32>, vector<1x64xf32>, vector<1x8xf32> -> vector<1x80xf32>
    %9 = vector.extract_strided_slice %0 {offsets = [0, 192], sizes = [1, 64], strides = [1, 1]} : vector<1x512xf32> to vector<1x64xf32>
    %10 = tpu.concatenate %1, %9, %1 in 1 : vector<1x8xf32>, vector<1x64xf32>, vector<1x8xf32> -> vector<1x80xf32>
    %11 = vector.extract_strided_slice %0 {offsets = [0, 256], sizes = [1, 64], strides = [1, 1]} : vector<1x512xf32> to vector<1x64xf32>
    %12 = tpu.concatenate %1, %11, %1 in 1 : vector<1x8xf32>, vector<1x64xf32>, vector<1x8xf32> -> vector<1x80xf32>
    %13 = vector.extract_strided_slice %0 {offsets = [0, 320], sizes = [1, 64], strides = [1, 1]} : vector<1x512xf32> to vector<1x64xf32>
    %14 = tpu.concatenate %1, %13, %1 in 1 : vector<1x8xf32>, vector<1x64xf32>, vector<1x8xf32> -> vector<1x80xf32>
    %15 = vector.extract_strided_slice %0 {offsets = [0, 384], sizes = [1, 64], strides = [1, 1]} : vector<1x512xf32> to vector<1x64xf32>
    %16 = tpu.concatenate %1, %15, %1 in 1 : vector<1x8xf32>, vector<1x64xf32>, vector<1x8xf32> -> vector<1x80xf32>
    %17 = vector.extract_strided_slice %0 {offsets = [0, 448], sizes = [1, 64], strides = [1, 1]} : vector<1x512xf32> to vector<1x64xf32>
    %18 = tpu.concatenate %1, %17, %1 in 1 : vector<1x8xf32>, vector<1x64xf32>, vector<1x8xf32> -> vector<1x80xf32>
    %19 = tpu.concatenate %2, %4, %6, %8, %10, %12, %14, %16, %18, %2 in 1 : vector<1x80xf32>, vector<1x80xf32>, vector<1x80xf32>, vector<1x80xf32>, vector<1x80xf32>, vector<1x80xf32>, vector<1x80xf32>, vector<1x80xf32>, vector<1x80xf32>, vector<1x80xf32> -> vector<1x800xf32>
    %c0_2 = arith.constant 0 : index
    %c0_3 = arith.constant 0 : index
    %20 = vector.load %arg3[%c0_2, %c0_3] : memref<16x1xf32, #tpu.memory_space<vmem>>, vector<16x1xf32>
    %21 = vector.shape_cast %20 : vector<16x1xf32> to vector<16x1xf32>
    %22 = vector.broadcast %21 : vector<16x1xf32> to vector<16x512xf32>
    %23 = vector.extract_strided_slice %19 {offsets = [0, 0], sizes = [1, 64], strides = [1, 1]} : vector<1x800xf32> to vector<1x64xf32>
    %24 = vector.extract_strided_slice %19 {offsets = [0, 80], sizes = [1, 64], strides = [1, 1]} : vector<1x800xf32> to vector<1x64xf32>
    %25 = vector.extract_strided_slice %19 {offsets = [0, 160], sizes = [1, 64], strides = [1, 1]} : vector<1x800xf32> to vector<1x64xf32>
    %26 = vector.extract_strided_slice %19 {offsets = [0, 240], sizes = [1, 64], strides = [1, 1]} : vector<1x800xf32> to vector<1x64xf32>
    %27 = vector.extract_strided_slice %19 {offsets = [0, 320], sizes = [1, 64], strides = [1, 1]} : vector<1x800xf32> to vector<1x64xf32>
    %28 = vector.extract_strided_slice %19 {offsets = [0, 400], sizes = [1, 64], strides = [1, 1]} : vector<1x800xf32> to vector<1x64xf32>
    %29 = vector.extract_strided_slice %19 {offsets = [0, 480], sizes = [1, 64], strides = [1, 1]} : vector<1x800xf32> to vector<1x64xf32>
    %30 = vector.extract_strided_slice %19 {offsets = [0, 560], sizes = [1, 64], strides = [1, 1]} : vector<1x800xf32> to vector<1x64xf32>
    %31 = tpu.concatenate %23, %24, %25, %26, %27, %28, %29, %30 in 1 : vector<1x64xf32>, vector<1x64xf32>, vector<1x64xf32>, vector<1x64xf32>, vector<1x64xf32>, vector<1x64xf32>, vector<1x64xf32>, vector<1x64xf32> -> vector<1x512xf32>
    %c0_4 = arith.constant 0 : index
    %c0_5 = arith.constant 0 : index
    %32 = vector.load %arg2[%c0_4, %c0_5] : memref<16x9xf32, #tpu.memory_space<vmem>>, vector<16x1xf32>
    %33 = vector.broadcast %32 : vector<16x1xf32> to vector<16x512xf32>
    %34 = vector.broadcast %31 : vector<1x512xf32> to vector<16x512xf32>
    %35 = arith.mulf %33, %34 : vector<16x512xf32>
    %36 = arith.addf %22, %35 : vector<16x512xf32>
    %37 = vector.extract_strided_slice %19 {offsets = [0, 8], sizes = [1, 64], strides = [1, 1]} : vector<1x800xf32> to vector<1x64xf32>
    %38 = vector.extract_strided_slice %19 {offsets = [0, 88], sizes = [1, 64], strides = [1, 1]} : vector<1x800xf32> to vector<1x64xf32>
    %39 = vector.extract_strided_slice %19 {offsets = [0, 168], sizes = [1, 64], strides = [1, 1]} : vector<1x800xf32> to vector<1x64xf32>
    %40 = vector.extract_strided_slice %19 {offsets = [0, 248], sizes = [1, 64], strides = [1, 1]} : vector<1x800xf32> to vector<1x64xf32>
    %41 = vector.extract_strided_slice %19 {offsets = [0, 328], sizes = [1, 64], strides = [1, 1]} : vector<1x800xf32> to vector<1x64xf32>
    %42 = vector.extract_strided_slice %19 {offsets = [0, 408], sizes = [1, 64], strides = [1, 1]} : vector<1x800xf32> to vector<1x64xf32>
    %43 = vector.extract_strided_slice %19 {offsets = [0, 488], sizes = [1, 64], strides = [1, 1]} : vector<1x800xf32> to vector<1x64xf32>
    %44 = vector.extract_strided_slice %19 {offsets = [0, 568], sizes = [1, 64], strides = [1, 1]} : vector<1x800xf32> to vector<1x64xf32>
    %45 = tpu.concatenate %37, %38, %39, %40, %41, %42, %43, %44 in 1 : vector<1x64xf32>, vector<1x64xf32>, vector<1x64xf32>, vector<1x64xf32>, vector<1x64xf32>, vector<1x64xf32>, vector<1x64xf32>, vector<1x64xf32> -> vector<1x512xf32>
    %c0_6 = arith.constant 0 : index
    %c1 = arith.constant 1 : index
    %46 = vector.load %arg2[%c0_6, %c1] : memref<16x9xf32, #tpu.memory_space<vmem>>, vector<16x1xf32>
    %47 = vector.broadcast %46 : vector<16x1xf32> to vector<16x512xf32>
    %48 = vector.broadcast %45 : vector<1x512xf32> to vector<16x512xf32>
    %49 = arith.mulf %47, %48 : vector<16x512xf32>
    %50 = arith.addf %36, %49 : vector<16x512xf32>
    %51 = vector.extract_strided_slice %19 {offsets = [0, 16], sizes = [1, 64], strides = [1, 1]} : vector<1x800xf32> to vector<1x64xf32>
    %52 = vector.extract_strided_slice %19 {offsets = [0, 96], sizes = [1, 64], strides = [1, 1]} : vector<1x800xf32> to vector<1x64xf32>
    %53 = vector.extract_strided_slice %19 {offsets = [0, 176], sizes = [1, 64], strides = [1, 1]} : vector<1x800xf32> to vector<1x64xf32>
    %54 = vector.extract_strided_slice %19 {offsets = [0, 256], sizes = [1, 64], strides = [1, 1]} : vector<1x800xf32> to vector<1x64xf32>
    %55 = vector.extract_strided_slice %19 {offsets = [0, 336], sizes = [1, 64], strides = [1, 1]} : vector<1x800xf32> to vector<1x64xf32>
    %56 = vector.extract_strided_slice %19 {offsets = [0, 416], sizes = [1, 64], strides = [1, 1]} : vector<1x800xf32> to vector<1x64xf32>
    %57 = vector.extract_strided_slice %19 {offsets = [0, 496], sizes = [1, 64], strides = [1, 1]} : vector<1x800xf32> to vector<1x64xf32>
    %58 = vector.extract_strided_slice %19 {offsets = [0, 576], sizes = [1, 64], strides = [1, 1]} : vector<1x800xf32> to vector<1x64xf32>
    %59 = tpu.concatenate %51, %52, %53, %54, %55, %56, %57, %58 in 1 : vector<1x64xf32>, vector<1x64xf32>, vector<1x64xf32>, vector<1x64xf32>, vector<1x64xf32>, vector<1x64xf32>, vector<1x64xf32>, vector<1x64xf32> -> vector<1x512xf32>
    %c0_7 = arith.constant 0 : index
    %c2 = arith.constant 2 : index
    %60 = vector.load %arg2[%c0_7, %c2] : memref<16x9xf32, #tpu.memory_space<vmem>>, vector<16x1xf32>
    %61 = vector.broadcast %60 : vector<16x1xf32> to vector<16x512xf32>
    %62 = vector.broadcast %59 : vector<1x512xf32> to vector<16x512xf32>
    %63 = arith.mulf %61, %62 : vector<16x512xf32>
    %64 = arith.addf %50, %63 : vector<16x512xf32>
    %65 = vector.extract_strided_slice %19 {offsets = [0, 80], sizes = [1, 64], strides = [1, 1]} : vector<1x800xf32> to vector<1x64xf32>
    %66 = vector.extract_strided_slice %19 {offsets = [0, 160], sizes = [1, 64], strides = [1, 1]} : vector<1x800xf32> to vector<1x64xf32>
    %67 = vector.extract_strided_slice %19 {offsets = [0, 240], sizes = [1, 64], strides = [1, 1]} : vector<1x800xf32> to vector<1x64xf32>
    %68 = vector.extract_strided_slice %19 {offsets = [0, 320], sizes = [1, 64], strides = [1, 1]} : vector<1x800xf32> to vector<1x64xf32>
    %69 = vector.extract_strided_slice %19 {offsets = [0, 400], sizes = [1, 64], strides = [1, 1]} : vector<1x800xf32> to vector<1x64xf32>
    %70 = vector.extract_strided_slice %19 {offsets = [0, 480], sizes = [1, 64], strides = [1, 1]} : vector<1x800xf32> to vector<1x64xf32>
    %71 = vector.extract_strided_slice %19 {offsets = [0, 560], sizes = [1, 64], strides = [1, 1]} : vector<1x800xf32> to vector<1x64xf32>
    %72 = vector.extract_strided_slice %19 {offsets = [0, 640], sizes = [1, 64], strides = [1, 1]} : vector<1x800xf32> to vector<1x64xf32>
    %73 = tpu.concatenate %65, %66, %67, %68, %69, %70, %71, %72 in 1 : vector<1x64xf32>, vector<1x64xf32>, vector<1x64xf32>, vector<1x64xf32>, vector<1x64xf32>, vector<1x64xf32>, vector<1x64xf32>, vector<1x64xf32> -> vector<1x512xf32>
    %c0_8 = arith.constant 0 : index
    %c3 = arith.constant 3 : index
    %74 = vector.load %arg2[%c0_8, %c3] : memref<16x9xf32, #tpu.memory_space<vmem>>, vector<16x1xf32>
    %75 = vector.broadcast %74 : vector<16x1xf32> to vector<16x512xf32>
    %76 = vector.broadcast %73 : vector<1x512xf32> to vector<16x512xf32>
    %77 = arith.mulf %75, %76 : vector<16x512xf32>
    %78 = arith.addf %64, %77 : vector<16x512xf32>
    %79 = vector.extract_strided_slice %19 {offsets = [0, 88], sizes = [1, 64], strides = [1, 1]} : vector<1x800xf32> to vector<1x64xf32>
    %80 = vector.extract_strided_slice %19 {offsets = [0, 168], sizes = [1, 64], strides = [1, 1]} : vector<1x800xf32> to vector<1x64xf32>
    %81 = vector.extract_strided_slice %19 {offsets = [0, 248], sizes = [1, 64], strides = [1, 1]} : vector<1x800xf32> to vector<1x64xf32>
    %82 = vector.extract_strided_slice %19 {offsets = [0, 328], sizes = [1, 64], strides = [1, 1]} : vector<1x800xf32> to vector<1x64xf32>
    %83 = vector.extract_strided_slice %19 {offsets = [0, 408], sizes = [1, 64], strides = [1, 1]} : vector<1x800xf32> to vector<1x64xf32>
    %84 = vector.extract_strided_slice %19 {offsets = [0, 488], sizes = [1, 64], strides = [1, 1]} : vector<1x800xf32> to vector<1x64xf32>
    %85 = vector.extract_strided_slice %19 {offsets = [0, 568], sizes = [1, 64], strides = [1, 1]} : vector<1x800xf32> to vector<1x64xf32>
    %86 = vector.extract_strided_slice %19 {offsets = [0, 648], sizes = [1, 64], strides = [1, 1]} : vector<1x800xf32> to vector<1x64xf32>
    %87 = tpu.concatenate %79, %80, %81, %82, %83, %84, %85, %86 in 1 : vector<1x64xf32>, vector<1x64xf32>, vector<1x64xf32>, vector<1x64xf32>, vector<1x64xf32>, vector<1x64xf32>, vector<1x64xf32>, vector<1x64xf32> -> vector<1x512xf32>
    %c0_9 = arith.constant 0 : index
    %c4 = arith.constant 4 : index
    %88 = vector.load %arg2[%c0_9, %c4] : memref<16x9xf32, #tpu.memory_space<vmem>>, vector<16x1xf32>
    %89 = vector.broadcast %88 : vector<16x1xf32> to vector<16x512xf32>
    %90 = vector.broadcast %87 : vector<1x512xf32> to vector<16x512xf32>
    %91 = arith.mulf %89, %90 : vector<16x512xf32>
    %92 = arith.addf %78, %91 : vector<16x512xf32>
    %93 = vector.extract_strided_slice %19 {offsets = [0, 96], sizes = [1, 64], strides = [1, 1]} : vector<1x800xf32> to vector<1x64xf32>
    %94 = vector.extract_strided_slice %19 {offsets = [0, 176], sizes = [1, 64], strides = [1, 1]} : vector<1x800xf32> to vector<1x64xf32>
    %95 = vector.extract_strided_slice %19 {offsets = [0, 256], sizes = [1, 64], strides = [1, 1]} : vector<1x800xf32> to vector<1x64xf32>
    %96 = vector.extract_strided_slice %19 {offsets = [0, 336], sizes = [1, 64], strides = [1, 1]} : vector<1x800xf32> to vector<1x64xf32>
    %97 = vector.extract_strided_slice %19 {offsets = [0, 416], sizes = [1, 64], strides = [1, 1]} : vector<1x800xf32> to vector<1x64xf32>
    %98 = vector.extract_strided_slice %19 {offsets = [0, 496], sizes = [1, 64], strides = [1, 1]} : vector<1x800xf32> to vector<1x64xf32>
    %99 = vector.extract_strided_slice %19 {offsets = [0, 576], sizes = [1, 64], strides = [1, 1]} : vector<1x800xf32> to vector<1x64xf32>
    %100 = vector.extract_strided_slice %19 {offsets = [0, 656], sizes = [1, 64], strides = [1, 1]} : vector<1x800xf32> to vector<1x64xf32>
    %101 = tpu.concatenate %93, %94, %95, %96, %97, %98, %99, %100 in 1 : vector<1x64xf32>, vector<1x64xf32>, vector<1x64xf32>, vector<1x64xf32>, vector<1x64xf32>, vector<1x64xf32>, vector<1x64xf32>, vector<1x64xf32> -> vector<1x512xf32>
    %c0_10 = arith.constant 0 : index
    %c5 = arith.constant 5 : index
    %102 = vector.load %arg2[%c0_10, %c5] : memref<16x9xf32, #tpu.memory_space<vmem>>, vector<16x1xf32>
    %103 = vector.broadcast %102 : vector<16x1xf32> to vector<16x512xf32>
    %104 = vector.broadcast %101 : vector<1x512xf32> to vector<16x512xf32>
    %105 = arith.mulf %103, %104 : vector<16x512xf32>
    %106 = arith.addf %92, %105 : vector<16x512xf32>
    %107 = vector.extract_strided_slice %19 {offsets = [0, 160], sizes = [1, 64], strides = [1, 1]} : vector<1x800xf32> to vector<1x64xf32>
    %108 = vector.extract_strided_slice %19 {offsets = [0, 240], sizes = [1, 64], strides = [1, 1]} : vector<1x800xf32> to vector<1x64xf32>
    %109 = vector.extract_strided_slice %19 {offsets = [0, 320], sizes = [1, 64], strides = [1, 1]} : vector<1x800xf32> to vector<1x64xf32>
    %110 = vector.extract_strided_slice %19 {offsets = [0, 400], sizes = [1, 64], strides = [1, 1]} : vector<1x800xf32> to vector<1x64xf32>
    %111 = vector.extract_strided_slice %19 {offsets = [0, 480], sizes = [1, 64], strides = [1, 1]} : vector<1x800xf32> to vector<1x64xf32>
    %112 = vector.extract_strided_slice %19 {offsets = [0, 560], sizes = [1, 64], strides = [1, 1]} : vector<1x800xf32> to vector<1x64xf32>
    %113 = vector.extract_strided_slice %19 {offsets = [0, 640], sizes = [1, 64], strides = [1, 1]} : vector<1x800xf32> to vector<1x64xf32>
    %114 = vector.extract_strided_slice %19 {offsets = [0, 720], sizes = [1, 64], strides = [1, 1]} : vector<1x800xf32> to vector<1x64xf32>
    %115 = tpu.concatenate %107, %108, %109, %110, %111, %112, %113, %114 in 1 : vector<1x64xf32>, vector<1x64xf32>, vector<1x64xf32>, vector<1x64xf32>, vector<1x64xf32>, vector<1x64xf32>, vector<1x64xf32>, vector<1x64xf32> -> vector<1x512xf32>
    %c0_11 = arith.constant 0 : index
    %c6 = arith.constant 6 : index
    %116 = vector.load %arg2[%c0_11, %c6] : memref<16x9xf32, #tpu.memory_space<vmem>>, vector<16x1xf32>
    %117 = vector.broadcast %116 : vector<16x1xf32> to vector<16x512xf32>
    %118 = vector.broadcast %115 : vector<1x512xf32> to vector<16x512xf32>
    %119 = arith.mulf %117, %118 : vector<16x512xf32>
    %120 = arith.addf %106, %119 : vector<16x512xf32>
    %121 = vector.extract_strided_slice %19 {offsets = [0, 168], sizes = [1, 64], strides = [1, 1]} : vector<1x800xf32> to vector<1x64xf32>
    %122 = vector.extract_strided_slice %19 {offsets = [0, 248], sizes = [1, 64], strides = [1, 1]} : vector<1x800xf32> to vector<1x64xf32>
    %123 = vector.extract_strided_slice %19 {offsets = [0, 328], sizes = [1, 64], strides = [1, 1]} : vector<1x800xf32> to vector<1x64xf32>
    %124 = vector.extract_strided_slice %19 {offsets = [0, 408], sizes = [1, 64], strides = [1, 1]} : vector<1x800xf32> to vector<1x64xf32>
    %125 = vector.extract_strided_slice %19 {offsets = [0, 488], sizes = [1, 64], strides = [1, 1]} : vector<1x800xf32> to vector<1x64xf32>
    %126 = vector.extract_strided_slice %19 {offsets = [0, 568], sizes = [1, 64], strides = [1, 1]} : vector<1x800xf32> to vector<1x64xf32>
    %127 = vector.extract_strided_slice %19 {offsets = [0, 648], sizes = [1, 64], strides = [1, 1]} : vector<1x800xf32> to vector<1x64xf32>
    %128 = vector.extract_strided_slice %19 {offsets = [0, 728], sizes = [1, 64], strides = [1, 1]} : vector<1x800xf32> to vector<1x64xf32>
    %129 = tpu.concatenate %121, %122, %123, %124, %125, %126, %127, %128 in 1 : vector<1x64xf32>, vector<1x64xf32>, vector<1x64xf32>, vector<1x64xf32>, vector<1x64xf32>, vector<1x64xf32>, vector<1x64xf32>, vector<1x64xf32> -> vector<1x512xf32>
    %c0_12 = arith.constant 0 : index
    %c7 = arith.constant 7 : index
    %130 = vector.load %arg2[%c0_12, %c7] : memref<16x9xf32, #tpu.memory_space<vmem>>, vector<16x1xf32>
    %131 = vector.broadcast %130 : vector<16x1xf32> to vector<16x512xf32>
    %132 = vector.broadcast %129 : vector<1x512xf32> to vector<16x512xf32>
    %133 = arith.mulf %131, %132 : vector<16x512xf32>
    %134 = arith.addf %120, %133 : vector<16x512xf32>
    %135 = vector.extract_strided_slice %19 {offsets = [0, 176], sizes = [1, 64], strides = [1, 1]} : vector<1x800xf32> to vector<1x64xf32>
    %136 = vector.extract_strided_slice %19 {offsets = [0, 256], sizes = [1, 64], strides = [1, 1]} : vector<1x800xf32> to vector<1x64xf32>
    %137 = vector.extract_strided_slice %19 {offsets = [0, 336], sizes = [1, 64], strides = [1, 1]} : vector<1x800xf32> to vector<1x64xf32>
    %138 = vector.extract_strided_slice %19 {offsets = [0, 416], sizes = [1, 64], strides = [1, 1]} : vector<1x800xf32> to vector<1x64xf32>
    %139 = vector.extract_strided_slice %19 {offsets = [0, 496], sizes = [1, 64], strides = [1, 1]} : vector<1x800xf32> to vector<1x64xf32>
    %140 = vector.extract_strided_slice %19 {offsets = [0, 576], sizes = [1, 64], strides = [1, 1]} : vector<1x800xf32> to vector<1x64xf32>
    %141 = vector.extract_strided_slice %19 {offsets = [0, 656], sizes = [1, 64], strides = [1, 1]} : vector<1x800xf32> to vector<1x64xf32>
    %142 = vector.extract_strided_slice %19 {offsets = [0, 736], sizes = [1, 64], strides = [1, 1]} : vector<1x800xf32> to vector<1x64xf32>
    %143 = tpu.concatenate %135, %136, %137, %138, %139, %140, %141, %142 in 1 : vector<1x64xf32>, vector<1x64xf32>, vector<1x64xf32>, vector<1x64xf32>, vector<1x64xf32>, vector<1x64xf32>, vector<1x64xf32>, vector<1x64xf32> -> vector<1x512xf32>
    %c0_13 = arith.constant 0 : index
    %c8 = arith.constant 8 : index
    %144 = vector.load %arg2[%c0_13, %c8] : memref<16x9xf32, #tpu.memory_space<vmem>>, vector<16x1xf32>
    %145 = vector.broadcast %144 : vector<16x1xf32> to vector<16x512xf32>
    %146 = vector.broadcast %143 : vector<1x512xf32> to vector<16x512xf32>
    %147 = arith.mulf %145, %146 : vector<16x512xf32>
    %148 = arith.addf %134, %147 : vector<16x512xf32>
    %cst_14 = arith.constant 0.000000e+00 : f32
    %149 = vector.broadcast %cst_14 : f32 to vector<16x512xf32>
    %150 = arith.maximumf %148, %149 : vector<16x512xf32>
    %151 = arith.truncf %150 : vector<16x512xf32> to vector<16x512xbf16>
    %cst_15 = arith.constant 0.000000e+00 : bf16
    %152 = vector.broadcast %cst_15 : bf16 to vector<16x8xbf16>
    %cst_16 = arith.constant 0.000000e+00 : bf16
    %153 = vector.broadcast %cst_16 : bf16 to vector<16x80xbf16>
    %154 = vector.extract_strided_slice %151 {offsets = [0, 0], sizes = [16, 64], strides = [1, 1]} : vector<16x512xbf16> to vector<16x64xbf16>
    %155 = tpu.concatenate %152, %154, %152 in 1 : vector<16x8xbf16>, vector<16x64xbf16>, vector<16x8xbf16> -> vector<16x80xbf16>
    %156 = vector.extract_strided_slice %151 {offsets = [0, 64], sizes = [16, 64], strides = [1, 1]} : vector<16x512xbf16> to vector<16x64xbf16>
    %157 = tpu.concatenate %152, %156, %152 in 1 : vector<16x8xbf16>, vector<16x64xbf16>, vector<16x8xbf16> -> vector<16x80xbf16>
    %158 = vector.extract_strided_slice %151 {offsets = [0, 128], sizes = [16, 64], strides = [1, 1]} : vector<16x512xbf16> to vector<16x64xbf16>
    %159 = tpu.concatenate %152, %158, %152 in 1 : vector<16x8xbf16>, vector<16x64xbf16>, vector<16x8xbf16> -> vector<16x80xbf16>
    %160 = vector.extract_strided_slice %151 {offsets = [0, 192], sizes = [16, 64], strides = [1, 1]} : vector<16x512xbf16> to vector<16x64xbf16>
    %161 = tpu.concatenate %152, %160, %152 in 1 : vector<16x8xbf16>, vector<16x64xbf16>, vector<16x8xbf16> -> vector<16x80xbf16>
    %162 = vector.extract_strided_slice %151 {offsets = [0, 256], sizes = [16, 64], strides = [1, 1]} : vector<16x512xbf16> to vector<16x64xbf16>
    %163 = tpu.concatenate %152, %162, %152 in 1 : vector<16x8xbf16>, vector<16x64xbf16>, vector<16x8xbf16> -> vector<16x80xbf16>
    %164 = vector.extract_strided_slice %151 {offsets = [0, 320], sizes = [16, 64], strides = [1, 1]} : vector<16x512xbf16> to vector<16x64xbf16>
    %165 = tpu.concatenate %152, %164, %152 in 1 : vector<16x8xbf16>, vector<16x64xbf16>, vector<16x8xbf16> -> vector<16x80xbf16>
    %166 = vector.extract_strided_slice %151 {offsets = [0, 384], sizes = [16, 64], strides = [1, 1]} : vector<16x512xbf16> to vector<16x64xbf16>
    %167 = tpu.concatenate %152, %166, %152 in 1 : vector<16x8xbf16>, vector<16x64xbf16>, vector<16x8xbf16> -> vector<16x80xbf16>
    %168 = vector.extract_strided_slice %151 {offsets = [0, 448], sizes = [16, 64], strides = [1, 1]} : vector<16x512xbf16> to vector<16x64xbf16>
    %169 = tpu.concatenate %152, %168, %152 in 1 : vector<16x8xbf16>, vector<16x64xbf16>, vector<16x8xbf16> -> vector<16x80xbf16>
    %170 = tpu.concatenate %153, %155, %157, %159, %161, %163, %165, %167, %169, %153 in 1 : vector<16x80xbf16>, vector<16x80xbf16>, vector<16x80xbf16>, vector<16x80xbf16>, vector<16x80xbf16>, vector<16x80xbf16>, vector<16x80xbf16>, vector<16x80xbf16>, vector<16x80xbf16>, vector<16x80xbf16> -> vector<16x800xbf16>
    %c0_17 = arith.constant 0 : index
    %c0_18 = arith.constant 0 : index
    %171 = vector.load %arg5[%c0_17, %c0_18] : memref<32x1xf32, #tpu.memory_space<vmem>>, vector<32x1xf32>
    %172 = vector.shape_cast %171 : vector<32x1xf32> to vector<32x1xf32>
    %173 = vector.broadcast %172 : vector<32x1xf32> to vector<32x512xf32>
    %174 = vector.extract_strided_slice %170 {offsets = [0, 0], sizes = [16, 64], strides = [1, 1]} : vector<16x800xbf16> to vector<16x64xbf16>
    %175 = vector.extract_strided_slice %170 {offsets = [0, 80], sizes = [16, 64], strides = [1, 1]} : vector<16x800xbf16> to vector<16x64xbf16>
    %176 = vector.extract_strided_slice %170 {offsets = [0, 160], sizes = [16, 64], strides = [1, 1]} : vector<16x800xbf16> to vector<16x64xbf16>
    %177 = vector.extract_strided_slice %170 {offsets = [0, 240], sizes = [16, 64], strides = [1, 1]} : vector<16x800xbf16> to vector<16x64xbf16>
    %178 = vector.extract_strided_slice %170 {offsets = [0, 320], sizes = [16, 64], strides = [1, 1]} : vector<16x800xbf16> to vector<16x64xbf16>
    %179 = vector.extract_strided_slice %170 {offsets = [0, 400], sizes = [16, 64], strides = [1, 1]} : vector<16x800xbf16> to vector<16x64xbf16>
    %180 = vector.extract_strided_slice %170 {offsets = [0, 480], sizes = [16, 64], strides = [1, 1]} : vector<16x800xbf16> to vector<16x64xbf16>
    %181 = vector.extract_strided_slice %170 {offsets = [0, 560], sizes = [16, 64], strides = [1, 1]} : vector<16x800xbf16> to vector<16x64xbf16>
    %182 = tpu.concatenate %174, %175, %176, %177, %178, %179, %180, %181 in 1 : vector<16x64xbf16>, vector<16x64xbf16>, vector<16x64xbf16>, vector<16x64xbf16>, vector<16x64xbf16>, vector<16x64xbf16>, vector<16x64xbf16>, vector<16x64xbf16> -> vector<16x512xbf16>
    %c0_19 = arith.constant 0 : index
    %c0_20 = arith.constant 0 : index
    %183 = vector.load %arg4[%c0_19, %c0_20] : memref<288x16xbf16, #tpu.memory_space<vmem>>, vector<32x16xbf16>
    %cst_21 = arith.constant dense<0.000000e+00> : vector<32x512xf32>
    %184 = tpu.matmul %183, %182, %cst_21 {dimension_numbers = #tpu.dot_dimension_numbers<[1], [0], [0], [1], [0, 0, 1, 1], [], []>} : vector<32x16xbf16>, vector<16x512xbf16>, vector<32x512xf32> -> vector<32x512xf32>
    %185 = arith.addf %173, %184 : vector<32x512xf32>
    %186 = vector.extract_strided_slice %170 {offsets = [0, 8], sizes = [16, 64], strides = [1, 1]} : vector<16x800xbf16> to vector<16x64xbf16>
    %187 = vector.extract_strided_slice %170 {offsets = [0, 88], sizes = [16, 64], strides = [1, 1]} : vector<16x800xbf16> to vector<16x64xbf16>
    %188 = vector.extract_strided_slice %170 {offsets = [0, 168], sizes = [16, 64], strides = [1, 1]} : vector<16x800xbf16> to vector<16x64xbf16>
    %189 = vector.extract_strided_slice %170 {offsets = [0, 248], sizes = [16, 64], strides = [1, 1]} : vector<16x800xbf16> to vector<16x64xbf16>
    %190 = vector.extract_strided_slice %170 {offsets = [0, 328], sizes = [16, 64], strides = [1, 1]} : vector<16x800xbf16> to vector<16x64xbf16>
    %191 = vector.extract_strided_slice %170 {offsets = [0, 408], sizes = [16, 64], strides = [1, 1]} : vector<16x800xbf16> to vector<16x64xbf16>
    %192 = vector.extract_strided_slice %170 {offsets = [0, 488], sizes = [16, 64], strides = [1, 1]} : vector<16x800xbf16> to vector<16x64xbf16>
    %193 = vector.extract_strided_slice %170 {offsets = [0, 568], sizes = [16, 64], strides = [1, 1]} : vector<16x800xbf16> to vector<16x64xbf16>
    %194 = tpu.concatenate %186, %187, %188, %189, %190, %191, %192, %193 in 1 : vector<16x64xbf16>, vector<16x64xbf16>, vector<16x64xbf16>, vector<16x64xbf16>, vector<16x64xbf16>, vector<16x64xbf16>, vector<16x64xbf16>, vector<16x64xbf16> -> vector<16x512xbf16>
    %c32 = arith.constant 32 : index
    %c0_22 = arith.constant 0 : index
    %195 = vector.load %arg4[%c32, %c0_22] : memref<288x16xbf16, #tpu.memory_space<vmem>>, vector<32x16xbf16>
    %cst_23 = arith.constant dense<0.000000e+00> : vector<32x512xf32>
    %196 = tpu.matmul %195, %194, %cst_23 {dimension_numbers = #tpu.dot_dimension_numbers<[1], [0], [0], [1], [0, 0, 1, 1], [], []>} : vector<32x16xbf16>, vector<16x512xbf16>, vector<32x512xf32> -> vector<32x512xf32>
    %197 = arith.addf %185, %196 : vector<32x512xf32>
    %198 = vector.extract_strided_slice %170 {offsets = [0, 16], sizes = [16, 64], strides = [1, 1]} : vector<16x800xbf16> to vector<16x64xbf16>
    %199 = vector.extract_strided_slice %170 {offsets = [0, 96], sizes = [16, 64], strides = [1, 1]} : vector<16x800xbf16> to vector<16x64xbf16>
    %200 = vector.extract_strided_slice %170 {offsets = [0, 176], sizes = [16, 64], strides = [1, 1]} : vector<16x800xbf16> to vector<16x64xbf16>
    %201 = vector.extract_strided_slice %170 {offsets = [0, 256], sizes = [16, 64], strides = [1, 1]} : vector<16x800xbf16> to vector<16x64xbf16>
    %202 = vector.extract_strided_slice %170 {offsets = [0, 336], sizes = [16, 64], strides = [1, 1]} : vector<16x800xbf16> to vector<16x64xbf16>
    %203 = vector.extract_strided_slice %170 {offsets = [0, 416], sizes = [16, 64], strides = [1, 1]} : vector<16x800xbf16> to vector<16x64xbf16>
    %204 = vector.extract_strided_slice %170 {offsets = [0, 496], sizes = [16, 64], strides = [1, 1]} : vector<16x800xbf16> to vector<16x64xbf16>
    %205 = vector.extract_strided_slice %170 {offsets = [0, 576], sizes = [16, 64], strides = [1, 1]} : vector<16x800xbf16> to vector<16x64xbf16>
    %206 = tpu.concatenate %198, %199, %200, %201, %202, %203, %204, %205 in 1 : vector<16x64xbf16>, vector<16x64xbf16>, vector<16x64xbf16>, vector<16x64xbf16>, vector<16x64xbf16>, vector<16x64xbf16>, vector<16x64xbf16>, vector<16x64xbf16> -> vector<16x512xbf16>
    %c64 = arith.constant 64 : index
    %c0_24 = arith.constant 0 : index
    %207 = vector.load %arg4[%c64, %c0_24] : memref<288x16xbf16, #tpu.memory_space<vmem>>, vector<32x16xbf16>
    %cst_25 = arith.constant dense<0.000000e+00> : vector<32x512xf32>
    %208 = tpu.matmul %207, %206, %cst_25 {dimension_numbers = #tpu.dot_dimension_numbers<[1], [0], [0], [1], [0, 0, 1, 1], [], []>} : vector<32x16xbf16>, vector<16x512xbf16>, vector<32x512xf32> -> vector<32x512xf32>
    %209 = arith.addf %197, %208 : vector<32x512xf32>
    %210 = vector.extract_strided_slice %170 {offsets = [0, 80], sizes = [16, 64], strides = [1, 1]} : vector<16x800xbf16> to vector<16x64xbf16>
    %211 = vector.extract_strided_slice %170 {offsets = [0, 160], sizes = [16, 64], strides = [1, 1]} : vector<16x800xbf16> to vector<16x64xbf16>
    %212 = vector.extract_strided_slice %170 {offsets = [0, 240], sizes = [16, 64], strides = [1, 1]} : vector<16x800xbf16> to vector<16x64xbf16>
    %213 = vector.extract_strided_slice %170 {offsets = [0, 320], sizes = [16, 64], strides = [1, 1]} : vector<16x800xbf16> to vector<16x64xbf16>
    %214 = vector.extract_strided_slice %170 {offsets = [0, 400], sizes = [16, 64], strides = [1, 1]} : vector<16x800xbf16> to vector<16x64xbf16>
    %215 = vector.extract_strided_slice %170 {offsets = [0, 480], sizes = [16, 64], strides = [1, 1]} : vector<16x800xbf16> to vector<16x64xbf16>
    %216 = vector.extract_strided_slice %170 {offsets = [0, 560], sizes = [16, 64], strides = [1, 1]} : vector<16x800xbf16> to vector<16x64xbf16>
    %217 = vector.extract_strided_slice %170 {offsets = [0, 640], sizes = [16, 64], strides = [1, 1]} : vector<16x800xbf16> to vector<16x64xbf16>
    %218 = tpu.concatenate %210, %211, %212, %213, %214, %215, %216, %217 in 1 : vector<16x64xbf16>, vector<16x64xbf16>, vector<16x64xbf16>, vector<16x64xbf16>, vector<16x64xbf16>, vector<16x64xbf16>, vector<16x64xbf16>, vector<16x64xbf16> -> vector<16x512xbf16>
    %c96 = arith.constant 96 : index
    %c0_26 = arith.constant 0 : index
    %219 = vector.load %arg4[%c96, %c0_26] : memref<288x16xbf16, #tpu.memory_space<vmem>>, vector<32x16xbf16>
    %cst_27 = arith.constant dense<0.000000e+00> : vector<32x512xf32>
    %220 = tpu.matmul %219, %218, %cst_27 {dimension_numbers = #tpu.dot_dimension_numbers<[1], [0], [0], [1], [0, 0, 1, 1], [], []>} : vector<32x16xbf16>, vector<16x512xbf16>, vector<32x512xf32> -> vector<32x512xf32>
    %221 = arith.addf %209, %220 : vector<32x512xf32>
    %222 = vector.extract_strided_slice %170 {offsets = [0, 88], sizes = [16, 64], strides = [1, 1]} : vector<16x800xbf16> to vector<16x64xbf16>
    %223 = vector.extract_strided_slice %170 {offsets = [0, 168], sizes = [16, 64], strides = [1, 1]} : vector<16x800xbf16> to vector<16x64xbf16>
    %224 = vector.extract_strided_slice %170 {offsets = [0, 248], sizes = [16, 64], strides = [1, 1]} : vector<16x800xbf16> to vector<16x64xbf16>
    %225 = vector.extract_strided_slice %170 {offsets = [0, 328], sizes = [16, 64], strides = [1, 1]} : vector<16x800xbf16> to vector<16x64xbf16>
    %226 = vector.extract_strided_slice %170 {offsets = [0, 408], sizes = [16, 64], strides = [1, 1]} : vector<16x800xbf16> to vector<16x64xbf16>
    %227 = vector.extract_strided_slice %170 {offsets = [0, 488], sizes = [16, 64], strides = [1, 1]} : vector<16x800xbf16> to vector<16x64xbf16>
    %228 = vector.extract_strided_slice %170 {offsets = [0, 568], sizes = [16, 64], strides = [1, 1]} : vector<16x800xbf16> to vector<16x64xbf16>
    %229 = vector.extract_strided_slice %170 {offsets = [0, 648], sizes = [16, 64], strides = [1, 1]} : vector<16x800xbf16> to vector<16x64xbf16>
    %230 = tpu.concatenate %222, %223, %224, %225, %226, %227, %228, %229 in 1 : vector<16x64xbf16>, vector<16x64xbf16>, vector<16x64xbf16>, vector<16x64xbf16>, vector<16x64xbf16>, vector<16x64xbf16>, vector<16x64xbf16>, vector<16x64xbf16> -> vector<16x512xbf16>
    %c128 = arith.constant 128 : index
    %c0_28 = arith.constant 0 : index
    %231 = vector.load %arg4[%c128, %c0_28] : memref<288x16xbf16, #tpu.memory_space<vmem>>, vector<32x16xbf16>
    %cst_29 = arith.constant dense<0.000000e+00> : vector<32x512xf32>
    %232 = tpu.matmul %231, %230, %cst_29 {dimension_numbers = #tpu.dot_dimension_numbers<[1], [0], [0], [1], [0, 0, 1, 1], [], []>} : vector<32x16xbf16>, vector<16x512xbf16>, vector<32x512xf32> -> vector<32x512xf32>
    %233 = arith.addf %221, %232 : vector<32x512xf32>
    %234 = vector.extract_strided_slice %170 {offsets = [0, 96], sizes = [16, 64], strides = [1, 1]} : vector<16x800xbf16> to vector<16x64xbf16>
    %235 = vector.extract_strided_slice %170 {offsets = [0, 176], sizes = [16, 64], strides = [1, 1]} : vector<16x800xbf16> to vector<16x64xbf16>
    %236 = vector.extract_strided_slice %170 {offsets = [0, 256], sizes = [16, 64], strides = [1, 1]} : vector<16x800xbf16> to vector<16x64xbf16>
    %237 = vector.extract_strided_slice %170 {offsets = [0, 336], sizes = [16, 64], strides = [1, 1]} : vector<16x800xbf16> to vector<16x64xbf16>
    %238 = vector.extract_strided_slice %170 {offsets = [0, 416], sizes = [16, 64], strides = [1, 1]} : vector<16x800xbf16> to vector<16x64xbf16>
    %239 = vector.extract_strided_slice %170 {offsets = [0, 496], sizes = [16, 64], strides = [1, 1]} : vector<16x800xbf16> to vector<16x64xbf16>
    %240 = vector.extract_strided_slice %170 {offsets = [0, 576], sizes = [16, 64], strides = [1, 1]} : vector<16x800xbf16> to vector<16x64xbf16>
    %241 = vector.extract_strided_slice %170 {offsets = [0, 656], sizes = [16, 64], strides = [1, 1]} : vector<16x800xbf16> to vector<16x64xbf16>
    %242 = tpu.concatenate %234, %235, %236, %237, %238, %239, %240, %241 in 1 : vector<16x64xbf16>, vector<16x64xbf16>, vector<16x64xbf16>, vector<16x64xbf16>, vector<16x64xbf16>, vector<16x64xbf16>, vector<16x64xbf16>, vector<16x64xbf16> -> vector<16x512xbf16>
    %c160 = arith.constant 160 : index
    %c0_30 = arith.constant 0 : index
    %243 = vector.load %arg4[%c160, %c0_30] : memref<288x16xbf16, #tpu.memory_space<vmem>>, vector<32x16xbf16>
    %cst_31 = arith.constant dense<0.000000e+00> : vector<32x512xf32>
    %244 = tpu.matmul %243, %242, %cst_31 {dimension_numbers = #tpu.dot_dimension_numbers<[1], [0], [0], [1], [0, 0, 1, 1], [], []>} : vector<32x16xbf16>, vector<16x512xbf16>, vector<32x512xf32> -> vector<32x512xf32>
    %245 = arith.addf %233, %244 : vector<32x512xf32>
    %246 = vector.extract_strided_slice %170 {offsets = [0, 160], sizes = [16, 64], strides = [1, 1]} : vector<16x800xbf16> to vector<16x64xbf16>
    %247 = vector.extract_strided_slice %170 {offsets = [0, 240], sizes = [16, 64], strides = [1, 1]} : vector<16x800xbf16> to vector<16x64xbf16>
    %248 = vector.extract_strided_slice %170 {offsets = [0, 320], sizes = [16, 64], strides = [1, 1]} : vector<16x800xbf16> to vector<16x64xbf16>
    %249 = vector.extract_strided_slice %170 {offsets = [0, 400], sizes = [16, 64], strides = [1, 1]} : vector<16x800xbf16> to vector<16x64xbf16>
    %250 = vector.extract_strided_slice %170 {offsets = [0, 480], sizes = [16, 64], strides = [1, 1]} : vector<16x800xbf16> to vector<16x64xbf16>
    %251 = vector.extract_strided_slice %170 {offsets = [0, 560], sizes = [16, 64], strides = [1, 1]} : vector<16x800xbf16> to vector<16x64xbf16>
    %252 = vector.extract_strided_slice %170 {offsets = [0, 640], sizes = [16, 64], strides = [1, 1]} : vector<16x800xbf16> to vector<16x64xbf16>
    %253 = vector.extract_strided_slice %170 {offsets = [0, 720], sizes = [16, 64], strides = [1, 1]} : vector<16x800xbf16> to vector<16x64xbf16>
    %254 = tpu.concatenate %246, %247, %248, %249, %250, %251, %252, %253 in 1 : vector<16x64xbf16>, vector<16x64xbf16>, vector<16x64xbf16>, vector<16x64xbf16>, vector<16x64xbf16>, vector<16x64xbf16>, vector<16x64xbf16>, vector<16x64xbf16> -> vector<16x512xbf16>
    %c192 = arith.constant 192 : index
    %c0_32 = arith.constant 0 : index
    %255 = vector.load %arg4[%c192, %c0_32] : memref<288x16xbf16, #tpu.memory_space<vmem>>, vector<32x16xbf16>
    %cst_33 = arith.constant dense<0.000000e+00> : vector<32x512xf32>
    %256 = tpu.matmul %255, %254, %cst_33 {dimension_numbers = #tpu.dot_dimension_numbers<[1], [0], [0], [1], [0, 0, 1, 1], [], []>} : vector<32x16xbf16>, vector<16x512xbf16>, vector<32x512xf32> -> vector<32x512xf32>
    %257 = arith.addf %245, %256 : vector<32x512xf32>
    %258 = vector.extract_strided_slice %170 {offsets = [0, 168], sizes = [16, 64], strides = [1, 1]} : vector<16x800xbf16> to vector<16x64xbf16>
    %259 = vector.extract_strided_slice %170 {offsets = [0, 248], sizes = [16, 64], strides = [1, 1]} : vector<16x800xbf16> to vector<16x64xbf16>
    %260 = vector.extract_strided_slice %170 {offsets = [0, 328], sizes = [16, 64], strides = [1, 1]} : vector<16x800xbf16> to vector<16x64xbf16>
    %261 = vector.extract_strided_slice %170 {offsets = [0, 408], sizes = [16, 64], strides = [1, 1]} : vector<16x800xbf16> to vector<16x64xbf16>
    %262 = vector.extract_strided_slice %170 {offsets = [0, 488], sizes = [16, 64], strides = [1, 1]} : vector<16x800xbf16> to vector<16x64xbf16>
    %263 = vector.extract_strided_slice %170 {offsets = [0, 568], sizes = [16, 64], strides = [1, 1]} : vector<16x800xbf16> to vector<16x64xbf16>
    %264 = vector.extract_strided_slice %170 {offsets = [0, 648], sizes = [16, 64], strides = [1, 1]} : vector<16x800xbf16> to vector<16x64xbf16>
    %265 = vector.extract_strided_slice %170 {offsets = [0, 728], sizes = [16, 64], strides = [1, 1]} : vector<16x800xbf16> to vector<16x64xbf16>
    %266 = tpu.concatenate %258, %259, %260, %261, %262, %263, %264, %265 in 1 : vector<16x64xbf16>, vector<16x64xbf16>, vector<16x64xbf16>, vector<16x64xbf16>, vector<16x64xbf16>, vector<16x64xbf16>, vector<16x64xbf16>, vector<16x64xbf16> -> vector<16x512xbf16>
    %c224 = arith.constant 224 : index
    %c0_34 = arith.constant 0 : index
    %267 = vector.load %arg4[%c224, %c0_34] : memref<288x16xbf16, #tpu.memory_space<vmem>>, vector<32x16xbf16>
    %cst_35 = arith.constant dense<0.000000e+00> : vector<32x512xf32>
    %268 = tpu.matmul %267, %266, %cst_35 {dimension_numbers = #tpu.dot_dimension_numbers<[1], [0], [0], [1], [0, 0, 1, 1], [], []>} : vector<32x16xbf16>, vector<16x512xbf16>, vector<32x512xf32> -> vector<32x512xf32>
    %269 = arith.addf %257, %268 : vector<32x512xf32>
    %270 = vector.extract_strided_slice %170 {offsets = [0, 176], sizes = [16, 64], strides = [1, 1]} : vector<16x800xbf16> to vector<16x64xbf16>
    %271 = vector.extract_strided_slice %170 {offsets = [0, 256], sizes = [16, 64], strides = [1, 1]} : vector<16x800xbf16> to vector<16x64xbf16>
    %272 = vector.extract_strided_slice %170 {offsets = [0, 336], sizes = [16, 64], strides = [1, 1]} : vector<16x800xbf16> to vector<16x64xbf16>
    %273 = vector.extract_strided_slice %170 {offsets = [0, 416], sizes = [16, 64], strides = [1, 1]} : vector<16x800xbf16> to vector<16x64xbf16>
    %274 = vector.extract_strided_slice %170 {offsets = [0, 496], sizes = [16, 64], strides = [1, 1]} : vector<16x800xbf16> to vector<16x64xbf16>
    %275 = vector.extract_strided_slice %170 {offsets = [0, 576], sizes = [16, 64], strides = [1, 1]} : vector<16x800xbf16> to vector<16x64xbf16>
    %276 = vector.extract_strided_slice %170 {offsets = [0, 656], sizes = [16, 64], strides = [1, 1]} : vector<16x800xbf16> to vector<16x64xbf16>
    %277 = vector.extract_strided_slice %170 {offsets = [0, 736], sizes = [16, 64], strides = [1, 1]} : vector<16x800xbf16> to vector<16x64xbf16>
    %278 = tpu.concatenate %270, %271, %272, %273, %274, %275, %276, %277 in 1 : vector<16x64xbf16>, vector<16x64xbf16>, vector<16x64xbf16>, vector<16x64xbf16>, vector<16x64xbf16>, vector<16x64xbf16>, vector<16x64xbf16>, vector<16x64xbf16> -> vector<16x512xbf16>
    %c256 = arith.constant 256 : index
    %c0_36 = arith.constant 0 : index
    %279 = vector.load %arg4[%c256, %c0_36] : memref<288x16xbf16, #tpu.memory_space<vmem>>, vector<32x16xbf16>
    %cst_37 = arith.constant dense<0.000000e+00> : vector<32x512xf32>
    %280 = tpu.matmul %279, %278, %cst_37 {dimension_numbers = #tpu.dot_dimension_numbers<[1], [0], [0], [1], [0, 0, 1, 1], [], []>} : vector<32x16xbf16>, vector<16x512xbf16>, vector<32x512xf32> -> vector<32x512xf32>
    %281 = arith.addf %269, %280 : vector<32x512xf32>
    %cst_38 = arith.constant 0.000000e+00 : f32
    %282 = vector.broadcast %cst_38 : f32 to vector<32x512xf32>
    %283 = arith.maximumf %281, %282 : vector<32x512xf32>
    %c0_39 = arith.constant 0 : index
    %c0_40 = arith.constant 0 : index
    %284 = vector.load %arg7[%c0_39, %c0_40] : memref<64x1xf32, #tpu.memory_space<vmem>>, vector<64x1xf32>
    %285 = vector.shape_cast %284 : vector<64x1xf32> to vector<64x1xf32>
    %286 = vector.broadcast %285 : vector<64x1xf32> to vector<64x8xf32>
    %287 = vector.extract_strided_slice %283 {offsets = [0, 0], sizes = [32, 8], strides = [1, 1]} : vector<32x512xf32> to vector<32x8xf32>
    %288 = vector.extract_strided_slice %283 {offsets = [0, 8], sizes = [32, 8], strides = [1, 1]} : vector<32x512xf32> to vector<32x8xf32>
    %289 = arith.maximumf %287, %288 : vector<32x8xf32>
    %290 = vector.extract_strided_slice %283 {offsets = [0, 64], sizes = [32, 8], strides = [1, 1]} : vector<32x512xf32> to vector<32x8xf32>
    %291 = vector.extract_strided_slice %283 {offsets = [0, 72], sizes = [32, 8], strides = [1, 1]} : vector<32x512xf32> to vector<32x8xf32>
    %292 = arith.maximumf %290, %291 : vector<32x8xf32>
    %293 = arith.maximumf %289, %292 : vector<32x8xf32>
    %c0_41 = arith.constant 0 : index
    %c0_42 = arith.constant 0 : index
    %294 = vector.load %arg6[%c0_41, %c0_42] : memref<1024x32xbf16, #tpu.memory_space<vmem>>, vector<64x32xbf16>
    %295 = arith.truncf %293 : vector<32x8xf32> to vector<32x8xbf16>
    %cst_43 = arith.constant dense<0.000000e+00> : vector<64x8xf32>
    %296 = tpu.matmul %294, %295, %cst_43 {dimension_numbers = #tpu.dot_dimension_numbers<[1], [0], [0], [1], [0, 0, 1, 1], [], []>} : vector<64x32xbf16>, vector<32x8xbf16>, vector<64x8xf32> -> vector<64x8xf32>
    %297 = arith.addf %286, %296 : vector<64x8xf32>
    %298 = vector.extract_strided_slice %283 {offsets = [0, 16], sizes = [32, 8], strides = [1, 1]} : vector<32x512xf32> to vector<32x8xf32>
    %299 = vector.extract_strided_slice %283 {offsets = [0, 24], sizes = [32, 8], strides = [1, 1]} : vector<32x512xf32> to vector<32x8xf32>
    %300 = arith.maximumf %298, %299 : vector<32x8xf32>
    %301 = vector.extract_strided_slice %283 {offsets = [0, 80], sizes = [32, 8], strides = [1, 1]} : vector<32x512xf32> to vector<32x8xf32>
    %302 = vector.extract_strided_slice %283 {offsets = [0, 88], sizes = [32, 8], strides = [1, 1]} : vector<32x512xf32> to vector<32x8xf32>
    %303 = arith.maximumf %301, %302 : vector<32x8xf32>
    %304 = arith.maximumf %300, %303 : vector<32x8xf32>
    %c64_44 = arith.constant 64 : index
    %c0_45 = arith.constant 0 : index
    %305 = vector.load %arg6[%c64_44, %c0_45] : memref<1024x32xbf16, #tpu.memory_space<vmem>>, vector<64x32xbf16>
    %306 = arith.truncf %304 : vector<32x8xf32> to vector<32x8xbf16>
    %cst_46 = arith.constant dense<0.000000e+00> : vector<64x8xf32>
    %307 = tpu.matmul %305, %306, %cst_46 {dimension_numbers = #tpu.dot_dimension_numbers<[1], [0], [0], [1], [0, 0, 1, 1], [], []>} : vector<64x32xbf16>, vector<32x8xbf16>, vector<64x8xf32> -> vector<64x8xf32>
    %308 = arith.addf %297, %307 : vector<64x8xf32>
    %309 = vector.extract_strided_slice %283 {offsets = [0, 32], sizes = [32, 8], strides = [1, 1]} : vector<32x512xf32> to vector<32x8xf32>
    %310 = vector.extract_strided_slice %283 {offsets = [0, 40], sizes = [32, 8], strides = [1, 1]} : vector<32x512xf32> to vector<32x8xf32>
    %311 = arith.maximumf %309, %310 : vector<32x8xf32>
    %312 = vector.extract_strided_slice %283 {offsets = [0, 96], sizes = [32, 8], strides = [1, 1]} : vector<32x512xf32> to vector<32x8xf32>
    %313 = vector.extract_strided_slice %283 {offsets = [0, 104], sizes = [32, 8], strides = [1, 1]} : vector<32x512xf32> to vector<32x8xf32>
    %314 = arith.maximumf %312, %313 : vector<32x8xf32>
    %315 = arith.maximumf %311, %314 : vector<32x8xf32>
    %c128_47 = arith.constant 128 : index
    %c0_48 = arith.constant 0 : index
    %316 = vector.load %arg6[%c128_47, %c0_48] : memref<1024x32xbf16, #tpu.memory_space<vmem>>, vector<64x32xbf16>
    %317 = arith.truncf %315 : vector<32x8xf32> to vector<32x8xbf16>
    %cst_49 = arith.constant dense<0.000000e+00> : vector<64x8xf32>
    %318 = tpu.matmul %316, %317, %cst_49 {dimension_numbers = #tpu.dot_dimension_numbers<[1], [0], [0], [1], [0, 0, 1, 1], [], []>} : vector<64x32xbf16>, vector<32x8xbf16>, vector<64x8xf32> -> vector<64x8xf32>
    %319 = arith.addf %308, %318 : vector<64x8xf32>
    %320 = vector.extract_strided_slice %283 {offsets = [0, 48], sizes = [32, 8], strides = [1, 1]} : vector<32x512xf32> to vector<32x8xf32>
    %321 = vector.extract_strided_slice %283 {offsets = [0, 56], sizes = [32, 8], strides = [1, 1]} : vector<32x512xf32> to vector<32x8xf32>
    %322 = arith.maximumf %320, %321 : vector<32x8xf32>
    %323 = vector.extract_strided_slice %283 {offsets = [0, 112], sizes = [32, 8], strides = [1, 1]} : vector<32x512xf32> to vector<32x8xf32>
    %324 = vector.extract_strided_slice %283 {offsets = [0, 120], sizes = [32, 8], strides = [1, 1]} : vector<32x512xf32> to vector<32x8xf32>
    %325 = arith.maximumf %323, %324 : vector<32x8xf32>
    %326 = arith.maximumf %322, %325 : vector<32x8xf32>
    %c192_50 = arith.constant 192 : index
    %c0_51 = arith.constant 0 : index
    %327 = vector.load %arg6[%c192_50, %c0_51] : memref<1024x32xbf16, #tpu.memory_space<vmem>>, vector<64x32xbf16>
    %328 = arith.truncf %326 : vector<32x8xf32> to vector<32x8xbf16>
    %cst_52 = arith.constant dense<0.000000e+00> : vector<64x8xf32>
    %329 = tpu.matmul %327, %328, %cst_52 {dimension_numbers = #tpu.dot_dimension_numbers<[1], [0], [0], [1], [0, 0, 1, 1], [], []>} : vector<64x32xbf16>, vector<32x8xbf16>, vector<64x8xf32> -> vector<64x8xf32>
    %330 = arith.addf %319, %329 : vector<64x8xf32>
    %331 = vector.extract_strided_slice %283 {offsets = [0, 128], sizes = [32, 8], strides = [1, 1]} : vector<32x512xf32> to vector<32x8xf32>
    %332 = vector.extract_strided_slice %283 {offsets = [0, 136], sizes = [32, 8], strides = [1, 1]} : vector<32x512xf32> to vector<32x8xf32>
    %333 = arith.maximumf %331, %332 : vector<32x8xf32>
    %334 = vector.extract_strided_slice %283 {offsets = [0, 192], sizes = [32, 8], strides = [1, 1]} : vector<32x512xf32> to vector<32x8xf32>
    %335 = vector.extract_strided_slice %283 {offsets = [0, 200], sizes = [32, 8], strides = [1, 1]} : vector<32x512xf32> to vector<32x8xf32>
    %336 = arith.maximumf %334, %335 : vector<32x8xf32>
    %337 = arith.maximumf %333, %336 : vector<32x8xf32>
    %c256_53 = arith.constant 256 : index
    %c0_54 = arith.constant 0 : index
    %338 = vector.load %arg6[%c256_53, %c0_54] : memref<1024x32xbf16, #tpu.memory_space<vmem>>, vector<64x32xbf16>
    %339 = arith.truncf %337 : vector<32x8xf32> to vector<32x8xbf16>
    %cst_55 = arith.constant dense<0.000000e+00> : vector<64x8xf32>
    %340 = tpu.matmul %338, %339, %cst_55 {dimension_numbers = #tpu.dot_dimension_numbers<[1], [0], [0], [1], [0, 0, 1, 1], [], []>} : vector<64x32xbf16>, vector<32x8xbf16>, vector<64x8xf32> -> vector<64x8xf32>
    %341 = arith.addf %330, %340 : vector<64x8xf32>
    %342 = vector.extract_strided_slice %283 {offsets = [0, 144], sizes = [32, 8], strides = [1, 1]} : vector<32x512xf32> to vector<32x8xf32>
    %343 = vector.extract_strided_slice %283 {offsets = [0, 152], sizes = [32, 8], strides = [1, 1]} : vector<32x512xf32> to vector<32x8xf32>
    %344 = arith.maximumf %342, %343 : vector<32x8xf32>
    %345 = vector.extract_strided_slice %283 {offsets = [0, 208], sizes = [32, 8], strides = [1, 1]} : vector<32x512xf32> to vector<32x8xf32>
    %346 = vector.extract_strided_slice %283 {offsets = [0, 216], sizes = [32, 8], strides = [1, 1]} : vector<32x512xf32> to vector<32x8xf32>
    %347 = arith.maximumf %345, %346 : vector<32x8xf32>
    %348 = arith.maximumf %344, %347 : vector<32x8xf32>
    %c320 = arith.constant 320 : index
    %c0_56 = arith.constant 0 : index
    %349 = vector.load %arg6[%c320, %c0_56] : memref<1024x32xbf16, #tpu.memory_space<vmem>>, vector<64x32xbf16>
    %350 = arith.truncf %348 : vector<32x8xf32> to vector<32x8xbf16>
    %cst_57 = arith.constant dense<0.000000e+00> : vector<64x8xf32>
    %351 = tpu.matmul %349, %350, %cst_57 {dimension_numbers = #tpu.dot_dimension_numbers<[1], [0], [0], [1], [0, 0, 1, 1], [], []>} : vector<64x32xbf16>, vector<32x8xbf16>, vector<64x8xf32> -> vector<64x8xf32>
    %352 = arith.addf %341, %351 : vector<64x8xf32>
    %353 = vector.extract_strided_slice %283 {offsets = [0, 160], sizes = [32, 8], strides = [1, 1]} : vector<32x512xf32> to vector<32x8xf32>
    %354 = vector.extract_strided_slice %283 {offsets = [0, 168], sizes = [32, 8], strides = [1, 1]} : vector<32x512xf32> to vector<32x8xf32>
    %355 = arith.maximumf %353, %354 : vector<32x8xf32>
    %356 = vector.extract_strided_slice %283 {offsets = [0, 224], sizes = [32, 8], strides = [1, 1]} : vector<32x512xf32> to vector<32x8xf32>
    %357 = vector.extract_strided_slice %283 {offsets = [0, 232], sizes = [32, 8], strides = [1, 1]} : vector<32x512xf32> to vector<32x8xf32>
    %358 = arith.maximumf %356, %357 : vector<32x8xf32>
    %359 = arith.maximumf %355, %358 : vector<32x8xf32>
    %c384 = arith.constant 384 : index
    %c0_58 = arith.constant 0 : index
    %360 = vector.load %arg6[%c384, %c0_58] : memref<1024x32xbf16, #tpu.memory_space<vmem>>, vector<64x32xbf16>
    %361 = arith.truncf %359 : vector<32x8xf32> to vector<32x8xbf16>
    %cst_59 = arith.constant dense<0.000000e+00> : vector<64x8xf32>
    %362 = tpu.matmul %360, %361, %cst_59 {dimension_numbers = #tpu.dot_dimension_numbers<[1], [0], [0], [1], [0, 0, 1, 1], [], []>} : vector<64x32xbf16>, vector<32x8xbf16>, vector<64x8xf32> -> vector<64x8xf32>
    %363 = arith.addf %352, %362 : vector<64x8xf32>
    %364 = vector.extract_strided_slice %283 {offsets = [0, 176], sizes = [32, 8], strides = [1, 1]} : vector<32x512xf32> to vector<32x8xf32>
    %365 = vector.extract_strided_slice %283 {offsets = [0, 184], sizes = [32, 8], strides = [1, 1]} : vector<32x512xf32> to vector<32x8xf32>
    %366 = arith.maximumf %364, %365 : vector<32x8xf32>
    %367 = vector.extract_strided_slice %283 {offsets = [0, 240], sizes = [32, 8], strides = [1, 1]} : vector<32x512xf32> to vector<32x8xf32>
    %368 = vector.extract_strided_slice %283 {offsets = [0, 248], sizes = [32, 8], strides = [1, 1]} : vector<32x512xf32> to vector<32x8xf32>
    %369 = arith.maximumf %367, %368 : vector<32x8xf32>
    %370 = arith.maximumf %366, %369 : vector<32x8xf32>
    %c448 = arith.constant 448 : index
    %c0_60 = arith.constant 0 : index
    %371 = vector.load %arg6[%c448, %c0_60] : memref<1024x32xbf16, #tpu.memory_space<vmem>>, vector<64x32xbf16>
    %372 = arith.truncf %370 : vector<32x8xf32> to vector<32x8xbf16>
    %cst_61 = arith.constant dense<0.000000e+00> : vector<64x8xf32>
    %373 = tpu.matmul %371, %372, %cst_61 {dimension_numbers = #tpu.dot_dimension_numbers<[1], [0], [0], [1], [0, 0, 1, 1], [], []>} : vector<64x32xbf16>, vector<32x8xbf16>, vector<64x8xf32> -> vector<64x8xf32>
    %374 = arith.addf %363, %373 : vector<64x8xf32>
    %375 = vector.extract_strided_slice %283 {offsets = [0, 256], sizes = [32, 8], strides = [1, 1]} : vector<32x512xf32> to vector<32x8xf32>
    %376 = vector.extract_strided_slice %283 {offsets = [0, 264], sizes = [32, 8], strides = [1, 1]} : vector<32x512xf32> to vector<32x8xf32>
    %377 = arith.maximumf %375, %376 : vector<32x8xf32>
    %378 = vector.extract_strided_slice %283 {offsets = [0, 320], sizes = [32, 8], strides = [1, 1]} : vector<32x512xf32> to vector<32x8xf32>
    %379 = vector.extract_strided_slice %283 {offsets = [0, 328], sizes = [32, 8], strides = [1, 1]} : vector<32x512xf32> to vector<32x8xf32>
    %380 = arith.maximumf %378, %379 : vector<32x8xf32>
    %381 = arith.maximumf %377, %380 : vector<32x8xf32>
    %c512 = arith.constant 512 : index
    %c0_62 = arith.constant 0 : index
    %382 = vector.load %arg6[%c512, %c0_62] : memref<1024x32xbf16, #tpu.memory_space<vmem>>, vector<64x32xbf16>
    %383 = arith.truncf %381 : vector<32x8xf32> to vector<32x8xbf16>
    %cst_63 = arith.constant dense<0.000000e+00> : vector<64x8xf32>
    %384 = tpu.matmul %382, %383, %cst_63 {dimension_numbers = #tpu.dot_dimension_numbers<[1], [0], [0], [1], [0, 0, 1, 1], [], []>} : vector<64x32xbf16>, vector<32x8xbf16>, vector<64x8xf32> -> vector<64x8xf32>
    %385 = arith.addf %374, %384 : vector<64x8xf32>
    %386 = vector.extract_strided_slice %283 {offsets = [0, 272], sizes = [32, 8], strides = [1, 1]} : vector<32x512xf32> to vector<32x8xf32>
    %387 = vector.extract_strided_slice %283 {offsets = [0, 280], sizes = [32, 8], strides = [1, 1]} : vector<32x512xf32> to vector<32x8xf32>
    %388 = arith.maximumf %386, %387 : vector<32x8xf32>
    %389 = vector.extract_strided_slice %283 {offsets = [0, 336], sizes = [32, 8], strides = [1, 1]} : vector<32x512xf32> to vector<32x8xf32>
    %390 = vector.extract_strided_slice %283 {offsets = [0, 344], sizes = [32, 8], strides = [1, 1]} : vector<32x512xf32> to vector<32x8xf32>
    %391 = arith.maximumf %389, %390 : vector<32x8xf32>
    %392 = arith.maximumf %388, %391 : vector<32x8xf32>
    %c576 = arith.constant 576 : index
    %c0_64 = arith.constant 0 : index
    %393 = vector.load %arg6[%c576, %c0_64] : memref<1024x32xbf16, #tpu.memory_space<vmem>>, vector<64x32xbf16>
    %394 = arith.truncf %392 : vector<32x8xf32> to vector<32x8xbf16>
    %cst_65 = arith.constant dense<0.000000e+00> : vector<64x8xf32>
    %395 = tpu.matmul %393, %394, %cst_65 {dimension_numbers = #tpu.dot_dimension_numbers<[1], [0], [0], [1], [0, 0, 1, 1], [], []>} : vector<64x32xbf16>, vector<32x8xbf16>, vector<64x8xf32> -> vector<64x8xf32>
    %396 = arith.addf %385, %395 : vector<64x8xf32>
    %397 = vector.extract_strided_slice %283 {offsets = [0, 288], sizes = [32, 8], strides = [1, 1]} : vector<32x512xf32> to vector<32x8xf32>
    %398 = vector.extract_strided_slice %283 {offsets = [0, 296], sizes = [32, 8], strides = [1, 1]} : vector<32x512xf32> to vector<32x8xf32>
    %399 = arith.maximumf %397, %398 : vector<32x8xf32>
    %400 = vector.extract_strided_slice %283 {offsets = [0, 352], sizes = [32, 8], strides = [1, 1]} : vector<32x512xf32> to vector<32x8xf32>
    %401 = vector.extract_strided_slice %283 {offsets = [0, 360], sizes = [32, 8], strides = [1, 1]} : vector<32x512xf32> to vector<32x8xf32>
    %402 = arith.maximumf %400, %401 : vector<32x8xf32>
    %403 = arith.maximumf %399, %402 : vector<32x8xf32>
    %c640 = arith.constant 640 : index
    %c0_66 = arith.constant 0 : index
    %404 = vector.load %arg6[%c640, %c0_66] : memref<1024x32xbf16, #tpu.memory_space<vmem>>, vector<64x32xbf16>
    %405 = arith.truncf %403 : vector<32x8xf32> to vector<32x8xbf16>
    %cst_67 = arith.constant dense<0.000000e+00> : vector<64x8xf32>
    %406 = tpu.matmul %404, %405, %cst_67 {dimension_numbers = #tpu.dot_dimension_numbers<[1], [0], [0], [1], [0, 0, 1, 1], [], []>} : vector<64x32xbf16>, vector<32x8xbf16>, vector<64x8xf32> -> vector<64x8xf32>
    %407 = arith.addf %396, %406 : vector<64x8xf32>
    %408 = vector.extract_strided_slice %283 {offsets = [0, 304], sizes = [32, 8], strides = [1, 1]} : vector<32x512xf32> to vector<32x8xf32>
    %409 = vector.extract_strided_slice %283 {offsets = [0, 312], sizes = [32, 8], strides = [1, 1]} : vector<32x512xf32> to vector<32x8xf32>
    %410 = arith.maximumf %408, %409 : vector<32x8xf32>
    %411 = vector.extract_strided_slice %283 {offsets = [0, 368], sizes = [32, 8], strides = [1, 1]} : vector<32x512xf32> to vector<32x8xf32>
    %412 = vector.extract_strided_slice %283 {offsets = [0, 376], sizes = [32, 8], strides = [1, 1]} : vector<32x512xf32> to vector<32x8xf32>
    %413 = arith.maximumf %411, %412 : vector<32x8xf32>
    %414 = arith.maximumf %410, %413 : vector<32x8xf32>
    %c704 = arith.constant 704 : index
    %c0_68 = arith.constant 0 : index
    %415 = vector.load %arg6[%c704, %c0_68] : memref<1024x32xbf16, #tpu.memory_space<vmem>>, vector<64x32xbf16>
    %416 = arith.truncf %414 : vector<32x8xf32> to vector<32x8xbf16>
    %cst_69 = arith.constant dense<0.000000e+00> : vector<64x8xf32>
    %417 = tpu.matmul %415, %416, %cst_69 {dimension_numbers = #tpu.dot_dimension_numbers<[1], [0], [0], [1], [0, 0, 1, 1], [], []>} : vector<64x32xbf16>, vector<32x8xbf16>, vector<64x8xf32> -> vector<64x8xf32>
    %418 = arith.addf %407, %417 : vector<64x8xf32>
    %419 = vector.extract_strided_slice %283 {offsets = [0, 384], sizes = [32, 8], strides = [1, 1]} : vector<32x512xf32> to vector<32x8xf32>
    %420 = vector.extract_strided_slice %283 {offsets = [0, 392], sizes = [32, 8], strides = [1, 1]} : vector<32x512xf32> to vector<32x8xf32>
    %421 = arith.maximumf %419, %420 : vector<32x8xf32>
    %422 = vector.extract_strided_slice %283 {offsets = [0, 448], sizes = [32, 8], strides = [1, 1]} : vector<32x512xf32> to vector<32x8xf32>
    %423 = vector.extract_strided_slice %283 {offsets = [0, 456], sizes = [32, 8], strides = [1, 1]} : vector<32x512xf32> to vector<32x8xf32>
    %424 = arith.maximumf %422, %423 : vector<32x8xf32>
    %425 = arith.maximumf %421, %424 : vector<32x8xf32>
    %c768 = arith.constant 768 : index
    %c0_70 = arith.constant 0 : index
    %426 = vector.load %arg6[%c768, %c0_70] : memref<1024x32xbf16, #tpu.memory_space<vmem>>, vector<64x32xbf16>
    %427 = arith.truncf %425 : vector<32x8xf32> to vector<32x8xbf16>
    %cst_71 = arith.constant dense<0.000000e+00> : vector<64x8xf32>
    %428 = tpu.matmul %426, %427, %cst_71 {dimension_numbers = #tpu.dot_dimension_numbers<[1], [0], [0], [1], [0, 0, 1, 1], [], []>} : vector<64x32xbf16>, vector<32x8xbf16>, vector<64x8xf32> -> vector<64x8xf32>
    %429 = arith.addf %418, %428 : vector<64x8xf32>
    %430 = vector.extract_strided_slice %283 {offsets = [0, 400], sizes = [32, 8], strides = [1, 1]} : vector<32x512xf32> to vector<32x8xf32>
    %431 = vector.extract_strided_slice %283 {offsets = [0, 408], sizes = [32, 8], strides = [1, 1]} : vector<32x512xf32> to vector<32x8xf32>
    %432 = arith.maximumf %430, %431 : vector<32x8xf32>
    %433 = vector.extract_strided_slice %283 {offsets = [0, 464], sizes = [32, 8], strides = [1, 1]} : vector<32x512xf32> to vector<32x8xf32>
    %434 = vector.extract_strided_slice %283 {offsets = [0, 472], sizes = [32, 8], strides = [1, 1]} : vector<32x512xf32> to vector<32x8xf32>
    %435 = arith.maximumf %433, %434 : vector<32x8xf32>
    %436 = arith.maximumf %432, %435 : vector<32x8xf32>
    %c832 = arith.constant 832 : index
    %c0_72 = arith.constant 0 : index
    %437 = vector.load %arg6[%c832, %c0_72] : memref<1024x32xbf16, #tpu.memory_space<vmem>>, vector<64x32xbf16>
    %438 = arith.truncf %436 : vector<32x8xf32> to vector<32x8xbf16>
    %cst_73 = arith.constant dense<0.000000e+00> : vector<64x8xf32>
    %439 = tpu.matmul %437, %438, %cst_73 {dimension_numbers = #tpu.dot_dimension_numbers<[1], [0], [0], [1], [0, 0, 1, 1], [], []>} : vector<64x32xbf16>, vector<32x8xbf16>, vector<64x8xf32> -> vector<64x8xf32>
    %440 = arith.addf %429, %439 : vector<64x8xf32>
    %441 = vector.extract_strided_slice %283 {offsets = [0, 416], sizes = [32, 8], strides = [1, 1]} : vector<32x512xf32> to vector<32x8xf32>
    %442 = vector.extract_strided_slice %283 {offsets = [0, 424], sizes = [32, 8], strides = [1, 1]} : vector<32x512xf32> to vector<32x8xf32>
    %443 = arith.maximumf %441, %442 : vector<32x8xf32>
    %444 = vector.extract_strided_slice %283 {offsets = [0, 480], sizes = [32, 8], strides = [1, 1]} : vector<32x512xf32> to vector<32x8xf32>
    %445 = vector.extract_strided_slice %283 {offsets = [0, 488], sizes = [32, 8], strides = [1, 1]} : vector<32x512xf32> to vector<32x8xf32>
    %446 = arith.maximumf %444, %445 : vector<32x8xf32>
    %447 = arith.maximumf %443, %446 : vector<32x8xf32>
    %c896 = arith.constant 896 : index
    %c0_74 = arith.constant 0 : index
    %448 = vector.load %arg6[%c896, %c0_74] : memref<1024x32xbf16, #tpu.memory_space<vmem>>, vector<64x32xbf16>
    %449 = arith.truncf %447 : vector<32x8xf32> to vector<32x8xbf16>
    %cst_75 = arith.constant dense<0.000000e+00> : vector<64x8xf32>
    %450 = tpu.matmul %448, %449, %cst_75 {dimension_numbers = #tpu.dot_dimension_numbers<[1], [0], [0], [1], [0, 0, 1, 1], [], []>} : vector<64x32xbf16>, vector<32x8xbf16>, vector<64x8xf32> -> vector<64x8xf32>
    %451 = arith.addf %440, %450 : vector<64x8xf32>
    %452 = vector.extract_strided_slice %283 {offsets = [0, 432], sizes = [32, 8], strides = [1, 1]} : vector<32x512xf32> to vector<32x8xf32>
    %453 = vector.extract_strided_slice %283 {offsets = [0, 440], sizes = [32, 8], strides = [1, 1]} : vector<32x512xf32> to vector<32x8xf32>
    %454 = arith.maximumf %452, %453 : vector<32x8xf32>
    %455 = vector.extract_strided_slice %283 {offsets = [0, 496], sizes = [32, 8], strides = [1, 1]} : vector<32x512xf32> to vector<32x8xf32>
    %456 = vector.extract_strided_slice %283 {offsets = [0, 504], sizes = [32, 8], strides = [1, 1]} : vector<32x512xf32> to vector<32x8xf32>
    %457 = arith.maximumf %455, %456 : vector<32x8xf32>
    %458 = arith.maximumf %454, %457 : vector<32x8xf32>
    %c960 = arith.constant 960 : index
    %c0_76 = arith.constant 0 : index
    %459 = vector.load %arg6[%c960, %c0_76] : memref<1024x32xbf16, #tpu.memory_space<vmem>>, vector<64x32xbf16>
    %460 = arith.truncf %458 : vector<32x8xf32> to vector<32x8xbf16>
    %cst_77 = arith.constant dense<0.000000e+00> : vector<64x8xf32>
    %461 = tpu.matmul %459, %460, %cst_77 {dimension_numbers = #tpu.dot_dimension_numbers<[1], [0], [0], [1], [0, 0, 1, 1], [], []>} : vector<64x32xbf16>, vector<32x8xbf16>, vector<64x8xf32> -> vector<64x8xf32>
    %462 = arith.addf %451, %461 : vector<64x8xf32>
    %cst_78 = arith.constant 0.000000e+00 : f32
    %463 = vector.broadcast %cst_78 : f32 to vector<64x8xf32>
    %464 = arith.maximumf %462, %463 : vector<64x8xf32>
    %c0_79 = arith.constant 0 : index
    %c0_80 = arith.constant 0 : index
    %465 = vector.load %arg8[%c0_79, %c0_80] : memref<1x64xbf16, #tpu.memory_space<vmem>>, vector<1x64xbf16>
    %466 = arith.truncf %464 : vector<64x8xf32> to vector<64x8xbf16>
    %cst_81 = arith.constant dense<0.000000e+00> : vector<1x8xf32>
    %467 = tpu.matmul %465, %466, %cst_81 {dimension_numbers = #tpu.dot_dimension_numbers<[1], [0], [0], [1], [0, 0, 1, 1], [], []>} : vector<1x64xbf16>, vector<64x8xbf16>, vector<1x8xf32> -> vector<1x8xf32>
    %c0_82 = arith.constant 0 : index
    %c0_83 = arith.constant 0 : index
    %468 = vector.load %arg9[%c0_82, %c0_83] : memref<1x1xf32, #tpu.memory_space<vmem>>, vector<1x1xf32>
    %469 = vector.broadcast %468 : vector<1x1xf32> to vector<1x8xf32>
    %470 = arith.addf %467, %469 : vector<1x8xf32>
    %471 = math.tanh %470 : vector<1x8xf32>
    %c0_84 = arith.constant 0 : index
    %c0_85 = arith.constant 0 : index
    %472 = vector.load %arg10[%c0_84, %c0_85] : memref<1x8xf32, #tpu.memory_space<vmem>>, vector<1x8xf32>
    tpu.vector_store %arg10[%c0_84, %c0_85], %471 {strides = array<i32>} : memref<1x8xf32, #tpu.memory_space<vmem>>, vector<1x8xf32>,
    return
  }
  func.func @transform_0(%arg0: i32) -> (i32, i32) {
    %c0_i32 = arith.constant 0 : i32
    %c0_i32_0 = arith.constant 0 : i32
    return %c0_i32, %arg0 : i32, i32
  }
  func.func @transform_1(%arg0: i32) -> (i32, i32) {
    %c0_i32 = arith.constant 0 : i32
    %c0_i32_0 = arith.constant 0 : i32
    %c0_i32_1 = arith.constant 0 : i32
    return %c0_i32, %c0_i32_0 : i32, i32
  }
  func.func @transform_2(%arg0: i32) -> (i32, i32) {
    %c0_i32 = arith.constant 0 : i32
    %c0_i32_0 = arith.constant 0 : i32
    %c0_i32_1 = arith.constant 0 : i32
    return %c0_i32, %c0_i32_0 : i32, i32
  }
  func.func @transform_3(%arg0: i32) -> (i32, i32) {
    %c0_i32 = arith.constant 0 : i32
    %c0_i32_0 = arith.constant 0 : i32
    %c0_i32_1 = arith.constant 0 : i32
    return %c0_i32, %c0_i32_0 : i32, i32
  }
  func.func @transform_4(%arg0: i32) -> (i32, i32) {
    %c0_i32 = arith.constant 0 : i32
    %c0_i32_0 = arith.constant 0 : i32
    %c0_i32_1 = arith.constant 0 : i32
    return %c0_i32, %c0_i32_0 : i32, i32
  }
  func.func @transform_5(%arg0: i32) -> (i32, i32) {
    %c0_i32 = arith.constant 0 : i32
    %c0_i32_0 = arith.constant 0 : i32
    %c0_i32_1 = arith.constant 0 : i32
    return %c0_i32, %c0_i32_0 : i32, i32
  }
  func.func @transform_6(%arg0: i32) -> (i32, i32) {
    %c0_i32 = arith.constant 0 : i32
    %c0_i32_0 = arith.constant 0 : i32
    %c0_i32_1 = arith.constant 0 : i32
    return %c0_i32, %c0_i32_0 : i32, i32
  }
  func.func @transform_7(%arg0: i32) -> (i32, i32) {
    %c0_i32 = arith.constant 0 : i32
    %c0_i32_0 = arith.constant 0 : i32
    %c0_i32_1 = arith.constant 0 : i32
    return %c0_i32, %c0_i32_0 : i32, i32
  }
  func.func @transform_8(%arg0: i32) -> (i32, i32) {
    %c0_i32 = arith.constant 0 : i32
    %c0_i32_0 = arith.constant 0 : i32
    %c0_i32_1 = arith.constant 0 : i32
    return %c0_i32, %c0_i32_0 : i32, i32
  }
  func.func @transform_9(%arg0: i32) -> (i32, i32) {
    %c0_i32 = arith.constant 0 : i32
    %c0_i32_0 = arith.constant 0 : i32
    return %c0_i32, %arg0 : i32, i32
  }
}

</mosaic_0001>

<bundles_post_ra>
// kernel: net_forward.1
= control target key start
LH: loop header
LB: loop body
LE: loop exit
PB: predicated region body
PF: predicated region fallthrough
CT: control target
= control target key end

     0   :  { %v37_v0 = vlaneseq  ;;  %v7009_v1 = vmov 0   ;;  %v5529_v2 = vmov 1   ;;  %s5530_s11 = smov 8   ;;  %s5531_s12 = smov 72   ;;  %v5532_v17 = vmov 2   ;;  %s6997_s0 = inlined_call_operand.vmem [shape: f32[1,512], index: 0, kind: input, shape index: {}]   ;;  %s6998_s1 = inlined_call_operand.vmem [shape: f32[16,9], index: 1, kind: input, shape index: {}]   ;;  %s6999_s2 = inlined_call_operand.vmem [shape: f32[16,1], index: 2, kind: input, shape index: {}]   ;;  %s7000_s3 = inlined_call_operand.vmem [shape: bf16[288,16], index: 3, kind: input, shape index: {}]   ;;  %s7001_s4 = inlined_call_operand.vmem [shape: f32[32,1], index: 4, kind: input, shape index: {}]   ;;  %s7002_s5 = inlined_call_operand.vmem [shape: bf16[1024,32], index: 5, kind: input, shape index: {}]   ;;  %s7003_s8 = inlined_call_operand.<no memory space> [shape: f32[1,1], index: 8, kind: input, shape index: {}]   ;;  %s7004_s6 = inlined_call_operand.vmem [shape: f32[64,1], index: 6, kind: input, shape index: {}]   ;;  %s7005_s7 = inlined_call_operand.vmem [shape: bf16[1,64], index: 7, kind: input, shape index: {}]   ;;  %s7006_s9 = inlined_call_operand.vmem [shape: f32[1,8], index: 9, kind: output, shape index: {}]  }
   0x1   :  { %5345 = vset.pattern.permute.xlu1 %v7009_v1  ;;  %5346 = vset.pattern.permute.xlu0 %v5529_v2  ;;  %v35_v4 = vld [vmem:[%s6997_s0] sm:$0xf]  ;;  %v139_v15 = vld [vmem:[%s6999_s2 + $0x8] sm:$0xff]  ;;  %v5533_v18 = vmov 3   ;;  %v5534_v19 = vmov 4   ;;  %v5535_v20 = vmov 5  }
   0x2   :  { %v38_v3 = vshrl.u32 %v37_v0, 7  ;;  %922 = vmatprep.mubr.bf16.mxu1 %v7009_v1  ;;  %2276 = vmatprep.mubr.bf16.mxu0 %v7009_v1  ;;  %v189_v13 = vld [vmem:[%s6998_s1] sm:$0xff]  ;;  %v190_v16 = vld [vmem:[%s6998_s1 + $0x8] sm:$0xff]  ;;  %v5536_v21 = vmov 6   ;;  %v5537_v22 = vmov 7   ;;  %v5538_v23 = vmov 8  }
   0x3   :  { %v138_v14 = vld [vmem:[%s6999_s2] sm:$0xff]  ;;  %vm44_vm0 = vcmask 64512   ;;  %vm46_vm1 = vcmask 588800   ;;  %s5539_s1 = smov 80   ;;  %s5540_s2 = smov 32   ;;  %vm123_vm2 = vcmask 654336  }
   0x4   :  { %v5610_v5 = vsub.s32 0, %v38_v3  ;;  %v55_v6 = vsub.s32 1, %v38_v3  ;;  %v69_v9 = vsub.s32 2, %v38_v3  ;;  %v83_v11 = vsub.s32 3, %v38_v3  ;;  %s5541_s20 = smov 112   ;;  %s5542_s21 = smov 64  }
   0x5   :  { %s5543_s22 = smov 16   ;;  %s5544_s23 = smov 96   ;;  %vm129_vm3 = vcmask 523264   ;;  %vm135_vm4 = vcmask 392192   ;;  %vm125_vm5 = vcmask 261120   ;;  %vm127_vm6 = vcmask 916480  }
   0x6   :  { %v40_v7 = vrot.slane %v35_v4, %v5610_v5  ;;  %v56_v8 = vrot.slane %v35_v4, %v55_v6  ;;  %v70_v10 = vrot.slane %v35_v4, %v69_v9  ;;  %v84_v12 = vrot.slane %v35_v4, %v83_v11  ;;  %s5545_s24 = smov 48   ;;  %s5546_s25 = smov 56  }
   0x7   :  { %s5547_s26 = smov 104   ;;  %s5548_s27 = smov 120   ;;  %vm131_vm7 = vcmask 130048   ;;  %vm133_vm8 = vcmask 785408   ;;  %vm240_vm9 = vcmask 850944   ;;  %vm454_vm10 = vcmask 326656  }
   0x8   :  { %41 = vrot.lane.b32.xlu0 %v40_v7, %s5530_s11  ;;  %57 = vrot.lane.b32.xlu1 %v56_v8, %s5530_s11  ;;  %s5549_s28 = smov 40   ;;  %s5550_s29 = smov 24   ;;  %vm256_vm11 = vcmask 457728   ;;  %vm266_vm12 = vcmask 195584   ;;  %vm470_vm13 = vcmask 982016   ;;  %vm480_vm14 = vcmask 719872  }
   0x9   :  { %s5551_s30 = smov 88   ;;  %vm5553_vm15 = vmmov 0  }
   0xc   :  { %48 = vrot.lane.b32.xlu0 %v40_v7, %s5531_s12  ;;  %62 = vrot.lane.b32.xlu1 %v56_v8, %s5531_s12 }
  0x10   :  { %71 = vrot.lane.b32.xlu0 %v70_v10, %s5530_s11  ;;  %76 = vrot.lane.b32.xlu1 %v70_v10, %s5531_s12 }
  0x14   :  { %85 = vrot.lane.b32.xlu0 %v84_v12, %s5530_s11  ;;  %193 = vperm.xlu1 %5345, %v189_v13  }
  0x18   :  { %142 = vperm.xlu1 %5345, %v138_v14   ;;  %90 = vrot.lane.b32.xlu0 %v84_v12, %s5531_s12 }
  0x1c   :  { %147 = vperm.xlu1 %5345, %v139_v15   ;;  %277 = vperm.xlu0 %5346, %v189_v13  }
  0x20   :  { %5347 = vset.pattern.permute.xlu1 %v5529_v2  ;;  %5349 = vset.pattern.permute.xlu0 %v5532_v17 }
  0x21   :  { %281 = vperm.xlu1 %5347, %v190_v16   ;;  %340 = vperm.xlu0 %5349, %v190_v16  }
  0x25   :  { %5348 = vset.pattern.permute.xlu1 %v5532_v17  ;;  %5350 = vset.pattern.permute.xlu0 %v5533_v18 }
  0x26   :  { %336 = vperm.xlu1 %5348, %v189_v13   ;;  %411 = vperm.xlu0 %5350, %v189_v13  }
  0x2a   :  { %5351 = vset.pattern.permute.xlu1 %v5533_v18  ;;  %5353 = vset.pattern.permute.xlu0 %v5534_v19 }
  0x2b   :  { %415 = vperm.xlu1 %5351, %v190_v16   ;;  %498 = vperm.xlu0 %5353, %v190_v16  }
  0x2f   :  { %5352 = vset.pattern.permute.xlu1 %v5534_v19  ;;  %5354 = vset.pattern.permute.xlu0 %v5535_v20 }
  0x30   :  { %494 = vperm.xlu1 %5352, %v189_v13   ;;  %558 = vperm.xlu0 %5354, %v189_v13  }
  0x34   :  { %5355 = vset.pattern.permute.xlu1 %v5535_v20  ;;  %5356 = vset.pattern.permute.xlu0 %v5536_v21 }
  0x35   :  { %562 = vperm.xlu1 %5355, %v190_v16   ;;  %606 = vperm.xlu0 %5356, %v189_v13  }
  0x39   :  { %5357 = vset.pattern.permute.xlu1 %v5536_v21  ;;  %5358 = vset.pattern.permute.xlu0 %v5537_v22  ;;  %v7007_v21 = vmov 0.0  }
  0x3a   :  { %610 = vperm.xlu1 %5357, %v190_v16   ;;  %644 = vperm.xlu0 %5358, %v189_v13  }
  0x3e   :  { %5359 = vset.pattern.permute.xlu1 %v5537_v22  ;;  %5361 = vset.pattern.permute.xlu0 %v5538_v23 }
  0x3f   :  { %648 = vperm.xlu1 %5359, %v190_v16   ;;  %684 = vperm.xlu0 %5361, %v190_v16  }
  0x43   :  { %5360 = vset.pattern.permute.xlu1 %v5538_v23  ;;  %5362 = vset.pattern.permute.xlu0 %v7009_v1 }
  0x44   :  { %680 = vperm.xlu1 %5360, %v189_v13   ;;  %198 = vperm.xlu0 %5362, %v190_v16  }
  0x48   :  { %5363 = vset.pattern.permute.xlu1 %v7009_v1 }
  0x7a   :  { %v42_v24 = vpop.permute.xlu0 %41  ;;  %v58_v25 = vpop.permute.xlu1 %57 }
  0x7b   :  { %v45_v26 = vsel %vm44_vm0, 0.0, %v42_v24  ;;  %v60_v27 = vsel %vm44_vm0, 0.0, %v58_v25 }
  0x7c   :  { %v47_v28 = vsel %vm46_vm1, %v45_v26, 0.0  ;;  %v61_v31 = vsel %vm46_vm1, %v60_v27, 0.0 }
  0x7d   :  { %96 = vrot.lane.b32.xlu1 %v47_v28, %s5539_s1 }
  0x7e   :  { %v49_v29 = vpop.permute.xlu0 %48  ;;  %v63_v30 = vpop.permute.xlu1 %62 }
  0x7f   :  { %v51_v32 = vsel %vm44_vm0, 0.0, %v49_v29  ;;  %v65_v33 = vsel %vm44_vm0, 0.0, %v63_v30 }
  0x80   :  { %v52_v34 = vsel %vm46_vm1, %v51_v32, 0.0  ;;  %v66_v35 = vsel %vm46_vm1, %v65_v33, 0.0 }
  0x81   :  { %100 = vrot.lane.b32.xlu0 %v52_v34, %s5540_s2  ;;  %104 = vrot.lane.b32.xlu1 %v61_v31, %s5541_s20 }
  0x82   :  { %v72_v36 = vpop.permute.xlu0 %71  ;;  %v77_v37 = vpop.permute.xlu1 %76 }
  0x83   :  { %v74_v38 = vsel %vm44_vm0, 0.0, %v72_v36  ;;  %v79_v39 = vsel %vm44_vm0, 0.0, %v77_v37 }
  0x84   :  { %v75_v40 = vsel %vm46_vm1, %v74_v38, 0.0  ;;  %v80_v41 = vsel %vm46_vm1, %v79_v39, 0.0 }
  0x85   :  { %108 = vrot.lane.b32.xlu0 %v66_v35, %s5542_s21  ;;  %112 = vrot.lane.b32.xlu1 %v75_v40, %s5543_s22 }
  0x86   :  { %v86_v42 = vpop.permute.xlu0 %85 }
  0x87   :  { %v88_v43 = vsel %vm44_vm0, 0.0, %v86_v42 }
  0x88   :  { %v89_v44 = vsel %vm46_vm1, %v88_v43, 0.0 }
  0x89   :  { %116 = vrot.lane.b32.xlu0 %v80_v41, %s5544_s23  ;;  %120 = vrot.lane.b32.xlu1 %v89_v44, %s5545_s24 }
  0x8a   :  { %v91_v45 = vpop.permute.xlu0 %90 }
  0x8b   :  { %v93_v46 = vsel %vm44_vm0, 0.0, %v91_v45 }
  0x8c   :  { %v94_v47 = vsel %vm46_vm1, %v93_v46, 0.0 }
  0x8d   :  { %v5659_v48 = vsel %vm123_vm2, %v94_v47, 0.0 }
  0x8e   :  { %7019 = vst [vmem:[#allocation3_spill] sm:$0xff] %v5659_v48  ;;  %486 = vrot.lane.b32.xlu0 %v5659_v48, %s5546_s25  ;;  %403 = vrot.lane.b32.xlu1 %v5659_v48, %s5542_s21 }
  0x92   :  { %598 = vrot.lane.b32.xlu0 %v5659_v48, %s5541_s20  ;;  %550 = vrot.lane.b32.xlu1 %v5659_v48, %s5545_s24 }
  0x93   :  { %v5669_v49 = vpop.permute.xlu1 %193 }
  0x97   :  { %v5671_v50 = vpop.permute.xlu1 %142 }
  0x9b   :  { %v5673_v51 = vpop.permute.xlu1 %147  ;;  %v5675_v52 = vpop.permute.xlu0 %277 }
  0xa0   :  { %v5677_v53 = vpop.permute.xlu1 %281  ;;  %v5679_v54 = vpop.permute.xlu0 %340 }
  0xa5   :  { %v5681_v55 = vpop.permute.xlu1 %336  ;;  %v5683_v56 = vpop.permute.xlu0 %411 }
  0xaa   :  { %v5685_v57 = vpop.permute.xlu1 %415  ;;  %v5687_v58 = vpop.permute.xlu0 %498 }
  0xab   :  { %7020 = vst [vmem:[#allocation4_spill] sm:$0xff] %v5685_v57 }
  0xaf   :  { %v5689_v59 = vpop.permute.xlu1 %494  ;;  %v5691_v60 = vpop.permute.xlu0 %558 }
  0xb4   :  { %v5693_v61 = vpop.permute.xlu1 %562  ;;  %v5695_v62 = vpop.permute.xlu0 %606 }
  0xb9   :  { %v5697_v63 = vpop.permute.xlu1 %610  ;;  %v5699_v0 = vpop.permute.xlu0 %644 }
  0xbe   :  { %v5701_v2 = vpop.permute.xlu1 %648  ;;  %v5703_v3 = vpop.permute.xlu0 %684 }
  0xbf   :  { %7021 = vst [vmem:[#allocation5_spill] sm:$0xff] %v5701_v2  ;;  %7022 = vst [vmem:[#allocation6_spill] sm:$0xff] %v5703_v3 }
  0xc3   :  { %v5705_v4 = vpop.permute.xlu1 %680  ;;  %v5707_v6 = vpop.permute.xlu0 %198 }
  0xef   :  { %v97_v7 = vpop.permute.xlu1 %96 }
  0xf0   :  { %v5710_v8 = vsel %vm123_vm2, 0.0, %v97_v7 }
  0xf1   :  { %152 = vrot.lane.b32.xlu1 %v5710_v8, %s5541_s20 }
  0xf3   :  { %v101_v9 = vpop.permute.xlu0 %100  ;;  %v105_v10 = vpop.permute.xlu1 %104 }
  0xf4   :  { %v126_v17 = vsel %vm125_vm5, %v97_v7, %v101_v9 }
  0xf5   :  { %236 = vrot.lane.b32.xlu1 %v5710_v8, %s5547_s26  ;;  %v128_v18 = vsel %vm127_vm6, %v126_v17, %v105_v10 }
  0xf7   :  { %v109_v11 = vpop.permute.xlu0 %108  ;;  %v113_v13 = vpop.permute.xlu1 %112 }
  0xf8   :  { %v5717_v12 = vsel %vm129_vm3, %v105_v10, %v109_v11  ;;  %v132_v19 = vsel %vm131_vm7, %v109_v11, %v113_v13 }
  0xf9   :  { %233 = vrot.lane.b32.xlu1 %v5710_v8, %s5548_s27  ;;  %164 = vrot.lane.b32.xlu0 %v5717_v12, %s5539_s1 }
  0xfb   :  { %v121_v14 = vpop.permute.xlu1 %120  ;;  %v117_v15 = vpop.permute.xlu0 %116 }
  0xfc   :  { %v5736_v16 = vsel %vm135_vm4, %v117_v15, %v121_v14  ;;  %v134_v20 = vsel %vm133_vm8, %v132_v19, %v117_v15 }
  0xfd   :  { %248 = vrot.lane.b32.xlu1 %v5717_v12, %s5531_s12  ;;  %317 = vrot.lane.b32.xlu0 %v5710_v8, %s5544_s23  ;;  %7023 = vst [vmem:[#allocation7_spill] sm:$0xff] %v5736_v16 }
 0x100   :  { %v404_v22 = vpop.permute.xlu1 %403  ;;  %v5803_v24 = vpop.permute.xlu0 %486 }
 0x101   :  { %168 = vrot.lane.b32.xlu1 %v5717_v12, %s5542_s21  ;;  %466 = vrot.lane.b32.xlu0 %v5717_v12, %s5548_s27 }
 0x104   :  { %v551_v23 = vpop.permute.xlu1 %550  ;;  %v5810_v26 = vpop.permute.xlu0 %598 }
 0x105   :  { %375 = vrot.lane.b32.xlu1 %v5710_v8, %s5545_s24  ;;  %322 = vrot.lane.b32.xlu0 %v5717_v12, %s5545_s24  ;;  %7024 = vst [vmem:[#allocation8_spill] sm:$0xff] %v5810_v26 }
 0x109   :  { %386 = vrot.lane.b32.xlu1 %v5717_v12, %s5543_s22  ;;  %269 = vrot.lane.b32.xlu0 %v5736_v16, %s5530_s11 }
 0x10d   :  { %450 = vrot.lane.b32.xlu1 %v5710_v8, %s5549_s28  ;;  %399 = vrot.lane.b32.xlu0 %v5736_v16, %s5539_s1 }
 0x111   :  { %462 = vrot.lane.b32.xlu1 %v5717_v12, %s5530_s11  ;;  %547 = vrot.lane.b32.xlu0 %v5736_v16, %s5542_s21 }
 0x115   :  { %533 = vrot.lane.b32.xlu1 %v5710_v8, %s5540_s2  ;;  %154 = vrot.lane.b32.xlu0 %v128_v18, %s5541_s20 }
 0x119   :  { %538 = vrot.lane.b32.xlu1 %v5717_v12, %s5541_s20  ;;  %238 = vrot.lane.b32.xlu0 %v128_v18, %s5547_s26 }
 0x11d   :  { %252 = vrot.lane.b32.xlu1 %v5717_v12, %s5546_s25  ;;  %246 = vrot.lane.b32.xlu0 %v128_v18, %s5531_s12 }
 0x121   :  { %377 = vrot.lane.b32.xlu0 %v128_v18, %s5545_s24  ;;  %178 = vrot.lane.b32.xlu1 %v5736_v16, %s5540_s2 }
 0x125   :  { %384 = vrot.lane.b32.xlu0 %v128_v18, %s5543_s22  ;;  %182 = vrot.lane.b32.xlu1 %v5736_v16, %s5543_s22 }
 0x129   :  { %452 = vrot.lane.b32.xlu0 %v128_v18, %s5549_s28  ;;  %264 = vrot.lane.b32.xlu1 %v5736_v16, %s5550_s29 }
 0x12d   :  { %460 = vrot.lane.b32.xlu0 %v128_v18, %s5530_s11  ;;  %395 = vrot.lane.b32.xlu1 %v5736_v16, %s5544_s23 }
 0x131   :  { %478 = vrot.lane.b32.xlu1 %v5736_v16, %s5551_s30  ;;  %390 = vrot.lane.b32.xlu0 %v134_v20, %s5541_s20 }
 0x135   :  { %483 = vrot.lane.b32.xlu1 %v5736_v16, %s5531_s12  ;;  %254 = vrot.lane.b32.xlu0 %v134_v20, %s5546_s25 }
 0x139   :  { %162 = vrot.lane.b32.xlu1 %v128_v18, %s5539_s1  ;;  %636 = vrot.lane.b32.xlu0 %v5659_v48, %s5547_s26 }
 0x13d   :  { %158 = vrot.lane.b32.xlu1 %v128_v18, %s5544_s23  ;;  %176 = vrot.lane.b32.xlu0 %v134_v20, %s5540_s2 }
 0x141   :  { %243 = vrot.lane.b32.xlu1 %v128_v18, %s5551_s30  ;;  %262 = vrot.lane.b32.xlu0 %v134_v20, %s5550_s29 }
 0x145   :  { %381 = vrot.lane.b32.xlu1 %v128_v18, %s5540_s2  ;;  %393 = vrot.lane.b32.xlu0 %v134_v20, %s5544_s23 }
 0x149   :  { %457 = vrot.lane.b32.xlu1 %v128_v18, %s5550_s29  ;;  %476 = vrot.lane.b32.xlu0 %v134_v20, %s5551_s30 }
 0x14d   :  { %473 = vrot.lane.b32.xlu0 %v134_v20, %s5547_s26  ;;  %468 = vrot.lane.b32.xlu1 %v134_v20, %s5548_s27 }
 0x151   :  { %633 = vrot.lane.b32.xlu0 %v5659_v48, %s5548_s27  ;;  %172 = vrot.lane.b32.xlu1 %v134_v20, %s5545_s24 }
 0x155   :  { %259 = vrot.lane.b32.xlu1 %v134_v20, %s5549_s28  ;;  %674 = vrot.lane.b32.xlu0 %v7007_v21, %s5544_s23 }
 0x159   :  { %600 = vrot.lane.b32.xlu1 %v7007_v21, %s5541_s20 }
 0x15d   :  { %327 = vrot.lane.b32.xlu1 %v134_v20, %s5543_s22 }
 0x161   :  { %543 = vrot.lane.b32.xlu1 %v134_v20, %s5539_s1 }
 0x163   :  { %v5806_v25 = vpop.permute.xlu1 %152 }
 0x165   :  { %638 = vrot.lane.b32.xlu1 %v7007_v21, %s5547_s26 }
 0x167   :  { %v237_v27 = vpop.permute.xlu1 %236 }
 0x169   :  { %672 = vrot.lane.b32.xlu1 %v5659_v48, %s5544_s23 }
 0x16b   :  { %v234_v28 = vpop.permute.xlu1 %233  ;;  %v5814_v29 = vpop.permute.xlu0 %164 }
 0x16f   :  { %v5816_v30 = vpop.permute.xlu1 %248  ;;  %v5818_v31 = vpop.permute.xlu0 %317 }
 0x173   :  { %v5820_v32 = vpop.permute.xlu1 %168  ;;  %v5822_v33 = vpop.permute.xlu0 %466 }
 0x177   :  { %v5824_v34 = vpop.permute.xlu1 %375  ;;  %v5826_v35 = vpop.permute.xlu0 %322 }
 0x178   :  { %7025 = vst [vmem:[#allocation9_spill] sm:$0xff] %v5826_v35 }
 0x17b   :  { %v387_v36 = vpop.permute.xlu1 %386  ;;  %v5828_v37 = vpop.permute.xlu0 %269 }
 0x17f   :  { %v5830_v38 = vpop.permute.xlu1 %450  ;;  %v5832_v39 = vpop.permute.xlu0 %399 }
 0x180   :  { %7026 = vst [vmem:[#allocation10_spill] sm:$0xff] %v5832_v39  ;;  %v409_v16 = vsel %vm129_vm3, %v5832_v39, %v404_v22 }
 0x183   :  { %v5834_v40 = vpop.permute.xlu1 %462  ;;  %v548_v41 = vpop.permute.xlu0 %547 }
 0x184   :  { %v556_v48 = vsel %vm129_vm3, %v548_v41, %v551_v23 }
 0x187   :  { %v5836_v42 = vpop.permute.xlu1 %533  ;;  %v155_v43 = vpop.permute.xlu0 %154 }
 0x188   :  { %v156_v18 = vsel %vm127_vm6, %v5806_v25, %v155_v43 }
 0x189   :  { %v185_v19 = vsel %vm129_vm3, %v5710_v8, %v156_v18 }
 0x18a   :  { %v204_v26 = vrot.slane %v185_v19, %v5610_v5 }
 0x18b   :  { %v539_v44 = vpop.permute.xlu1 %538  ;;  %v239_v45 = vpop.permute.xlu0 %238 }
 0x18c   :  { %v241_v20 = vsel %vm240_vm9, %v237_v27, %v239_v45  ;;  %v433_v27 = vrot.slane %v409_v16, %v5610_v5  ;;  %v580_v45 = vrot.slane %v556_v48, %v5610_v5  ;;  %v217_v23 = vmul.f32 %v204_v26, %v5669_v49 }
 0x18d   :  { %v272_v35 = vsel %vm129_vm3, %v234_v28, %v241_v20  ;;  %v221_v41 = vmul.f32 %v204_v26, %v5707_v6 }
 0x18e   :  { %v287_v18 = vrot.slane %v272_v35, %v5610_v5  ;;  %v5878_v48 = vmul.f32 %v433_v27, %v5683_v56  ;;  %v5881_v35 = vmul.f32 %v433_v27, %v5685_v57 }
 0x18f   :  { %v5838_v46 = vpop.permute.xlu1 %252  ;;  %v247_v47 = vpop.permute.xlu0 %246 }
 0x190   :  { %7028 = vst [vmem:[#allocation12_spill] sm:$0xff] %v5878_v48  ;;  %7029 = vst [vmem:[#allocation13_spill] sm:$0xff] %v5881_v35  ;;  %v300_v26 = vmul.f32 %v287_v18, %v5675_v52 }
 0x193   :  { %v179_v7 = vpop.permute.xlu1 %178  ;;  %v378_v9 = vpop.permute.xlu0 %377 }
 0x197   :  { %v5840_v10 = vpop.permute.xlu1 %182  ;;  %v5842_v11 = vpop.permute.xlu0 %384 }
 0x198   :  { %v388_v8 = vsel %vm131_vm7, %v5842_v11, %v387_v36  ;;  %v5884_v36 = vmul.f32 %v580_v45, %v5691_v60 }
 0x199   :  { %v407_v28 = vsel %vm129_vm3, %v388_v8, %v5717_v12  ;;  %v225_v8 = vadd.f32 %v217_v23, %v5671_v50 }
 0x19a   :  { %7030 = vst [vmem:[#allocation14_spill] sm:$0xff] %v5884_v36 }
 0x19b   :  { %v5844_v13 = vpop.permute.xlu1 %264  ;;  %v453_v14 = vpop.permute.xlu0 %452 }
 0x19f   :  { %v5846_v15 = vpop.permute.xlu1 %395  ;;  %v461_v17 = vpop.permute.xlu0 %460 }
 0x1a3   :  { %v5853_v21 = vpop.permute.xlu1 %478  ;;  %v5855_v1 = vpop.permute.xlu0 %390 }
 0x1a4   :  { %v540_v22 = vsel %vm127_vm6, %v539_v44, %v5855_v1  ;;  %v5888_v44 = vmul.f32 %v580_v45, %v5693_v61 }
 0x1a5   :  { %v554_v16 = vsel %vm129_vm3, %v5717_v12, %v540_v22  ;;  %v425_v12 = vrot.slane %v407_v28, %v5610_v5  ;;  %v229_v22 = vadd.f32 %v221_v41, %v5673_v51  ;;  %v308_v28 = vadd.f32 %v300_v26, %v225_v8 }
 0x1a6   :  { %7031 = vst [vmem:[#allocation15_spill] sm:$0xff] %v5888_v44  ;;  %v572_v48 = vrot.slane %v554_v16, %v5610_v5 }
 0x1a7   :  { %v484_v43 = vpop.permute.xlu1 %483  ;;  %v255_v2 = vpop.permute.xlu0 %254 }
 0x1a8   :  { %v492_v27 = vsel %vm129_vm3, %v484_v43, %v5803_v24  ;;  %v250_v24 = vsel %vm46_vm1, %v247_v47, %v5816_v30  ;;  %v5935_v8 = vmul.f32 %v572_v48, %v5693_v61 }
 0x1ab   :  { %v163_v19 = vpop.permute.xlu1 %162  ;;  %v5873_v20 = vpop.permute.xlu0 %636 }
 0x1ac   :  { %7027 = vst [vmem:[#allocation11_spill] sm:$0xff] %v5873_v20  ;;  %v304_v20 = vmul.f32 %v287_v18, %v5677_v53  ;;  %v166_v36 = vsel %vm123_vm2, %v163_v19, %v5814_v29  ;;  %v332_v45 = vsel %vm129_vm3, %v163_v19, %v5820_v32  ;;  %v379_v19 = vsel %vm135_vm4, %v5824_v34, %v378_v9 }
 0x1ad   :  { %v455_v34 = vsel %vm454_vm10, %v5830_v38, %v453_v14  ;;  %v464_v9 = vsel %vm44_vm0, %v461_v17, %v5834_v40 }
 0x1ae   :  { %v312_v16 = vadd.f32 %v304_v20, %v229_v22  ;;  %v5932_v20 = vmul.f32 %v572_v48, %v5691_v60  ;;  %v5939_v22 = vsel %vm256_vm11, %v5838_v46, %v255_v2 }
 0x1af   :  { %v159_v35 = vpop.permute.xlu1 %158  ;;  %v5899_v39 = vpop.permute.xlu0 %176 }
 0x1b0   :  { %v186_v18 = vsel %vm129_vm3, %v159_v35, %v166_v36  ;;  %v319_v23 = vsel %vm133_vm8, %v5818_v31, %v159_v35  ;;  %v180_v41 = vsel %vm125_vm5, %v5899_v39, %v179_v7  ;;  %v5916_v36 = vmul.f32 %v425_v12, %v5683_v56 }
 0x1b1   :  { %v208_v29 = vrot.slane %v186_v18, %v5610_v5  ;;  %v331_v43 = vsel %vm129_vm3, %v5806_v25, %v319_v23  ;;  %v516_v31 = vrot.slane %v492_v27, %v5610_v5  ;;  %v350_v7 = vrot.slane %v332_v45, %v5610_v5 }
 0x1b2   :  { %v346_v30 = vrot.slane %v331_v43, %v5610_v5  ;;  %v188_v47 = vsel %vm129_vm3, %v180_v41, %v5840_v10  ;;  %v5925_v25 = vmul.f32 %v425_v12, %v5685_v57 }
 0x1b3   :  { %v218_v35 = vmul.f32 %v208_v29, %v5669_v49  ;;  %v244_v26 = vpop.permute.xlu1 %243  ;;  %v222_v27 = vmul.f32 %v208_v29, %v5707_v6  ;;  %v5944_v38 = vmul.f32 %v516_v31, %v5689_v59  ;;  %v5947_v40 = vmul.f32 %v516_v31, %v5687_v58  ;;  %v263_v48 = vpop.permute.xlu0 %262 }
 0x1b4   :  { %v273_v12 = vsel %vm129_vm3, %v244_v26, %v250_v24  ;;  %v5950_v14 = vrot.slane %v188_v47, %v5610_v5  ;;  %v360_v2 = vmul.f32 %v350_v7, %v5681_v55  ;;  %v364_v46 = vmul.f32 %v350_v7, %v5679_v54 }
 0x1b5   :  { %7032 = vst [vmem:[#allocation16_spill] sm:$0xff] %v5944_v38  ;;  %7033 = vst [vmem:[#allocation17_spill] sm:$0xff] %v5947_v40  ;;  %v291_v17 = vrot.slane %v273_v12, %v5610_v5  ;;  %v226_v45 = vadd.f32 %v218_v35, %v5671_v50  ;;  %v359_v18 = vmul.f32 %v346_v30, %v5681_v55 }
 0x1b6   :  { %v230_v47 = vadd.f32 %v222_v27, %v5673_v51  ;;  %v363_v26 = vmul.f32 %v346_v30, %v5679_v54  ;;  %v220_v44 = vmul.f32 %v5950_v14, %v5669_v49  ;;  %v267_v38 = vsel %vm266_vm12, %v263_v48, %v5844_v13 }
 0x1b7   :  { %v382_v23 = vpop.permute.xlu1 %381  ;;  %v301_v41 = vmul.f32 %v291_v17, %v5675_v52  ;;  %v305_v24 = vmul.f32 %v291_v17, %v5677_v53  ;;  %v275_v48 = vsel %vm129_vm3, %v267_v38, %v5828_v37 }
 0x1b8   :  { %v406_v43 = vsel %vm129_vm3, %v379_v19, %v382_v23  ;;  %v535_v31 = vsel %vm125_vm5, %v5836_v42, %v382_v23  ;;  %v5972_v19 = vmul.f32 %v5705_v4, %v350_v7  ;;  %v5999_v38 = vrot.slane %v275_v48, %v5610_v5 }
 0x1b9   :  { %v421_v12 = vrot.slane %v406_v43, %v5610_v5  ;;  %v553_v35 = vsel %vm129_vm3, %v535_v31, %v5842_v11  ;;  %v309_v40 = vadd.f32 %v301_v41, %v226_v45  ;;  %v313_v42 = vadd.f32 %v305_v24, %v230_v47  ;;  %v5982_v41 = vpop.permute.xlu0 %393 }
 0x1ba   :  { %v5977_v43 = vmul.f32 %v5703_v3, %v350_v7  ;;  %v224_v11 = vmul.f32 %v5950_v14, %v5707_v6  ;;  %v367_v31 = vadd.f32 %v359_v18, %v308_v28  ;;  %v568_v45 = vrot.slane %v553_v35, %v5610_v5 }
 0x1bb   :  { %v434_v27 = vmul.f32 %v421_v12, %v5683_v56  ;;  %v438_v30 = vmul.f32 %v421_v12, %v5685_v57  ;;  %v458_v23 = vpop.permute.xlu1 %457  ;;  %v371_v24 = vadd.f32 %v363_v26, %v312_v16  ;;  %v617_v7 = vmul.f32 %v5695_v62, %v208_v29 }
 0x1bc   :  { %v489_v13 = vsel %vm129_vm3, %v455_v34, %v458_v23  ;;  %v5990_v12 = vadd.f32 %v220_v44, %v5671_v50  ;;  %v368_v28 = vadd.f32 %v360_v2, %v309_v40  ;;  %v621_v18 = vmul.f32 %v5697_v63, %v208_v29 }
 0x1bd   :  { %v504_v47 = vrot.slane %v489_v13, %v5610_v5  ;;  %v442_v57 = vadd.f32 %v434_v27, %v367_v31  ;;  %v446_v35 = vadd.f32 %v438_v30, %v371_v24  ;;  %v372_v37 = vadd.f32 %v364_v46, %v313_v42  ;;  %v477_v42 = vpop.permute.xlu0 %476 }
 0x1be   :  { %v5996_v16 = vadd.f32 %v224_v11, %v5673_v51  ;;  %v581_v44 = vmul.f32 %v568_v45, %v5691_v60  ;;  %v585_v29 = vmul.f32 %v568_v45, %v5693_v61  ;;  %v397_v46 = vsel %vm133_vm8, %v5982_v41, %v5846_v15 }
 0x1bf   :  { %v517_v3 = vmul.f32 %v504_v47, %v5689_v59  ;;  %v521_v34 = vmul.f32 %v504_v47, %v5687_v58  ;;  %v469_v23 = vpop.permute.xlu1 %468  ;;  %v443_v30 = vadd.f32 %v5916_v36, %v368_v28  ;;  %v655_v31 = vmul.f32 %v5699_v0, %v291_v17  ;;  %v7035_v47 = vld [vmem:[#allocation9_spill] sm:$0xff] }
 0x1c0   :  { %v471_v40 = vsel %vm470_vm13, %v5822_v33, %v469_v23  ;;  %v447_v33 = vadd.f32 %v5925_v25, %v372_v37 }
 0x1c1   :  { %v525_v2 = vadd.f32 %v517_v3, %v442_v57  ;;  %v529_v26 = vadd.f32 %v521_v34, %v446_v35  ;;  %v490_v27 = vsel %vm129_vm3, %v464_v9, %v471_v40  ;;  %v7034_v57 = vld [vmem:[#allocation5_spill] sm:$0xff] }
 0x1c2   :  { %v508_v11 = vrot.slane %v490_v27, %v5610_v5  ;;  %v659_v3 = vmul.f32 %v7034_v57, %v291_v17  ;;  %v303_v17 = vmul.f32 %v5999_v38, %v5675_v52 }
 0x1c3   :  { %v589_v13 = vadd.f32 %v581_v44, %v525_v2  ;;  %v593_v48 = vadd.f32 %v585_v29, %v529_v26  ;;  %v173_v45 = vpop.permute.xlu1 %172  ;;  %v6027_v44 = vmul.f32 %v5695_v62, %v5950_v14 }
 0x1c4   :  { %v518_v9 = vmul.f32 %v508_v11, %v5689_v59  ;;  %v522_v24 = vmul.f32 %v508_v11, %v5687_v58  ;;  %v187_v15 = vsel %vm129_vm3, %v5820_v32, %v173_v45  ;;  %v324_v36 = vsel %vm135_vm4, %v7035_v47, %v173_v45 }
 0x1c5   :  { %v212_v28 = vrot.slane %v187_v15, %v5610_v5  ;;  %v333_v35 = vsel %vm129_vm3, %v324_v36, %v5899_v39  ;;  %v625_v34 = vadd.f32 %v617_v7, %v589_v13  ;;  %v629_v25 = vadd.f32 %v621_v18, %v593_v48  ;;  %v474_v18 = vpop.permute.xlu0 %473 }
 0x1c6   :  { %v526_v23 = vadd.f32 %v518_v9, %v443_v30  ;;  %v530_v37 = vadd.f32 %v522_v24, %v447_v33  ;;  %v307_v32 = vmul.f32 %v5999_v38, %v5677_v53  ;;  %v408_v39 = vsel %vm129_vm3, %v5855_v1, %v397_v46 }
 0x1c7   :  { %v219_v40 = vmul.f32 %v212_v28, %v5669_v49  ;;  %v260_v29 = vpop.permute.xlu1 %259  ;;  %v663_v2 = vadd.f32 %v655_v31, %v625_v34  ;;  %v667_v26 = vadd.f32 %v659_v3, %v629_v25  ;;  %v481_v7 = vsel %vm480_vm14, %v477_v42, %v5853_v21 }
 0x1c8   :  { %v223_v27 = vmul.f32 %v212_v28, %v5707_v6  ;;  %v354_v30 = vrot.slane %v333_v35, %v5610_v5  ;;  %v590_v11 = vadd.f32 %v5932_v20, %v526_v23  ;;  %v594_v13 = vadd.f32 %v5935_v8, %v530_v37  ;;  %v7036_v35 = vld [vmem:[#allocation8_spill] sm:$0xff] }
 0x1c9   :  { %v274_v49 = vsel %vm129_vm3, %v5939_v22, %v260_v29  ;;  %v699_v31 = vadd.f32 %v5972_v19, %v663_v2  ;;  %v703_v1 = vadd.f32 %v5977_v43, %v667_v26  ;;  %v618_v21 = vmul.f32 %v5695_v62, %v212_v28 }
 0x1ca   :  { %v295_v48 = vrot.slane %v274_v49, %v5610_v5  ;;  %v622_v46 = vmul.f32 %v5697_v63, %v212_v28  ;;  %v429_v6 = vrot.slane %v408_v39, %v5610_v5  ;;  %v491_v42 = vsel %vm129_vm3, %v474_v18, %v481_v7  ;;  %v7037_v39 = vld [vmem:[#allocation6_spill] sm:$0xff] }
 0x1cb   :  { %v227_v20 = vadd.f32 %v219_v40, %v5671_v50  ;;  %v601_v8 = vpop.permute.xlu1 %600  ;;  %v707_v33 = vmax.f32 %v699_v31, 0.0  ;;  %v231_v22 = vadd.f32 %v223_v27, %v5673_v51  ;;  %v711_v3 = vmax.f32 %v703_v1, 0.0  ;;  %v7040_v31 = vld [vmem:[#allocation7_spill] sm:$0xff] }
 0x1cc   :  { %v302_v19 = vmul.f32 %v295_v48, %v5675_v52  ;;  %v306_v45 = vmul.f32 %v295_v48, %v5677_v53  ;;  %v361_v43 = vmul.f32 %v354_v30, %v5681_v55  ;;  %v626_v9 = vadd.f32 %v618_v21, %v590_v11  ;;  %v7038_v11 = vld [vmem:[#allocation4_spill] sm:$0xff] }
 0x1cd   :  { %v630_v24 = vadd.f32 %v622_v46, %v594_v13  ;;  %v656_v15 = vmul.f32 %v5699_v0, %v295_v48  ;;  %v365_v47 = vmul.f32 %v354_v30, %v5679_v54  ;;  %v715_v50 = vpack.c.bf16 %v711_v3, %v707_v33 }
 0x1ce   :  { %v310_v36 = vadd.f32 %v302_v19, %v227_v20  ;;  %v314_v28 = vadd.f32 %v306_v45, %v231_v22  ;;  %v602_v34 = vsel %vm127_vm6, %v7036_v35, %v601_v8  ;;  %v660_v52 = vmul.f32 %v7034_v57, %v295_v48 }
 0x1cf   :  { %v328_v51 = vpop.permute.xlu1 %327  ;;  %v664_v25 = vadd.f32 %v656_v15, %v626_v9  ;;  %v692_v53 = vmul.f32 %v5705_v4, %v354_v30  ;;  %v436_v23 = vmul.f32 %v429_v6, %v5683_v56  ;;  %v512_v37 = vrot.slane %v491_v42, %v5610_v5  ;;  %726 = vrot.lane.b32.xlu0 %v715_v50, %s5531_s12  ;;  %v7039_v56 = vld [vmem:[#allocation3_spill] sm:$0xff] }
 0x1d0   :  { %v369_v40 = vadd.f32 %v361_v43, %v310_v36  ;;  %v373_v29 = vadd.f32 %v365_v47, %v314_v28  ;;  %v329_v2 = vsel %vm131_vm7, %v328_v51, %v5840_v10  ;;  %720 = vrot.lane.b32.xlu1 %v715_v50, %s5530_s11  ;;  %v668_v26 = vadd.f32 %v660_v52, %v630_v24  ;;  %v7042_v36 = vld [vmem:[#allocation11_spill] sm:$0xff]  ;;  %v7043_v28 = vld [vmem:[#allocation12_spill] sm:$0xff] }
 0x1d1   :  { %v696_v7 = vmul.f32 %v7037_v39, %v354_v30  ;;  %v700_v18 = vadd.f32 %v692_v53, %v664_v25  ;;  %v311_v27 = vadd.f32 %v303_v17, %v5990_v12  ;;  %v440_v13 = vmul.f32 %v429_v6, %v7038_v11  ;;  %v7041_v12 = vld [vmem:[#allocation10_spill] sm:$0xff]  ;;  %v634_v6 = vpop.permute.xlu0 %633 }
 0x1d2   :  { %v604_v49 = vsel %vm129_vm3, %v7039_v56, %v602_v34  ;;  %v334_v48 = vsel %vm129_vm3, %v329_v2, %v7040_v31  ;;  %v444_v10 = vadd.f32 %v436_v23, %v369_v40  ;;  %v315_v20 = vadd.f32 %v307_v32, %v5996_v16  ;;  %v7047_v56 = vld [vmem:[#allocation14_spill] sm:$0xff]  ;;  %v7048_v31 = vld [vmem:[#allocation15_spill] sm:$0xff] }
 0x1d3   :  { %v358_v1 = vrot.slane %v334_v48, %v5610_v5  ;;  %v544_v21 = vpop.permute.xlu1 %543  ;;  %v704_v46 = vadd.f32 %v696_v7, %v668_v26  ;;  %v708_v42 = vmax.f32 %v700_v18, 0.0  ;;  %v519_v30 = vmul.f32 %v512_v37, %v5689_v59 }
 0x1d4   :  { %v448_v8 = vadd.f32 %v440_v13, %v373_v29  ;;  %v545_v17 = vsel %vm123_vm2, %v544_v21, %v7041_v12  ;;  %v523_v3 = vmul.f32 %v512_v37, %v5687_v58  ;;  %v616_v43 = vrot.slane %v604_v49, %v5610_v5  ;;  %v7045_v37 = vld [vmem:[#allocation16_spill] sm:$0xff]  ;;  %v7046_v29 = vld [vmem:[#allocation17_spill] sm:$0xff] }
 0x1d5   :  { %v362_v33 = vmul.f32 %v358_v1, %v5681_v55  ;;  %v366_v22 = vmul.f32 %v358_v1, %v5679_v54  ;;  %v555_v19 = vsel %vm129_vm3, %v5982_v41, %v545_v17  ;;  %v712_v45 = vmax.f32 %v704_v46, 0.0  ;;  %v675_v52 = vpop.permute.xlu0 %674 }
 0x1d6   :  { %v576_v16 = vrot.slane %v555_v19, %v5610_v5  ;;  %v623_v59 = vmul.f32 %v5697_v63, %v5950_v14  ;;  %v527_v24 = vadd.f32 %v519_v30, %v444_v10  ;;  %v531_v47 = vadd.f32 %v523_v3, %v448_v8  ;;  %v7044_v14 = vld [vmem:[#allocation13_spill] sm:$0xff] }
 0x1d7   :  { %v370_v32 = vadd.f32 %v362_v33, %v311_v27  ;;  %v374_v9 = vadd.f32 %v366_v22, %v315_v20  ;;  %v716_v15 = vpack.c.bf16 %v712_v45, %v708_v42  ;;  %v639_v55 = vpop.permute.xlu1 %638  ;;  %v620_v23 = vmul.f32 %v616_v43, %v5695_v62 }
 0x1d8   :  { %v583_v54 = vmul.f32 %v576_v16, %v5691_v60  ;;  %v587_v41 = vmul.f32 %v576_v16, %v5693_v61  ;;  %v640_v58 = vsel %vm240_vm9, %v7042_v36, %v639_v55  ;;  %v657_v61 = vmul.f32 %v5699_v0, %v5999_v38 }
 0x1d9   :  { %737 = vrot.lane.b32.xlu0 %v716_v15, %s5531_s12  ;;  %732 = vrot.lane.b32.xlu1 %v716_v15, %s5530_s11  ;;  %v445_v50 = vadd.f32 %v7043_v28, %v370_v32  ;;  %v449_v34 = vadd.f32 %v7044_v14, %v374_v9  ;;  %v642_v51 = vsel %vm129_vm3, %v634_v6, %v640_v58 }
 0x1da   :  { %v591_v25 = vadd.f32 %v583_v54, %v527_v24  ;;  %v595_v53 = vadd.f32 %v587_v41, %v531_v47  ;;  %v654_v60 = vrot.slane %v642_v51, %v5610_v5  ;;  %v661_v7 = vmul.f32 %v7034_v57, %v5999_v38 }
 0x1db   :  { %v528_v40 = vadd.f32 %v7045_v37, %v445_v50  ;;  %v532_v2 = vadd.f32 %v7046_v29, %v449_v34  ;;  %v673_v26 = vpop.permute.xlu1 %672  ;;  %v624_v18 = vmul.f32 %v616_v43, %v5697_v63  ;;  %v693_v13 = vmul.f32 %v5705_v4, %v358_v1 }
 0x1dc   :  { %v676_v27 = vsel %vm133_vm8, %v673_v26, %v675_v52  ;;  %v627_v11 = vadd.f32 %v6027_v44, %v591_v25  ;;  %v631_v21 = vadd.f32 %v623_v59, %v595_v53  ;;  %v658_v10 = vmul.f32 %v654_v60, %v5699_v0 }
 0x1dd   :  { %v592_v49 = vadd.f32 %v7047_v56, %v528_v40  ;;  %v596_v62 = vadd.f32 %v7048_v31, %v532_v2  ;;  %v678_v48 = vsel %vm129_vm3, %v7036_v35, %v676_v27  ;;  %v697_v63 = vmul.f32 %v7037_v39, %v358_v1 }
 0x1de   :  { %v690_v38 = vrot.slane %v678_v48, %v5610_v5  ;;  %v665_v46 = vadd.f32 %v657_v61, %v627_v11  ;;  %v662_v44 = vmul.f32 %v654_v60, %v7034_v57  ;;  %v669_v30 = vadd.f32 %v661_v7, %v631_v21 }
 0x1df   :  { %v628_v42 = vadd.f32 %v620_v23, %v592_v49  ;;  %v632_v20 = vadd.f32 %v624_v18, %v596_v62 }
 0x1e0   :  { %v694_v8 = vmul.f32 %v690_v38, %v5705_v4  ;;  %v698_v12 = vmul.f32 %v690_v38, %v7037_v39  ;;  %v701_v17 = vadd.f32 %v693_v13, %v665_v46  ;;  %v705_v33 = vadd.f32 %v697_v63, %v669_v30  ;;  %v5444_v63 = vld [vmem:[%s7000_s3] sm:$0xff]  }
 0x1e1   :  { %v666_v6 = vadd.f32 %v658_v10, %v628_v42  ;;  %v670_v35 = vadd.f32 %v662_v44, %v632_v20  ;;  %v7049_v42 = vmov 0   ;;  %v5445_v20 = vld [vmem:[%s7000_s3 + $0x8] sm:$0xff]  }
 0x1e2   :  { %v709_v22 = vmax.f32 %v701_v17, 0.0  ;;  %v713_v45 = vmax.f32 %v705_v33, 0.0 }
 0x1e3   :  { %v702_v0 = vadd.f32 %v694_v8, %v666_v6  ;;  %v706_v19 = vadd.f32 %v698_v12, %v670_v35 }
 0x1e4   :  { %v717_v3 = vpack.c.bf16 %v713_v45, %v709_v22 }
 0x1e5   :  { %v710_v43 = vmax.f32 %v702_v0, 0.0  ;;  %v714_v1 = vmax.f32 %v706_v19, 0.0 }
 0x1e6   :  { %748 = vrot.lane.b32.xlu0 %v717_v3, %s5531_s12  ;;  %743 = vrot.lane.b32.xlu1 %v717_v3, %s5530_s11 }
 0x1e7   :  { %v6120_v57 = vpack.c.bf16 %v714_v1, %v710_v43 }
 0x1ea   :  { %754 = vrot.lane.b32.xlu1 %v6120_v57, %s5530_s11 }
 0x241   :  { %v727_v4 = vpop.permute.xlu0 %726 }
 0x242   :  { %v721_v39 = vpop.permute.xlu1 %720  ;;  %v729_v16 = vsel %vm44_vm0, 0, %v727_v4 }
 0x243   :  { %v724_v59 = vsel %vm44_vm0, 0, %v721_v39  ;;  %v730_v32 = vsel %vm46_vm1, %v729_v16, 0 }
 0x244   :  { %v725_v9 = vsel %vm46_vm1, %v724_v59, 0  ;;  %768 = vrot.lane.b32.xlu1 %v730_v32, %s5540_s2 }
 0x245   :  { %765 = vrot.lane.b32.xlu0 %v725_v9, %s5539_s1  ;;  %v5446_v9 = vld [vmem:[%s7000_s3 + $0x10] sm:$0xff]  }
 0x24b   :  { %v733_v24 = vpop.permute.xlu1 %732  ;;  %v738_v15 = vpop.permute.xlu0 %737 }
 0x24c   :  { %v735_v55 = vsel %vm44_vm0, 0, %v733_v24  ;;  %v740_v47 = vsel %vm44_vm0, 0, %v738_v15 }
 0x24d   :  { %v741_v54 = vsel %vm46_vm1, %v740_v47, 0  ;;  %v736_v41 = vsel %vm46_vm1, %v735_v55, 0 }
 0x24e   :  { %771 = vrot.lane.b32.xlu0 %v736_v41, %s5541_s20  ;;  %774 = vrot.lane.b32.xlu1 %v741_v54, %s5542_s21 }
 0x258   :  { %v744_v36 = vpop.permute.xlu1 %743  ;;  %v749_v58 = vpop.permute.xlu0 %748 }
 0x259   :  { %v746_v28 = vsel %vm44_vm0, 0, %v744_v36  ;;  %v751_v50 = vsel %vm44_vm0, 0, %v749_v58 }
 0x25a   :  { %v752_v14 = vsel %vm46_vm1, %v751_v50, 0  ;;  %v747_v34 = vsel %vm46_vm1, %v746_v28, 0  ;;  %v5447_v50 = vld [vmem:[%s7000_s3 + $0x18] sm:$0xff]  }
 0x25b   :  { %777 = vrot.lane.b32.xlu0 %v747_v34, %s5543_s22  ;;  %780 = vrot.lane.b32.xlu1 %v752_v14, %s5544_s23 }
 0x25c   :  { %v755_v51 = vpop.permute.xlu1 %754 }
 0x25d   :  { %v757_v52 = vsel %vm44_vm0, 0, %v755_v51 }
 0x25e   :  { %v758_v25 = vsel %vm46_vm1, %v757_v52, 0 }
 0x25f   :  { %783 = vrot.lane.b32.xlu0 %v758_v25, %s5545_s24 }
 0x2b6   :  { %v769_v61 = vpop.permute.xlu1 %768 }
 0x2b7   :  { %v766_v53 = vpop.permute.xlu0 %765 }
 0x2b8   :  { %v6146_v60 = vsel %vm123_vm2, 0, %v766_v53  ;;  %v788_v23 = vsel %vm125_vm5, %v766_v53, %v769_v61 }
 0x2b9   :  { %826 = vrot.lane.b32.xlu1 %v6146_v60, %s5541_s20 }
 0x2c0   :  { %v775_v37 = vpop.permute.xlu1 %774  ;;  %v772_v40 = vpop.permute.xlu0 %771 }
 0x2c1   :  { %v6152_v29 = vsel %vm127_vm6, %v788_v23, %v772_v40  ;;  %v6155_v2 = vsel %vm129_vm3, %v772_v40, %v775_v37 }
 0x2c2   :  { %837 = vrot.lane.b32.xlu0 %v6155_v2, %s5539_s1  ;;  %835 = vrot.lane.b32.xlu1 %v6152_v29, %s5539_s1 }
 0x2c6   :  { %828 = vrot.lane.b32.xlu0 %v6152_v29, %s5541_s20  ;;  %832 = vrot.lane.b32.xlu1 %v6152_v29, %s5544_s23 }
 0x2cd   :  { %v778_v26 = vpop.permute.xlu0 %777  ;;  %v781_v7 = vpop.permute.xlu1 %780 }
 0x2ce   :  { %v794_v11 = vsel %vm131_vm7, %v775_v37, %v778_v26 }
 0x2cf   :  { %v6174_v13 = vsel %vm133_vm8, %v794_v11, %v781_v7  ;;  %v801_v11 = vld [vmem:[%s7001_s4 + $0x8] sm:$0xff] }
 0x2d1   :  { %v784_v18 = vpop.permute.xlu0 %783 }
 0x2d2   :  { %v6166_v27 = vsel %vm135_vm4, %v781_v7, %v784_v18 }
 0x2d3   :  { %853 = vrot.lane.b32.xlu0 %v6166_v27, %s5543_s22  ;;  %849 = vrot.lane.b32.xlu1 %v6166_v27, %s5540_s2 }
 0x2d7   :  { %847 = vrot.lane.b32.xlu0 %v6174_v13, %s5540_s2  ;;  %841 = vrot.lane.b32.xlu1 %v6155_v2, %s5542_s21 }
 0x2db   :  { %844 = vrot.lane.b32.xlu0 %v6174_v13, %s5545_s24  ;;  %1014 = vrot.lane.b32.xlu1 %v6146_v60, %s5547_s26 }
 0x2df   :  { %1024 = vrot.lane.b32.xlu0 %v6155_v2, %s5531_s12  ;;  %1022 = vrot.lane.b32.xlu1 %v6152_v29, %s5531_s12 }
 0x2e3   :  { %1016 = vrot.lane.b32.xlu0 %v6152_v29, %s5547_s26  ;;  %1020 = vrot.lane.b32.xlu1 %v6152_v29, %s5551_s30 }
 0x2e7   :  { %1012 = vrot.lane.b32.xlu0 %v6146_v60, %s5548_s27  ;;  %1028 = vrot.lane.b32.xlu1 %v6155_v2, %s5546_s25 }
 0x2eb   :  { %1038 = vrot.lane.b32.xlu0 %v6166_v27, %s5550_s29  ;;  %1042 = vrot.lane.b32.xlu1 %v6166_v27, %s5530_s11 }
 0x2ef   :  { %1030 = vrot.lane.b32.xlu0 %v6174_v13, %s5546_s25  ;;  %1036 = vrot.lane.b32.xlu1 %v6174_v13, %s5550_s29 }
 0x2f3   :  { %1034 = vrot.lane.b32.xlu0 %v6174_v13, %s5549_s28  ;;  %759 = vrot.lane.b32.xlu1 %v6120_v57, %s5531_s12 }
 0x2f7   :  { %1202 = vrot.lane.b32.xlu0 %v6146_v60, %s5544_s23  ;;  %1210 = vrot.lane.b32.xlu1 %v6174_v13, %s5543_s22 }
 0x2fb   :  { %1206 = vrot.lane.b32.xlu0 %v6155_v2, %s5545_s24  ;;  %1370 = vrot.lane.b32.xlu1 %v6146_v60, %s5545_s24 }
 0x2ff   :  { %1379 = vrot.lane.b32.xlu0 %v6155_v2, %s5543_s22  ;;  %1377 = vrot.lane.b32.xlu1 %v6152_v29, %s5543_s22 }
 0x303   :  { %1372 = vrot.lane.b32.xlu0 %v6152_v29, %s5545_s24  ;;  %1375 = vrot.lane.b32.xlu1 %v6152_v29, %s5540_s2 }
 0x307   :  { %1389 = vrot.lane.b32.xlu0 %v6166_v27, %s5539_s1  ;;  %1386 = vrot.lane.b32.xlu1 %v6166_v27, %s5544_s23 }
 0x30b   :  { %1384 = vrot.lane.b32.xlu0 %v6174_v13, %s5544_s23 }
 0x30f   :  { %1382 = vrot.lane.b32.xlu0 %v6174_v13, %s5541_s20 }
 0x313   :  { %1561 = vrot.lane.b32.xlu0 %v6155_v2, %s5530_s11 }
 0x317   :  { %1567 = vrot.lane.b32.xlu0 %v6174_v13, %s5548_s27 }
 0x31b   :  { %1553 = vrot.lane.b32.xlu0 %v6152_v29, %s5549_s28 }
 0x31f   :  { %1579 = vrot.lane.b32.xlu0 %v6166_v27, %s5531_s12 }
 0x323   :  { %1573 = vrot.lane.b32.xlu0 %v6174_v13, %s5551_s30 }
 0x327   :  { %1571 = vrot.lane.b32.xlu0 %v6174_v13, %s5547_s26 }
 0x32b   :  { %1741 = vrot.lane.b32.xlu0 %v6146_v60, %s5540_s2  ;;  %v6246_v56 = vpop.permute.xlu1 %826 }
 0x32f   :  { %1750 = vrot.lane.b32.xlu0 %v6166_v27, %s5542_s21 }
 0x334   :  { %v836_v49 = vpop.permute.xlu1 %835  ;;  %v838_v31 = vpop.permute.xlu0 %837 }
 0x335   :  { %v840_v62 = vsel %vm123_vm2, %v836_v49, %v838_v31 }
 0x338   :  { %v6251_v48 = vpop.permute.xlu1 %832  ;;  %v829_v21 = vpop.permute.xlu0 %828 }
 0x339   :  { %v831_v10 = vsel %vm127_vm6, %v6246_v56, %v829_v21  ;;  %v6257_v38 = vsel %vm129_vm3, %v6251_v48, %v840_v62 }
 0x33a   :  { %890 = vmatprep.subr.bf16.mxu1 %v6257_v38  ;;  %v856_v46 = vsel %vm129_vm3, %v6146_v60, %v831_v10 }
 0x33b   :  { %891 = vmatpush1.bf16.msra.mxu1 %v856_v46  ;;  %v5449_v46 = vld [vmem:[%s7000_s3 + $0x28] sm:$0xff]  }
 0x33e   :  { %4561 = vmatmul.mubr.msk.bf16.vlgmr.msra.gmra.mrb[0].mxu1 %vm131_vm7, %v5444_v63 }
 0x33f   :  { %932 = vmatprep.mubr.bf16.mxu1 %v7049_v42 }
 0x345   :  { %v850_v44 = vpop.permute.xlu1 %849  ;;  %v854_v30 = vpop.permute.xlu0 %853 }
 0x346   :  { %4562 = vmatmul.mubr.msk.bf16.gmra.mrb[4].mxu1 %vm131_vm7, %v5445_v20 }
 0x347   :  { %975 = vmatprep.mubr.bf16.mxu1 %v7049_v42 }
 0x349   :  { %v842_v8 = vpop.permute.xlu1 %841  ;;  %v848_v12 = vpop.permute.xlu0 %847 }
 0x34a   :  { %v852_v17 = vsel %vm125_vm5, %v848_v12, %v850_v44  ;;  %v1219_v34 = vsel %vm129_vm3, %v836_v49, %v842_v8 }
 0x34b   :  { %v6274_v6 = vsel %vm129_vm3, %v852_v17, %v854_v30 }
 0x34c   :  { %943 = vmatprep.subr.bf16.mxu1 %v6274_v6 }
 0x34d   :  { %v1015_v35 = vpop.permute.xlu1 %1014  ;;  %v845_v33 = vpop.permute.xlu0 %844 }
 0x34e   :  { %v6278_v22 = vsel %vm129_vm3, %v842_v8, %v845_v33 }
 0x34f   :  { %944 = vmatpush1.bf16.msra.mxu1 %v6278_v22 }
 0x351   :  { %v1023_v0 = vpop.permute.xlu1 %1022  ;;  %v1025_v19 = vpop.permute.xlu0 %1024 }
 0x352   :  { %4563 = vmatmul.mubr.msk.bf16.vlgmr.msra.gmra.mrb[8].mxu1 %vm131_vm7, %v5444_v63  ;;  %v1027_v45 = vsel %vm46_vm1, %v1023_v0, %v1025_v19  ;;  %v5450_v0 = vld [vmem:[%s7000_s3 + $0x30] sm:$0xff]  }
 0x353   :  { %985 = vmatprep.mubr.bf16.mxu1 %v7049_v42 }
 0x355   :  { %v1021_v3 = vpop.permute.xlu1 %1020  ;;  %v1017_v43 = vpop.permute.xlu0 %1016 }
 0x356   :  { %v6285_v1 = vsel %vm129_vm3, %v1021_v3, %v1027_v45  ;;  %v1019_v57 = vsel %vm240_vm9, %v1015_v35, %v1017_v43  ;;  %v5451_v45 = vld [vmem:[%s7000_s3 + $0x38] sm:$0xff]   ;;  %v6411_v3 = vld [vmem:[%s7000_s3 + $0x80] sm:$0xff]  }
 0x357   :  { %1080 = vmatprep.subr.bf16.mxu1 %v6285_v1 }
 0x359   :  { %v1029_v4 = vpop.permute.xlu1 %1028  ;;  %v1013_v39 = vpop.permute.xlu0 %1012 }
 0x35a   :  { %v1046_v16 = vsel %vm129_vm3, %v1013_v39, %v1019_v57  ;;  %4564 = vmatmul.mubr.msk.bf16.gmra.mrb[12].mxu1 %vm131_vm7, %v5445_v20  ;;  %v6419_v57 = vld [vmem:[%s7000_s3 + $0x88] sm:$0xff]  }
 0x35b   :  { %1081 = vmatpush1.bf16.msra.mxu1 %v1046_v16  ;;  %1112 = vmatprep.mubr.bf16.mxu1 %v7049_v42 }
 0x35d   :  { %v1043_v59 = vpop.permute.xlu1 %1042  ;;  %v1039_v32 = vpop.permute.xlu0 %1038 }
 0x361   :  { %v1037_v24 = vpop.permute.xlu1 %1036  ;;  %v1031_v15 = vpop.permute.xlu0 %1030 }
 0x362   :  { %v1041_v55 = vsel %vm266_vm12, %v1037_v24, %v1039_v32  ;;  %4567 = vmatmul.mubr.msk.bf16.vlgmr.msra.gmra.mrb[0].mxu1 %vm131_vm7, %v5446_v9  ;;  %v1033_v54 = vsel %vm256_vm11, %v1029_v4, %v1031_v15 }
 0x363   :  { %v6298_v47 = vsel %vm129_vm3, %v1041_v55, %v1043_v59  ;;  %1122 = vmatprep.mubr.bf16.mxu1 %v7049_v42 }
 0x364   :  { %1133 = vmatprep.subr.bf16.mxu1 %v6298_v47 }
 0x365   :  { %v760_v41 = vpop.permute.xlu1 %759  ;;  %v1035_v36 = vpop.permute.xlu0 %1034 }
 0x366   :  { %v762_v58 = vsel %vm44_vm0, 0, %v760_v41  ;;  %v6305_v28 = vsel %vm129_vm3, %v1033_v54, %v1035_v36 }
 0x367   :  { %v763_v14 = vsel %vm46_vm1, %v762_v58, 0  ;;  %1134 = vmatpush1.bf16.msra.mxu1 %v6305_v28 }
 0x368   :  { %v6314_v51 = vsel %vm123_vm2, %v763_v14, 0  ;;  %1248 = vmatprep.subr.bf16.mxu1 %v1219_v34 }
 0x369   :  { %1912 = vrot.lane.b32.xlu0 %v6314_v51, %s5541_s20  ;;  %1392 = vrot.lane.b32.xlu1 %v6314_v51, %s5542_s21  ;;  %v1203_v52 = vpop.permute.xlu0 %1202  ;;  %v1211_v25 = vpop.permute.xlu1 %1210 }
 0x36a   :  { %4568 = vmatmul.mubr.msk.bf16.gmra.mrb[4].mxu1 %vm131_vm7, %v5447_v50  ;;  %v1205_v23 = vsel %vm133_vm8, %v1203_v52, %v6251_v48  ;;  %v1213_v40 = vsel %vm131_vm7, %v1211_v25, %v854_v30  ;;  %v5448_v48 = vld [vmem:[%s7000_s3 + $0x20] sm:$0xff]  }
 0x36b   :  { %1165 = vmatprep.mubr.bf16.mxu1 %v7049_v42  ;;  %v1216_v7 = vsel %vm129_vm3, %v6246_v56, %v1205_v23  ;;  %v6340_v18 = vsel %vm129_vm3, %v1213_v40, %v6166_v27 }
 0x36d   :  { %2064 = vrot.lane.b32.xlu0 %v6314_v51, %s5547_s26  ;;  %1565 = vrot.lane.b32.xlu1 %v6155_v2, %s5548_s27  ;;  %v1207_v53 = vpop.permute.xlu0 %1206  ;;  %v1371_v56 = vpop.permute.xlu1 %1370 }
 0x36e   :  { %v1209_v61 = vsel %vm135_vm4, %v1207_v53, %v845_v33 }
 0x36f   :  { %v1223_v37 = vsel %vm129_vm3, %v1209_v61, %v848_v12  ;;  %v5453_v61 = vld [vmem:[%s7000_s3 + $0x48] sm:$0xff]  }
 0x370   :  { %2244 = vmatprep.subr.bf16.mxu0 %v1223_v37 }
 0x371   :  { %2062 = vrot.lane.b32.xlu0 %v6314_v51, %s5548_s27  ;;  %1551 = vrot.lane.b32.xlu1 %v6146_v60, %s5549_s28  ;;  %v1380_v26 = vpop.permute.xlu0 %1379  ;;  %v1378_v31 = vpop.permute.xlu1 %1377 }
 0x372   :  { %2245 = vmatpush1.bf16.msra.mxu0 %v1219_v34  ;;  %4569 = vmatmul.mubr.msk.bf16.vlgmr.msra.gmra.mrb[8].mxu1 %vm131_vm7, %v5446_v9  ;;  %v1381_v21 = vsel %vm131_vm7, %v1378_v31, %v1380_v26  ;;  %v800_v26 = vld [vmem:[%s7001_s4] sm:$0xff] }
 0x373   :  { %1249 = vmatpush1.bf16.msra.mxu1 %v1216_v7  ;;  %1175 = vmatprep.mubr.bf16.mxu1 %v7049_v42  ;;  %v1399_v10 = vsel %vm129_vm3, %v1381_v21, %v6155_v2 }
 0x374   :  { %1301 = vmatprep.subr.bf16.mxu1 %v6340_v18 }
 0x375   :  { %2217 = vrot.lane.b32.xlu0 %v7049_v42, %s5544_s23  ;;  %1559 = vrot.lane.b32.xlu1 %v6152_v29, %s5530_s11  ;;  %v1373_v60 = vpop.permute.xlu0 %1372  ;;  %v1376_v44 = vpop.permute.xlu1 %1375 }
 0x376   :  { %v1374_v30 = vsel %vm135_vm4, %v1371_v56, %v1373_v60  ;;  %4609 = vmatmul.mubr.msk.bf16.vlgmr.msra.gmra.mrb[0].mxu0 %vm131_vm7, %v6411_v3  ;;  %v802_v60 = vld [vmem:[%s7001_s4 + $0x10] sm:$0xff] }
 0x377   :  { %2286 = vmatprep.mubr.bf16.mxu0 %v7049_v42 }
 0x379   :  { %811 = vperm.xlu0 %5362, %v801_v11   ;;  %1557 = vrot.lane.b32.xlu1 %v6152_v29, %s5550_s29  ;;  %v6353_v49 = vpop.permute.xlu0 %1389  ;;  %v1387_v43 = vpop.permute.xlu1 %1386 }
 0x37a   :  { %4570 = vmatmul.mubr.msk.bf16.gmra.mrb[12].mxu1 %vm131_vm7, %v5447_v50  ;;  %v5452_v50 = vld [vmem:[%s7000_s3 + $0x40] sm:$0xff]  }
 0x37b   :  { %1280 = vmatprep.mubr.bf16.mxu1 %v7049_v42 }
 0x37d   :  { %1575 = vrot.lane.b32.xlu1 %v6166_v27, %s5551_s30  ;;  %v6359_v62 = vpop.permute.xlu0 %1384 }
 0x37e   :  { %v1388_v39 = vsel %vm133_vm8, %v6359_v62, %v1387_v43  ;;  %4610 = vmatmul.mubr.msk.bf16.gmra.mrb[4].mxu0 %vm131_vm7, %v6419_v57 }
 0x381   :  { %1581 = vrot.lane.b32.xlu1 %v6314_v51, %s5546_s25  ;;  %v6367_v29 = vpop.permute.xlu0 %1382 }
 0x382   :  { %4573 = vmatmul.mubr.msk.bf16.vlgmr.msra.gmra.mrb[0].mxu1 %vm131_vm7, %v5448_v48  ;;  %v1403_v59 = vsel %vm129_vm3, %v6367_v29, %v1388_v39 }
 0x383   :  { %1302 = vmatpush1.bf16.msra.mxu1 %v1223_v37  ;;  %1290 = vmatprep.mubr.bf16.mxu1 %v7049_v42 }
 0x384   :  { %1429 = vmatprep.subr.bf16.mxu1 %v1399_v10  ;;  %v5455_v10 = vld [vmem:[%s7000_s3 + $0x58] sm:$0xff]  }
 0x385   :  { %1744 = vrot.lane.b32.xlu1 %v6155_v2, %s5541_s20  ;;  %v1562_v27 = vpop.permute.xlu0 %1561 }
 0x389   :  { %1747 = vrot.lane.b32.xlu1 %v6174_v13, %s5539_s1  ;;  %v1568_v63 = vpop.permute.xlu0 %1567  ;;  %v1396_v13 = vsel %vm129_vm3, %v1374_v30, %v1376_v44  ;;  %v5458_v30 = vld [vmem:[%s7000_s3 + $0x70] sm:$0xff]  }
 0x38a   :  { %4574 = vmatmul.mubr.msk.bf16.gmra.mrb[4].mxu1 %vm131_vm7, %v5449_v46 }
 0x38b   :  { %1333 = vmatprep.mubr.bf16.mxu1 %v7049_v42 }
 0x38d   :  { %1752 = vrot.lane.b32.xlu1 %v6314_v51, %s5545_s24  ;;  %v1554_v20 = vpop.permute.xlu0 %1553 }
 0x391   :  { %1914 = vrot.lane.b32.xlu1 %v7049_v42, %s5541_s20  ;;  %v1580_v8 = vpop.permute.xlu0 %1579 }
 0x392   :  { %4575 = vmatmul.mubr.msk.bf16.vlgmr.msra.gmra.mrb[8].mxu1 %vm131_vm7, %v5448_v48  ;;  %v5454_v48 = vld [vmem:[%s7000_s3 + $0x50] sm:$0xff]  }
 0x393   :  { %1430 = vmatpush1.bf16.msra.mxu1 %v1396_v13  ;;  %1343 = vmatprep.mubr.bf16.mxu1 %v7049_v42 }
 0x395   :  { %2066 = vrot.lane.b32.xlu1 %v7049_v42, %s5547_s26  ;;  %v1574_v12 = vpop.permute.xlu0 %1573 }
 0x399   :  { %2215 = vrot.lane.b32.xlu1 %v6314_v51, %s5544_s23  ;;  %v1572_v17 = vpop.permute.xlu0 %1571 }
 0x39a   :  { %4576 = vmatmul.mubr.msk.bf16.gmra.mrb[12].mxu1 %vm131_vm7, %v5449_v46 }
 0x39b   :  { %1461 = vmatprep.mubr.bf16.mxu1 %v7049_v42 }
 0x39d   :  { %v1742_v35 = vpop.permute.xlu0 %1741  ;;  %806 = vperm.xlu1 %5363, %v800_v26  }
 0x39e   :  { %v1743_v33 = vsel %vm125_vm5, %v1742_v35, %v1376_v44 }
 0x39f   :  { %v1756_v19 = vsel %vm129_vm3, %v1743_v33, %v1378_v31 }
 0x3a1   :  { %v1751_v11 = vpop.permute.xlu0 %1750  ;;  %816 = vperm.xlu1 %5363, %v802_v60  }
 0x3a2   :  { %4579 = vmatmul.mubr.msk.bf16.vlgmr.msra.gmra.mrb[0].mxu1 %vm131_vm7, %v5450_v0 }
 0x3a3   :  { %1471 = vmatprep.mubr.bf16.mxu1 %v7049_v42 }
 0x3aa   :  { %4580 = vmatmul.mubr.msk.bf16.gmra.mrb[4].mxu1 %vm131_vm7, %v5451_v45 }
 0x3ab   :  { %1514 = vmatprep.mubr.bf16.mxu1 %v7049_v42 }
 0x3db   :  { %v1393_v4 = vpop.permute.xlu1 %1392 }
 0x3dc   :  { %v1407_v16 = vsel %vm129_vm3, %v6353_v49, %v1393_v4 }
 0x3dd   :  { %1482 = vmatprep.subr.bf16.mxu1 %v1407_v16 }
 0x3de   :  { %1483 = vmatpush1.bf16.msra.mxu1 %v1403_v59 }
 0x3df   :  { %v1566_v32 = vpop.permute.xlu1 %1565 }
 0x3e0   :  { %v1570_v15 = vsel %vm470_vm13, %v1566_v32, %v1568_v63 }
 0x3e1   :  { %4581 = vmatmul.mubr.msk.bf16.vlgmr.msra.gmra.mrb[8].mxu1 %vm131_vm7, %v5450_v0 }
 0x3e2   :  { %1524 = vmatprep.mubr.bf16.mxu1 %v7049_v42 }
 0x3e3   :  { %v1552_v9 = vpop.permute.xlu1 %1551 }
 0x3e4   :  { %v1556_v41 = vsel %vm454_vm10, %v1552_v9, %v1554_v20 }
 0x3e7   :  { %v1560_v24 = vpop.permute.xlu1 %1559 }
 0x3e8   :  { %v1564_v55 = vsel %vm44_vm0, %v1560_v24, %v1562_v27  ;;  %vm4553_vm0 = vcmask 57344  }
 0x3e9   :  { %4582 = vmatmul.mubr.msk.bf16.gmra.mrb[12].mxu1 %vm131_vm7, %v5451_v45  ;;  %v1589_v54 = vsel %vm129_vm3, %v1564_v55, %v1570_v15 }
 0x3ea   :  { %1619 = vmatprep.subr.bf16.mxu1 %v1589_v54  ;;  %1651 = vmatprep.mubr.bf16.mxu1 %v7049_v42 }
 0x3eb   :  { %v1558_v36 = vpop.permute.xlu1 %1557 }
 0x3ec   :  { %v1585_v58 = vsel %vm129_vm3, %v1556_v41, %v1558_v36 }
 0x3ed   :  { %1620 = vmatpush1.bf16.msra.mxu1 %v1585_v58 }
 0x3ef   :  { %v1576_v14 = vpop.permute.xlu1 %1575 }
 0x3f0   :  { %v1578_v34 = vsel %vm480_vm14, %v1574_v12, %v1576_v14  ;;  %v5460_v12 = vld [vmem:[%s7000_s3 + $0x78] sm:$0xff]  }
 0x3f1   :  { %4585 = vmatmul.mubr.msk.bf16.vlgmr.msra.gmra.mrb[0].mxu1 %vm131_vm7, %v5452_v50  ;;  %v1593_v53 = vsel %vm129_vm3, %v1572_v17, %v1578_v34 }
 0x3f2   :  { %1661 = vmatprep.mubr.bf16.mxu1 %v7049_v42 }
 0x3f3   :  { %v1582_v52 = vpop.permute.xlu1 %1581 }
 0x3f4   :  { %v1597_v25 = vsel %vm129_vm3, %v1580_v8, %v1582_v52 }
 0x3f5   :  { %1672 = vmatprep.subr.bf16.mxu1 %v1597_v25 }
 0x3f6   :  { %1673 = vmatpush1.bf16.msra.mxu1 %v1593_v53 }
 0x3f7   :  { %v1745_v23 = vpop.permute.xlu1 %1744 }
 0x3f8   :  { %v1746_v37 = vsel %vm127_vm6, %v1745_v23, %v6367_v29 }
 0x3f9   :  { %4586 = vmatmul.mubr.msk.bf16.gmra.mrb[4].mxu1 %vm131_vm7, %v5453_v61  ;;  %v1759_v40 = vsel %vm129_vm3, %v6155_v2, %v1746_v37  ;;  %v803_v2 = vld [vmem:[%s7001_s4 + $0x18] sm:$0xff] }
 0x3fa   :  { %1789 = vmatprep.subr.bf16.mxu1 %v1759_v40  ;;  %1704 = vmatprep.mubr.bf16.mxu1 %v7049_v42 }
 0x3fb   :  { %v1748_v7 = vpop.permute.xlu1 %1747  ;;  %821 = vperm.xlu1 %5363, %v803_v2  }
 0x3fc   :  { %v1749_v21 = vsel %vm123_vm2, %v1748_v7, %v6353_v49  ;;  %v1913_v49 = vpop.permute.xlu0 %1912 }
 0x3fd   :  { %v1763_v29 = vsel %vm129_vm3, %v6359_v62, %v1749_v21 }
 0x3ff   :  { %v1753_v56 = vpop.permute.xlu1 %1752 }
 0x400   :  { %v1767_v31 = vsel %vm129_vm3, %v1751_v11, %v1753_v56 }
 0x401   :  { %4587 = vmatmul.mubr.msk.bf16.vlgmr.msra.gmra.mrb[8].mxu1 %vm131_vm7, %v5452_v50 }
 0x402   :  { %1790 = vmatpush1.bf16.msra.mxu1 %v1756_v19  ;;  %1714 = vmatprep.mubr.bf16.mxu1 %v7049_v42 }
 0x403   :  { %1842 = vmatprep.subr.bf16.mxu1 %v1767_v31  ;;  %v1915_v27 = vpop.permute.xlu1 %1914 }
 0x404   :  { %v1916_v46 = vsel %vm127_vm6, %v1913_v49, %v1915_v27 }
 0x405   :  { %v1918_v62 = vsel %vm129_vm3, %v6314_v51, %v1916_v46  ;;  %v2065_v51 = vpop.permute.xlu0 %2064 }
 0x407   :  { %v2067_v63 = vpop.permute.xlu1 %2066 }
 0x408   :  { %v2068_v20 = vsel %vm240_vm9, %v2065_v51, %v2067_v63 }
 0x409   :  { %4588 = vmatmul.mubr.msk.bf16.gmra.mrb[12].mxu1 %vm131_vm7, %v5453_v61  ;;  %v2063_v44 = vpop.permute.xlu0 %2062 }
 0x40a   :  { %1821 = vmatprep.mubr.bf16.mxu1 %v7049_v42 }
 0x40d   :  { %v2218_v8 = vpop.permute.xlu0 %2217 }
 0x411   :  { %4591 = vmatmul.mubr.msk.bf16.vlgmr.msra.gmra.mrb[0].mxu1 %vm131_vm7, %v5454_v48 }
 0x412   :  { %1843 = vmatpush1.bf16.msra.mxu1 %v1763_v29  ;;  %1831 = vmatprep.mubr.bf16.mxu1 %v7049_v42 }
 0x413   :  { %1940 = vmatprep.subr.bf16.mxu1 %v6278_v22  ;;  %v5456_v22 = vld [vmem:[%s7000_s3 + $0x60] sm:$0xff]  }
 0x419   :  { %4592 = vmatmul.mubr.msk.bf16.gmra.mrb[4].mxu1 %vm131_vm7, %v5455_v10 }
 0x41a   :  { %1874 = vmatprep.mubr.bf16.mxu1 %v7049_v42 }
 0x421   :  { %4593 = vmatmul.mubr.msk.bf16.vlgmr.msra.gmra.mrb[8].mxu1 %vm131_vm7, %v5454_v48 }
 0x422   :  { %1941 = vmatpush1.bf16.msra.mxu1 %v6257_v38  ;;  %1884 = vmatprep.mubr.bf16.mxu1 %v7049_v42  ;;  %v5457_v38 = vld [vmem:[%s7000_s3 + $0x68] sm:$0xff]  }
 0x423   :  { %1993 = vmatprep.subr.bf16.mxu1 %v1918_v62 }
 0x429   :  { %4594 = vmatmul.mubr.msk.bf16.gmra.mrb[12].mxu1 %vm131_vm7, %v5455_v10 }
 0x42a   :  { %1972 = vmatprep.mubr.bf16.mxu1 %v7049_v42 }
 0x431   :  { %4597 = vmatmul.mubr.msk.bf16.vlgmr.msra.gmra.mrb[0].mxu1 %vm131_vm7, %v5456_v22 }
 0x432   :  { %1994 = vmatpush1.bf16.msra.mxu1 %v6274_v6  ;;  %1982 = vmatprep.mubr.bf16.mxu1 %v7049_v42  ;;  %v2071_v6 = vsel %vm129_vm3, %v2063_v44, %v2068_v20 }
 0x433   :  { %2093 = vmatprep.subr.bf16.mxu1 %v6305_v28  ;;  %v2216_v28 = vpop.permute.xlu1 %2215 }
 0x434   :  { %v2219_v13 = vsel %vm133_vm8, %v2216_v28, %v2218_v8 }
 0x437   :  { %v6535_v4 = vpop.permute.xlu1 %806 }
 0x439   :  { %4598 = vmatmul.mubr.msk.bf16.gmra.mrb[4].mxu1 %vm131_vm7, %v5457_v38 }
 0x43a   :  { %2025 = vmatprep.mubr.bf16.mxu1 %v7049_v42 }
 0x43b   :  { %v6542_v15 = vpop.permute.xlu1 %816 }
 0x441   :  { %4599 = vmatmul.mubr.msk.bf16.vlgmr.msra.gmra.mrb[8].mxu1 %vm131_vm7, %v5456_v22 }
 0x442   :  { %2094 = vmatpush1.bf16.msra.mxu1 %v6285_v1  ;;  %2035 = vmatprep.mubr.bf16.mxu1 %v7049_v42  ;;  %v2222_v1 = vsel %vm129_vm3, %v1913_v49, %v2219_v13 }
 0x443   :  { %2146 = vmatprep.subr.bf16.mxu1 %v2071_v6 }
 0x449   :  { %4600 = vmatmul.mubr.msk.bf16.gmra.mrb[12].mxu1 %vm131_vm7, %v5457_v38  ;;  %v2278_v17 = vpop.f32.mrb[0].mxu0 }
 0x44a   :  { %2125 = vmatprep.mubr.bf16.mxu1 %v7049_v42  ;;  %v2280_v35 = vpop.f32.mrb[1].mxu0 }
 0x44b   :  { %v2282_v33 = vpop.f32.mrb[2].mxu0 }
 0x451   :  { %4603 = vmatmul.mubr.msk.bf16.vlgmr.msra.gmra.mrb[0].mxu1 %vm131_vm7, %v5458_v30 }
 0x452   :  { %2147 = vmatpush1.bf16.msra.mxu1 %v6298_v47  ;;  %2135 = vmatprep.mubr.bf16.mxu1 %v7049_v42  ;;  %v7050_v47 = vmov 0.0  }
 0x453   :  { %2297 = vmatprep.subr.bf16.mxu1 %v2222_v1 }
 0x459   :  { %4604 = vmatmul.mubr.msk.bf16.gmra.mrb[4].mxu1 %vm131_vm7, %v5460_v12 }
 0x45a   :  { %2178 = vmatprep.mubr.bf16.mxu1 %v7049_v42 }
 0x461   :  { %4605 = vmatmul.mubr.msk.bf16.vlgmr.msra.gmra.mrb[8].mxu1 %vm131_vm7, %v5458_v30 }
 0x462   :  { %2298 = vmatpush1.bf16.msra.mxu1 %v6340_v18  ;;  %2188 = vmatprep.mubr.bf16.mxu1 %v7049_v42  ;;  %v2284_v18 = vpop.f32.mrb[3].mxu0 }
 0x463   :  { %5035 = vmatprep.subr.bf16.mxu1 %v7050_v47  ;;  %v2288_v0 = vpop.f32.mrb[4].mxu0 }
 0x464   :  { %v2290_v19 = vpop.f32.mrb[5].mxu0 }
 0x465   :  { %v2292_v45 = vpop.f32.mrb[6].mxu0 }
 0x466   :  { %v2294_v43 = vpop.f32.mrb[7].mxu0 }
 0x469   :  { %4606 = vmatmul.mubr.msk.bf16.gmra.mrb[12].mxu1 %vm131_vm7, %v5460_v12 }
 0x46a   :  { %2329 = vmatprep.mubr.bf16.mxu1 %v7049_v42 }
 0x471   :  { %4611 = vmatmul.mubr.msk.bf16.vlgmr.msra.gmra.mrb[8].mxu1 %vm131_vm7, %v6411_v3  ;;  %v6538_v3 = vpop.permute.xlu0 %811 }
 0x472   :  { %2339 = vmatprep.mubr.bf16.mxu1 %v7049_v42 }
 0x479   :  { %4612 = vmatmul.mubr.msk.bf16.gmra.mrb[12].mxu1 %vm131_vm7, %v6419_v57 }
 0x47a   :  { %v6550_v53 = vpop.permute.xlu1 %821  ;;  %5043 = vmatprep.mubr.msk.bf16.mxu1 %vm5553_vm15, %v7050_v47 }
 0x524   :  { %v2127_v39 = vpop.f32.mrb[0].mxu1 }
 0x525   :  { %v5047_v16 = vadd.f32 %v2127_v39, %v6535_v4  ;;  %v2129_v59 = vpop.f32.mrb[1].mxu1 }
 0x526   :  { %v5049_v42 = vadd.f32 %v2129_v59, %v6535_v4  ;;  %v2131_v32 = vpop.f32.mrb[2].mxu1 }
 0x527   :  { %v5051_v57 = vadd.f32 %v2131_v32, %v6538_v3  ;;  %v5048_v9 = vadd.f32 %v5047_v16, %v2278_v17  ;;  %v2133_v24 = vpop.f32.mrb[3].mxu1 }
 0x528   :  { %v5053_v55 = vadd.f32 %v2133_v24, %v6538_v3  ;;  %v6545_v54 = vadd.f32 %v5049_v42, %v2280_v35 }
 0x529   :  { %v5052_v41 = vadd.f32 %v5051_v57, %v2282_v33  ;;  %v2366_v58 = vmax.f32 %v5048_v9, 0.0 }
 0x52a   :  { %v6547_v36 = vadd.f32 %v5053_v55, %v2284_v18  ;;  %v2367_v30 = vmax.f32 %v6545_v54, 0.0 }
 0x52b   :  { %v2370_v50 = vmax.f32 %v5052_v41, 0.0 }
 0x52c   :  { %v2137_v14 = vpop.f32.mrb[4].mxu1  ;;  %v2371_v6 = vmax.f32 %v6547_v36, 0.0 }
 0x52d   :  { %v5364_v34 = vpack.i.bf16 %v2370_v50, %v2366_v58  ;;  %v5055_v52 = vadd.f32 %v2137_v14, %v6542_v15  ;;  %v2139_v25 = vpop.f32.mrb[5].mxu1 }
 0x52e   :  { %v5057_v61 = vadd.f32 %v2139_v25, %v6542_v15  ;;  %v2141_v23 = vpop.f32.mrb[6].mxu1  ;;  %v5379_v13 = vpack.i.bf16 %v2371_v6, %v2367_v30 }
 0x52f   :  { %v5059_v37 = vadd.f32 %v2141_v23, %v6550_v53  ;;  %v5056_v40 = vadd.f32 %v5055_v52, %v2288_v0  ;;  %v2143_v26 = vpop.f32.mrb[7].mxu1  ;;  %5365 = vrot.lane.b32.xlu0 %v5364_v34, %s5548_s27 }
 0x530   :  { %v5061_v7 = vadd.f32 %v2143_v26, %v6550_v53  ;;  %v6556_v60 = vadd.f32 %v5057_v61, %v2290_v19 }
 0x531   :  { %v5060_v11 = vadd.f32 %v5059_v37, %v2292_v45  ;;  %v2374_v31 = vmax.f32 %v5056_v40, 0.0  ;;  %v5462_v45 = vld [vmem:[%s7002_s5] sm:$0xff]  }
 0x532   :  { %v6558_v56 = vadd.f32 %v5061_v7, %v2294_v43  ;;  %v2375_v0 = vmax.f32 %v6556_v60, 0.0  ;;  %4847 = vmatprep.mubr.msk.bf16.mxu0 %vm125_vm5, %v5462_v45 }
 0x533   :  { %v2378_v2 = vmax.f32 %v5060_v11, 0.0 }
 0x534   :  { %v2379_v33 = vmax.f32 %v6558_v56, 0.0 }
 0x535   :  { %v5369_v48 = vpack.i.bf16 %v2378_v2, %v2374_v31 }
 0x536   :  { %v5389_v19 = vpack.i.bf16 %v2379_v33, %v2375_v0 }
 0x537   :  { %5370 = vrot.lane.b32.xlu1 %v5369_v48, %s5548_s27 }
 0x544   :  { %v2331_v21 = vpop.f32.mrb[8].mxu1 }
 0x545   :  { %v6561_v29 = vpop.f32.mrb[9].mxu1  ;;  %v6586_v34 = vadd.f32 %v2331_v21, %v6535_v4 }
 0x546   :  { %v2335_v10 = vpop.f32.mrb[10].mxu1 }
 0x547   :  { %v6563_v27 = vpop.f32.mrb[11].mxu1  ;;  %v6583_v41 = vadd.f32 %v2335_v10, %v6538_v3  ;;  %v2368_v60 = vmax.f32 %v6586_v34, 0.0 }
 0x549   :  { %v2372_v61 = vmax.f32 %v6583_v41, 0.0  ;;  %v5470_v41 = vld [vmem:[%s7002_s5 + $0x40] sm:$0xff]  }
 0x54b   :  { %v5404_v48 = vpack.i.bf16 %v2372_v61, %v2368_v60 }
 0x54c   :  { %v2341_v49 = vpop.f32.mrb[12].mxu1 }
 0x54d   :  { %v6565_v46 = vpop.f32.mrb[13].mxu1  ;;  %v6595_v11 = vadd.f32 %v2341_v49, %v6542_v15 }
 0x54e   :  { %v2345_v62 = vpop.f32.mrb[14].mxu1 }
 0x54f   :  { %v6567_v22 = vpop.f32.mrb[15].mxu1  ;;  %v6591_v37 = vadd.f32 %v2345_v62, %v6550_v53  ;;  %v5464_v62 = vld [vmem:[%s7002_s5 + $0x10] sm:$0xff]   ;;  %v2376_v49 = vmax.f32 %v6595_v11, 0.0  ;;  %v5477_v11 = vld [vmem:[%s7002_s5 + $0x78] sm:$0xff]  }
 0x551   :  { %v2380_v21 = vmax.f32 %v6591_v37, 0.0 }
 0x5a1   :  { %v5366_v38 = vpop.permute.xlu0 %5365 }
 0x5a2   :  { %v5368_v51 = vunpack.i.h.bf16 %v5366_v38  ;;  %v5367_v63 = vunpack.i.l.bf16 %v5366_v38  ;;  %v5409_v38 = vpack.i.bf16 %v2380_v21, %v2376_v49 }
 0x5a4   :  { %v2447_v20 = vmax.f32 %v2370_v50, %v5368_v51  ;;  %v2446_v44 = vmax.f32 %v2366_v58, %v5367_v63  ;;  %v5465_v51 = vld [vmem:[%s7002_s5 + $0x18] sm:$0xff]   ;;  %v5466_v63 = vld [vmem:[%s7002_s5 + $0x20] sm:$0xff]  }
 0x5a6   :  { %v5374_v28 = vpack.i.bf16 %v2447_v20, %v2446_v44 }
 0x5a8   :  { %5375 = vrot.lane.b32.xlu0 %v5374_v28, %s5542_s21 }
 0x5a9   :  { %v5371_v8 = vpop.permute.xlu1 %5370 }
 0x5aa   :  { %v5373_v1 = vunpack.i.h.bf16 %v5371_v8  ;;  %v5372_v12 = vunpack.i.l.bf16 %v5371_v8 }
 0x5ac   :  { %v2449_v17 = vmax.f32 %v2378_v2, %v5373_v1  ;;  %v2448_v35 = vmax.f32 %v2374_v31, %v5372_v12  ;;  %5380 = vrot.lane.b32.xlu0 %v5379_v13, %s5548_s27  ;;  %v5463_v2 = vld [vmem:[%s7002_s5 + $0x8] sm:$0xff]  }
 0x5ad   :  { %v5467_v12 = vld [vmem:[%s7002_s5 + $0x28] sm:$0xff]  }
 0x5ae   :  { %v5384_v18 = vpack.i.bf16 %v2449_v17, %v2448_v35 }
 0x5b0   :  { %5385 = vrot.lane.b32.xlu1 %v5384_v18, %s5542_s21 }
 0x5b4   :  { %5390 = vrot.lane.b32.xlu1 %v5389_v19, %s5548_s27 }
 0x61a   :  { %v5376_v43 = vpop.permute.xlu0 %5375 }
 0x61b   :  { %v5378_v39 = vunpack.i.h.bf16 %v5376_v43  ;;  %v5377_v16 = vunpack.i.l.bf16 %v5376_v43 }
 0x61d   :  { %v2467_v59 = vmax.f32 %v2447_v20, %v5378_v39  ;;  %v2466_v42 = vmax.f32 %v2446_v44, %v5377_v16  ;;  %v6640_v39 = vadd.f32 %v6561_v29, %v6535_v4 }
 0x61e   :  { %v5381_v32 = vpop.permute.xlu0 %5380 }
 0x61f   :  { %v2478_v57 = vpack.c.bf16 %v2467_v59, %v2466_v42  ;;  %v5383_v9 = vunpack.i.h.bf16 %v5381_v32  ;;  %v5382_v24 = vunpack.i.l.bf16 %v5381_v32  ;;  %v6650_v32 = vadd.f32 %v6567_v22, %v6550_v53 }
 0x620   :  { %v2369_v53 = vmax.f32 %v6640_v39, 0.0  ;;  %v6663_v22 = vadd.f32 %v6565_v46, %v6542_v15 }
 0x621   :  { %v2961_v55 = vmax.f32 %v2371_v6, %v5383_v9  ;;  %v2960_v54 = vmax.f32 %v2367_v30, %v5382_v24  ;;  %2615 = vrot.lane.b32.xlu0 %v2478_v57, %s5541_s20  ;;  %4843 = vmatprep.subr.bf16.mxu0 %v2478_v57  ;;  %v2381_v34 = vmax.f32 %v6650_v32, 0.0 }
 0x622   :  { %v5386_v36 = vpop.permute.xlu1 %5385  ;;  %4844 = vmatpush3.bf16.msra.mxu0 %v2478_v57  ;;  %v2377_v46 = vmax.f32 %v6663_v22, 0.0  ;;  %v14_v22 = vstv %s7003_s8 }
 0x623   :  { %v5394_v58 = vpack.i.bf16 %v2961_v55, %v2960_v54  ;;  %v5388_v50 = vunpack.i.h.bf16 %v5386_v36  ;;  %v5387_v14 = vunpack.i.l.bf16 %v5386_v36  ;;  %15 = vst [vmem:[#allocation2] sm:$0x1] %v14_v22 }
 0x625   :  { %v2469_v52 = vmax.f32 %v2449_v17, %v5388_v50  ;;  %v2468_v25 = vmax.f32 %v2448_v35, %v5387_v14  ;;  %5395 = vrot.lane.b32.xlu1 %v5394_v58, %s5542_s21  ;;  %v5468_v17 = vld [vmem:[%s7002_s5 + $0x30] sm:$0xff]   ;;  %v6635_v35 = vadd.f32 %v6563_v27, %v6538_v3 }
 0x626   :  { %v5391_v23 = vpop.permute.xlu1 %5390 }
 0x627   :  { %v2479_v40 = vpack.c.bf16 %v2469_v52, %v2468_v25  ;;  %v5393_v26 = vunpack.i.h.bf16 %v5391_v23  ;;  %v5392_v7 = vunpack.i.l.bf16 %v5391_v23  ;;  %v2373_v27 = vmax.f32 %v6635_v35, 0.0  ;;  %v5472_v23 = vld [vmem:[%s7002_s5 + $0x50] sm:$0xff]   ;;  %v5485_v35 = vld [vmem:[%s7002_s5 + $0xb8] sm:$0xff]  }
 0x628   :  { %v5429_v25 = vpack.i.bf16 %v2381_v34, %v2377_v46 }
 0x629   :  { %v2963_v56 = vmax.f32 %v2379_v33, %v5393_v26  ;;  %v2962_v31 = vmax.f32 %v2375_v0, %v5392_v7  ;;  %2617 = vrot.lane.b32.xlu0 %v2479_v40, %s5541_s20  ;;  %4845 = vmatprep.subr.bf16.mxu0 %v2479_v40  ;;  %v5424_v14 = vpack.i.bf16 %v2373_v27, %v2369_v53  ;;  %v5474_v26 = vld [vmem:[%s7002_s5 + $0x60] sm:$0xff]   ;;  %v5475_v7 = vld [vmem:[%s7002_s5 + $0x68] sm:$0xff]  }
 0x62a   :  { %4846 = vmatpush3.bf16.msra.mxu0 %v2479_v40 }
 0x62b   :  { %v5399_v10 = vpack.i.bf16 %v2963_v56, %v2962_v31 }
 0x62d   :  { %5400 = vrot.lane.b32.xlu1 %v5399_v10, %s5542_s21  ;;  %5405 = vrot.lane.b32.xlu0 %v5404_v48, %s5548_s27  ;;  %v5481_v48 = vld [vmem:[%s7002_s5 + $0x98] sm:$0xff]  }
 0x62e   :  { %4848 = vmatmul.mubr.msk.bf16.vlgmr.msra.gmra.mrb[8].mxu0 %vm125_vm5, %v5463_v2  ;;  %v5480_v2 = vld [vmem:[%s7002_s5 + $0x90] sm:$0xff]  }
 0x62f   :  { %4851 = vmatprep.mubr.msk.bf16.mxu0 %vm125_vm5, %v5464_v62 }
 0x631   :  { %5410 = vrot.lane.b32.xlu1 %v5409_v38, %s5548_s27  ;;  %2734 = vrot.lane.b32.xlu0 %v2478_v57, %s5544_s23 }
 0x635   :  { %2736 = vrot.lane.b32.xlu1 %v2479_v40, %s5544_s23  ;;  %2853 = vrot.lane.b32.xlu0 %v2478_v57, %s5539_s1 }
 0x636   :  { %4852 = vmatmul.mubr.msk.bf16.gmra.mrb[12].mxu0 %vm125_vm5, %v5465_v51 }
 0x637   :  { %4859 = vmatprep.mubr.msk.bf16.mxu0 %vm125_vm5, %v5466_v63  ;;  %v5483_v63 = vld [vmem:[%s7002_s5 + $0xa8] sm:$0xff]  }
 0x639   :  { %2855 = vrot.lane.b32.xlu1 %v2479_v40, %s5539_s1  ;;  %v5473_v40 = vld [vmem:[%s7002_s5 + $0x58] sm:$0xff]  }
 0x693   :  { %v2616_v20 = vpop.permute.xlu0 %2615 }
 0x694   :  { %4855 = vmatprep.subr.bf16.mxu0 %v2616_v20 }
 0x695   :  { %4856 = vmatpush3.bf16.msra.mxu0 %v2616_v20  ;;  %v5484_v20 = vld [vmem:[%s7002_s5 + $0xb0] sm:$0xff]  }
 0x697   :  { %v5396_v44 = vpop.permute.xlu1 %5395 }
 0x698   :  { %v5398_v6 = vunpack.i.h.bf16 %v5396_v44  ;;  %v5397_v28 = vunpack.i.l.bf16 %v5396_v44 }
 0x69a   :  { %v2981_v30 = vmax.f32 %v2961_v55, %v5398_v6  ;;  %v2980_v8 = vmax.f32 %v2960_v54, %v5397_v28  ;;  %v5469_v54 = vld [vmem:[%s7002_s5 + $0x38] sm:$0xff]  }
 0x69b   :  { %v2618_v13 = vpop.permute.xlu0 %2617 }
 0x69c   :  { %v6623_v1 = vpack.c.bf16 %v2981_v30, %v2980_v8  ;;  %4857 = vmatprep.subr.bf16.mxu0 %v2618_v13 }
 0x69d   :  { %4858 = vmatpush3.bf16.msra.mxu0 %v2618_v13 }
 0x69e   :  { %3129 = vrot.lane.b32.xlu0 %v6623_v1, %s5541_s20 }
 0x69f   :  { %v5401_v33 = vpop.permute.xlu1 %5400  ;;  %v5406_v18 = vpop.permute.xlu0 %5405 }
 0x6a0   :  { %v5403_v0 = vunpack.i.h.bf16 %v5401_v33  ;;  %v5402_v19 = vunpack.i.l.bf16 %v5401_v33  ;;  %v5408_v45 = vunpack.i.h.bf16 %v5406_v18  ;;  %v5407_v43 = vunpack.i.l.bf16 %v5406_v18  ;;  %4860 = vmatmul.mubr.msk.bf16.vlgmr.msra.gmra.mrb[8].mxu0 %vm125_vm5, %v5467_v12 }
 0x6a1   :  { %4863 = vmatprep.mubr.msk.bf16.mxu0 %vm125_vm5, %v5468_v17 }
 0x6a2   :  { %v2983_v16 = vmax.f32 %v2963_v56, %v5403_v0  ;;  %v2982_v59 = vmax.f32 %v2962_v31, %v5402_v19  ;;  %v6643_v42 = vmax.f32 %v2372_v61, %v5408_v45  ;;  %v6645_v3 = vmax.f32 %v2368_v60, %v5407_v43  ;;  %v5471_v61 = vld [vmem:[%s7002_s5 + $0x48] sm:$0xff]   ;;  %v5476_v60 = vld [vmem:[%s7002_s5 + $0x70] sm:$0xff]   ;;  %v5478_v56 = vld [vmem:[%s7002_s5 + $0x80] sm:$0xff]  }
 0x6a3   :  { %v5411_v57 = vpop.permute.xlu1 %5410  ;;  %v2735_v9 = vpop.permute.xlu0 %2734  ;;  %v5479_v31 = vld [vmem:[%s7002_s5 + $0x88] sm:$0xff]  }
 0x6a4   :  { %v2993_v24 = vpack.c.bf16 %v2983_v16, %v2982_v59  ;;  %v5414_v4 = vpack.i.bf16 %v6643_v42, %v6645_v3  ;;  %v5413_v29 = vunpack.i.h.bf16 %v5411_v57  ;;  %v5412_v55 = vunpack.i.l.bf16 %v5411_v57  ;;  %4867 = vmatprep.subr.bf16.mxu0 %v2735_v9 }
 0x6a5   :  { %4868 = vmatpush3.bf16.msra.mxu0 %v2735_v9 }
 0x6a6   :  { %v6665_v36 = vmax.f32 %v2380_v21, %v5413_v29  ;;  %v6667_v58 = vmax.f32 %v2376_v49, %v5412_v55  ;;  %3131 = vrot.lane.b32.xlu0 %v2993_v24, %s5541_s20  ;;  %5415 = vrot.lane.b32.xlu1 %v5414_v4, %s5542_s21  ;;  %v5482_v21 = vld [vmem:[%s7002_s5 + $0xa0] sm:$0xff]   ;;  %v5487_v4 = vld [vmem:[%s7002_s5 + $0xc8] sm:$0xff]  }
 0x6a7   :  { %v2737_v50 = vpop.permute.xlu1 %2736  ;;  %v2854_v52 = vpop.permute.xlu0 %2853  ;;  %v5488_v29 = vld [vmem:[%s7002_s5 + $0xd0] sm:$0xff]  }
 0x6a8   :  { %v5419_v15 = vpack.i.bf16 %v6665_v36, %v6667_v58  ;;  %4864 = vmatmul.mubr.msk.bf16.gmra.mrb[12].mxu0 %vm125_vm5, %v5469_v54  ;;  %4869 = vmatprep.subr.bf16.mxu0 %v2737_v50  ;;  %v5489_v54 = vld [vmem:[%s7002_s5 + $0xd8] sm:$0xff]  }
 0x6a9   :  { %4870 = vmatpush3.bf16.msra.mxu0 %v2737_v50  ;;  %4871 = vmatprep.mubr.msk.bf16.mxu0 %vm125_vm5, %v5470_v41  ;;  %v5490_v41 = vld [vmem:[%s7002_s5 + $0xe0] sm:$0xff]  }
 0x6aa   :  { %5425 = vrot.lane.b32.xlu0 %v5424_v14, %s5548_s27  ;;  %5420 = vrot.lane.b32.xlu1 %v5419_v15, %s5542_s21  ;;  %v5494_v50 = vld [vmem:[%s7002_s5 + $0x100] sm:$0xff]   ;;  %v5495_v14 = vld [vmem:[%s7002_s5 + $0x108] sm:$0xff]  }
 0x6ab   :  { %4879 = vmatprep.subr.bf16.mxu0 %v2854_v52  ;;  %v2856_v37 = vpop.permute.xlu1 %2855  ;;  %v5497_v15 = vld [vmem:[%s7002_s5 + $0x118] sm:$0xff]  }
 0x6ae   :  { %3248 = vrot.lane.b32.xlu0 %v6623_v1, %s5544_s23  ;;  %5430 = vrot.lane.b32.xlu1 %v5429_v25, %s5548_s27 }
 0x6b0   :  { %4872 = vmatmul.mubr.msk.bf16.vlgmr.msra.gmra.mrb[8].mxu0 %vm125_vm5, %v5471_v61 }
 0x6b1   :  { %4880 = vmatpush3.bf16.msra.mxu0 %v2854_v52  ;;  %4875 = vmatprep.mubr.msk.bf16.mxu0 %vm125_vm5, %v5472_v23 }
 0x6b2   :  { %4881 = vmatprep.subr.bf16.mxu0 %v2856_v37  ;;  %3367 = vrot.lane.b32.xlu0 %v6623_v1, %s5539_s1 }
 0x6b3   :  { %3250 = vrot.lane.b32.xlu1 %v2993_v24, %s5544_s23 }
 0x6b5   :  { %4882 = vmatpush3.bf16.msra.mxu0 %v2856_v37 }
 0x6b6   :  { %4891 = vmatprep.subr.bf16.mxu0 %v6623_v1 }
 0x6b7   :  { %3369 = vrot.lane.b32.xlu1 %v2993_v24, %s5539_s1 }
 0x6b8   :  { %4876 = vmatmul.mubr.msk.bf16.gmra.mrb[12].mxu0 %vm125_vm5, %v5473_v40  ;;  %v5499_v40 = vld [vmem:[%s7002_s5 + $0x128] sm:$0xff]  }
 0x6b9   :  { %4883 = vmatprep.mubr.msk.bf16.mxu0 %vm125_vm5, %v5474_v26 }
 0x6c0   :  { %4884 = vmatmul.mubr.msk.bf16.vlgmr.msra.gmra.mrb[8].mxu0 %vm125_vm5, %v5475_v7 }
 0x6c1   :  { %4892 = vmatpush3.bf16.msra.mxu0 %v6623_v1  ;;  %4887 = vmatprep.mubr.msk.bf16.mxu0 %vm125_vm5, %v5476_v60 }
 0x6c2   :  { %4893 = vmatprep.subr.bf16.mxu0 %v2993_v24 }
 0x6c5   :  { %4894 = vmatpush3.bf16.msra.mxu0 %v2993_v24 }
 0x6c8   :  { %4888 = vmatmul.mubr.msk.bf16.gmra.mrb[12].mxu0 %vm125_vm5, %v5477_v11  ;;  %v5500_v11 = vld [vmem:[%s7002_s5 + $0x130] sm:$0xff]  }
 0x6c9   :  { %4895 = vmatprep.mubr.msk.bf16.mxu0 %vm125_vm5, %v5478_v56 }
 0x6d0   :  { %4896 = vmatmul.mubr.msk.bf16.vlgmr.msra.gmra.mrb[8].mxu0 %vm125_vm5, %v5479_v31 }
 0x6d1   :  { %4899 = vmatprep.mubr.msk.bf16.mxu0 %vm125_vm5, %v5480_v2 }
 0x6d8   :  { %4900 = vmatmul.mubr.msk.bf16.gmra.mrb[12].mxu0 %vm125_vm5, %v5481_v48 }
 0x6d9   :  { %4907 = vmatprep.mubr.msk.bf16.mxu0 %vm125_vm5, %v5482_v21 }
 0x710   :  { %v3130_v10 = vpop.permute.xlu0 %3129 }
 0x711   :  { %4903 = vmatprep.subr.bf16.mxu0 %v3130_v10 }
 0x712   :  { %4904 = vmatpush3.bf16.msra.mxu0 %v3130_v10 }
 0x718   :  { %v3132_v62 = vpop.permute.xlu0 %3131  ;;  %v5416_v49 = vpop.permute.xlu1 %5415 }
 0x719   :  { %v5418_v38 = vunpack.i.h.bf16 %v5416_v49  ;;  %v5417_v51 = vunpack.i.l.bf16 %v5416_v49  ;;  %4905 = vmatprep.subr.bf16.mxu0 %v3132_v62 }
 0x71a   :  { %4906 = vmatpush3.bf16.msra.mxu0 %v3132_v62 }
 0x71b   :  { %v3495_v44 = vmax.f32 %v6643_v42, %v5418_v38  ;;  %v3494_v6 = vmax.f32 %v6645_v3, %v5417_v51  ;;  %v5486_v3 = vld [vmem:[%s7002_s5 + $0xc0] sm:$0xff]   ;;  %v5501_v38 = vld [vmem:[%s7002_s5 + $0x138] sm:$0xff]  }
 0x71c   :  { %v5426_v28 = vpop.permute.xlu0 %5425  ;;  %v5421_v30 = vpop.permute.xlu1 %5420 }
 0x71d   :  { %v3506_v8 = vpack.c.bf16 %v3495_v44, %v3494_v6  ;;  %v5428_v13 = vunpack.i.h.bf16 %v5426_v28  ;;  %v5427_v1 = vunpack.i.l.bf16 %v5426_v28  ;;  %v5423_v12 = vunpack.i.h.bf16 %v5421_v30  ;;  %4908 = vmatmul.mubr.msk.bf16.vlgmr.msra.gmra.mrb[8].mxu0 %vm125_vm5, %v5483_v63  ;;  %v5502_v63 = vld [vmem:[%s7002_s5 + $0x140] sm:$0xff]   ;;  %v5503_v44 = vld [vmem:[%s7002_s5 + $0x148] sm:$0xff]   ;;  %v2384_v28 = vld [vmem:[%s7004_s6 + $0x10] sm:$0xff] }
 0x71e   :  { %v5422_v17 = vunpack.i.l.bf16 %v5421_v30  ;;  %4911 = vmatprep.mubr.msk.bf16.mxu0 %vm125_vm5, %v5484_v20  ;;  %v2382_v20 = vld [vmem:[%s7004_s6] sm:$0xff]  ;;  %v2383_v6 = vld [vmem:[%s7004_s6 + $0x8] sm:$0xff]  ;;  %v5504_v30 = vld [vmem:[%s7002_s5 + $0x150] sm:$0xff]  }
 0x71f   :  { %v6756_v33 = vmax.f32 %v2373_v27, %v5428_v13  ;;  %v6760_v18 = vmax.f32 %v2369_v53, %v5427_v1  ;;  %v3497_v0 = vmax.f32 %v6665_v36, %v5423_v12  ;;  %3643 = vrot.lane.b32.xlu0 %v3506_v8, %s5541_s20  ;;  %v5491_v53 = vld [vmem:[%s7002_s5 + $0xe8] sm:$0xff]   ;;  %v5492_v36 = vld [vmem:[%s7002_s5 + $0xf0] sm:$0xff]   ;;  %v2385_v13 = vld [vmem:[%s7004_s6 + $0x18] sm:$0xff] }
 0x720   :  { %v3496_v19 = vmax.f32 %v6667_v58, %v5422_v17  ;;  %v3249_v45 = vpop.permute.xlu0 %3248  ;;  %v5431_v43 = vpop.permute.xlu1 %5430  ;;  %v5493_v58 = vld [vmem:[%s7002_s5 + $0xf8] sm:$0xff]   ;;  %v2386_v1 = vld [vmem:[%s7004_s6 + $0x20] sm:$0xff] }
 0x721   :  { %v5434_v16 = vpack.i.bf16 %v6756_v33, %v6760_v18  ;;  %v5433_v59 = vunpack.i.h.bf16 %v5431_v43  ;;  %v5432_v42 = vunpack.i.l.bf16 %v5431_v43  ;;  %4915 = vmatprep.subr.bf16.mxu0 %v3249_v45  ;;  %v5505_v12 = vld [vmem:[%s7002_s5 + $0x158] sm:$0xff]   ;;  %v5506_v17 = vld [vmem:[%s7002_s5 + $0x160] sm:$0xff]   ;;  %v5508_v43 = vld [vmem:[%s7002_s5 + $0x170] sm:$0xff]  }
 0x722   :  { %v3507_v39 = vpack.c.bf16 %v3497_v0, %v3496_v19  ;;  %4916 = vmatpush3.bf16.msra.mxu0 %v3249_v45  ;;  %v2389_v0 = vld [vmem:[%s7004_s6 + $0x38] sm:$0xff]  ;;  %v4499_v19 = vld [vmem:[#allocation2] sm:$0x1]  ;;  %v5507_v45 = vld [vmem:[%s7002_s5 + $0x168] sm:$0xff]  }
 0x723   :  { %v6775_v27 = vmax.f32 %v2381_v34, %v5433_v59  ;;  %v6779_v57 = vmax.f32 %v2377_v46, %v5432_v42  ;;  %5435 = vrot.lane.b32.xlu1 %v5434_v16, %s5542_s21  ;;  %v5496_v34 = vld [vmem:[%s7002_s5 + $0x110] sm:$0xff]   ;;  %v5498_v46 = vld [vmem:[%s7002_s5 + $0x120] sm:$0xff]   ;;  %v5509_v16 = vld [vmem:[%s7002_s5 + $0x178] sm:$0xff]  }
 0x724   :  { %3645 = vrot.lane.b32.xlu0 %v3507_v39, %s5541_s20  ;;  %v3368_v32 = vpop.permute.xlu0 %3367  ;;  %v5510_v59 = vld [vmem:[%s7002_s5 + $0x180] sm:$0xff]   ;;  %v5511_v42 = vld [vmem:[%s7002_s5 + $0x188] sm:$0xff]  }
 0x725   :  { %v5439_v9 = vpack.i.bf16 %v6775_v27, %v6779_v57  ;;  %v3251_v24 = vpop.permute.xlu1 %3250  ;;  %4912 = vmatmul.mubr.msk.bf16.gmra.mrb[12].mxu0 %vm125_vm5, %v5485_v35  ;;  %v5512_v35 = vld [vmem:[%s7002_s5 + $0x190] sm:$0xff]  }
 0x726   :  { %4917 = vmatprep.subr.bf16.mxu0 %v3251_v24  ;;  %4919 = vmatprep.mubr.msk.bf16.mxu0 %vm125_vm5, %v5486_v3  ;;  %v5514_v3 = vld [vmem:[%s7002_s5 + $0x1a0] sm:$0xff]  }
 0x727   :  { %4918 = vmatpush3.bf16.msra.mxu0 %v3251_v24  ;;  %5440 = vrot.lane.b32.xlu1 %v5439_v9, %s5542_s21  ;;  %v5515_v9 = vld [vmem:[%s7002_s5 + $0x1a8] sm:$0xff]  }
 0x728   :  { %3762 = vrot.lane.b32.xlu0 %v3506_v8, %s5544_s23  ;;  %4927 = vmatprep.subr.bf16.mxu0 %v3368_v32 }
 0x729   :  { %v3370_v55 = vpop.permute.xlu1 %3369 }
 0x72b   :  { %3764 = vrot.lane.b32.xlu1 %v3507_v39, %s5544_s23 }
 0x72c   :  { %3881 = vrot.lane.b32.xlu0 %v3506_v8, %s5539_s1 }
 0x72d   :  { %4920 = vmatmul.mubr.msk.bf16.vlgmr.msra.gmra.mrb[8].mxu0 %vm125_vm5, %v5487_v4 }
 0x72e   :  { %4928 = vmatpush3.bf16.msra.mxu0 %v3368_v32  ;;  %4923 = vmatprep.mubr.msk.bf16.mxu0 %vm125_vm5, %v5488_v29  ;;  %v5516_v32 = vld [vmem:[%s7002_s5 + $0x1b0] sm:$0xff]   ;;  %v5517_v29 = vld [vmem:[%s7002_s5 + $0x1b8] sm:$0xff]  }
 0x72f   :  { %4929 = vmatprep.subr.bf16.mxu0 %v3370_v55  ;;  %3883 = vrot.lane.b32.xlu1 %v3507_v39, %s5539_s1 }
 0x732   :  { %4930 = vmatpush3.bf16.msra.mxu0 %v3370_v55 }
 0x733   :  { %4939 = vmatprep.subr.bf16.mxu0 %v3506_v8 }
 0x735   :  { %4924 = vmatmul.mubr.msk.bf16.gmra.mrb[12].mxu0 %vm125_vm5, %v5489_v54  ;;  %v5518_v54 = vld [vmem:[%s7002_s5 + $0x1c0] sm:$0xff]  }
 0x736   :  { %4931 = vmatprep.mubr.msk.bf16.mxu0 %vm125_vm5, %v5490_v41  ;;  %v5519_v41 = vld [vmem:[%s7002_s5 + $0x1c8] sm:$0xff]  }
 0x73d   :  { %4932 = vmatmul.mubr.msk.bf16.vlgmr.msra.gmra.mrb[8].mxu0 %vm125_vm5, %v5491_v53  ;;  %v5520_v53 = vld [vmem:[%s7002_s5 + $0x1d0] sm:$0xff]  }
 0x73e   :  { %4940 = vmatpush3.bf16.msra.mxu0 %v3506_v8  ;;  %4935 = vmatprep.mubr.msk.bf16.mxu0 %vm125_vm5, %v5492_v36  ;;  %v5521_v36 = vld [vmem:[%s7002_s5 + $0x1d8] sm:$0xff]  }
 0x73f   :  { %4941 = vmatprep.subr.bf16.mxu0 %v3507_v39 }
 0x742   :  { %4942 = vmatpush3.bf16.msra.mxu0 %v3507_v39  ;;  %v5513_v39 = vld [vmem:[%s7002_s5 + $0x198] sm:$0xff]  }
 0x745   :  { %4936 = vmatmul.mubr.msk.bf16.gmra.mrb[12].mxu0 %vm125_vm5, %v5493_v58  ;;  %v5522_v58 = vld [vmem:[%s7002_s5 + $0x1e0] sm:$0xff]  }
 0x746   :  { %4943 = vmatprep.mubr.msk.bf16.mxu0 %vm125_vm5, %v5494_v50  ;;  %v5523_v50 = vld [vmem:[%s7002_s5 + $0x1e8] sm:$0xff]  }
 0x74d   :  { %4944 = vmatmul.mubr.msk.bf16.vlgmr.msra.gmra.mrb[8].mxu0 %vm125_vm5, %v5495_v14  ;;  %v5524_v14 = vld [vmem:[%s7002_s5 + $0x1f0] sm:$0xff]  }
 0x74e   :  { %4947 = vmatprep.mubr.msk.bf16.mxu0 %vm125_vm5, %v5496_v34  ;;  %v5525_v34 = vld [vmem:[%s7002_s5 + $0x1f8] sm:$0xff]  }
 0x755   :  { %4948 = vmatmul.mubr.msk.bf16.gmra.mrb[12].mxu0 %vm125_vm5, %v5497_v15 }
 0x756   :  { %4955 = vmatprep.mubr.msk.bf16.mxu0 %vm125_vm5, %v5498_v46 }
 0x791   :  { %v3644_v52 = vpop.permute.xlu0 %3643 }
 0x792   :  { %4951 = vmatprep.subr.bf16.mxu0 %v3644_v52 }
 0x793   :  { %4952 = vmatpush3.bf16.msra.mxu0 %v3644_v52 }
 0x795   :  { %v5436_v25 = vpop.permute.xlu1 %5435 }
 0x796   :  { %v5438_v61 = vunpack.i.h.bf16 %v5436_v25  ;;  %v5437_v23 = vunpack.i.l.bf16 %v5436_v25  ;;  %v3646_v37 = vpop.permute.xlu0 %3645 }
 0x797   :  { %4953 = vmatprep.subr.bf16.mxu0 %v3646_v37 }
 0x798   :  { %v4009_v26 = vmax.f32 %v6756_v33, %v5438_v61  ;;  %v4008_v7 = vmax.f32 %v6760_v18, %v5437_v23  ;;  %4954 = vmatpush3.bf16.msra.mxu0 %v3646_v37  ;;  %v2387_v33 = vld [vmem:[%s7004_s6 + $0x28] sm:$0xff]  ;;  %v2388_v18 = vld [vmem:[%s7004_s6 + $0x30] sm:$0xff] }
 0x799   :  { %v5441_v60 = vpop.permute.xlu1 %5440 }
 0x79a   :  { %v4020_v56 = vpack.c.bf16 %v4009_v26, %v4008_v7  ;;  %v5443_v31 = vunpack.i.h.bf16 %v5441_v60  ;;  %v5442_v2 = vunpack.i.l.bf16 %v5441_v60  ;;  %v3763_v48 = vpop.permute.xlu0 %3762 }
 0x79b   :  { %4956 = vmatmul.mubr.msk.bf16.vlgmr.msra.gmra.mrb[8].mxu0 %vm125_vm5, %v5499_v40  ;;  %4963 = vmatprep.subr.bf16.mxu0 %v3763_v48 }
 0x79c   :  { %v4011_v21 = vmax.f32 %v6775_v27, %v5443_v31  ;;  %v4010_v10 = vmax.f32 %v6779_v57, %v5442_v2  ;;  %4964 = vmatpush3.bf16.msra.mxu0 %v3763_v48  ;;  %4157 = vrot.lane.b32.xlu0 %v4020_v56, %s5541_s20 }
 0x79d   :  { %v3765_v62 = vpop.permute.xlu1 %3764  ;;  %4959 = vmatprep.mubr.msk.bf16.mxu0 %vm125_vm5, %v5500_v11 }
 0x79e   :  { %v4021_v49 = vpack.c.bf16 %v4011_v21, %v4010_v10  ;;  %4965 = vmatprep.subr.bf16.mxu0 %v3765_v62  ;;  %v3882_v51 = vpop.permute.xlu0 %3881 }
 0x7a0   :  { %4966 = vmatpush3.bf16.msra.mxu0 %v3765_v62  ;;  %4159 = vrot.lane.b32.xlu1 %v4021_v49, %s5541_s20 }
 0x7a1   :  { %4276 = vrot.lane.b32.xlu0 %v4020_v56, %s5544_s23  ;;  %4975 = vmatprep.subr.bf16.mxu0 %v3882_v51  ;;  %v3884_v8 = vpop.permute.xlu1 %3883 }
 0x7a3   :  { %4960 = vmatmul.mubr.msk.bf16.gmra.mrb[12].mxu0 %vm125_vm5, %v5501_v38 }
 0x7a4   :  { %4278 = vrot.lane.b32.xlu1 %v4021_v49, %s5544_s23  ;;  %4967 = vmatprep.mubr.msk.bf16.mxu0 %vm125_vm5, %v5502_v63 }
 0x7a5   :  { %4395 = vrot.lane.b32.xlu0 %v4020_v56, %s5539_s1 }
 0x7a8   :  { %4397 = vrot.lane.b32.xlu1 %v4021_v49, %s5539_s1 }
 0x7a9   :  { %2392 = vperm.xlu0 %5362, %v2382_v20  }
 0x7ab   :  { %4968 = vmatmul.mubr.msk.bf16.vlgmr.msra.gmra.mrb[8].mxu0 %vm125_vm5, %v5503_v44 }
 0x7ac   :  { %4976 = vmatpush3.bf16.msra.mxu0 %v3882_v51  ;;  %2397 = vperm.xlu1 %5363, %v2383_v6  }
 0x7ad   :  { %4977 = vmatprep.subr.bf16.mxu0 %v3884_v8  ;;  %2402 = vperm.xlu0 %5362, %v2384_v28  }
 0x7ae   :  { %4971 = vmatprep.mubr.msk.bf16.mxu0 %vm125_vm5, %v5504_v30 }
 0x7b0   :  { %4978 = vmatpush3.bf16.msra.mxu0 %v3884_v8  ;;  %2407 = vperm.xlu1 %5363, %v2385_v13  }
 0x7b1   :  { %4987 = vmatprep.subr.bf16.mxu0 %v4020_v56  ;;  %2412 = vperm.xlu0 %5362, %v2386_v1  }
 0x7b3   :  { %4972 = vmatmul.mubr.msk.bf16.gmra.mrb[12].mxu0 %vm125_vm5, %v5505_v12 }
 0x7b4   :  { %2417 = vperm.xlu1 %5363, %v2387_v33   ;;  %4979 = vmatprep.mubr.msk.bf16.mxu0 %vm125_vm5, %v5506_v17 }
 0x7b5   :  { %2422 = vperm.xlu0 %5362, %v2388_v18  }
 0x7b8   :  { %2427 = vperm.xlu1 %5363, %v2389_v0  }
 0x7b9   :  { %4502 = vperm.xlu0 %5362, %v4499_v19   ;;  %v4494_v19 = vld [vmem:[%s7005_s7] sm:$0x1] }
 0x7bb   :  { %4980 = vmatmul.mubr.msk.bf16.vlgmr.msra.gmra.mrb[8].mxu0 %vm125_vm5, %v5507_v45 }
 0x7bc   :  { %4988 = vmatpush3.bf16.msra.mxu0 %v4020_v56  ;;  %4983 = vmatprep.mubr.msk.bf16.mxu0 %vm125_vm5, %v5508_v43 }
 0x7bd   :  { %4989 = vmatprep.subr.bf16.mxu0 %v4021_v49 }
 0x7c0   :  { %4990 = vmatpush3.bf16.msra.mxu0 %v4021_v49 }
 0x7c3   :  { %4984 = vmatmul.mubr.msk.bf16.gmra.mrb[12].mxu0 %vm125_vm5, %v5509_v16 }
 0x7c4   :  { %4991 = vmatprep.mubr.msk.bf16.mxu0 %vm125_vm5, %v5510_v59 }
 0x7cb   :  { %4992 = vmatmul.mubr.msk.bf16.vlgmr.msra.gmra.mrb[8].mxu0 %vm125_vm5, %v5511_v42 }
 0x7cc   :  { %4995 = vmatprep.mubr.msk.bf16.mxu0 %vm125_vm5, %v5512_v35 }
 0x7d3   :  { %4996 = vmatmul.mubr.msk.bf16.gmra.mrb[12].mxu0 %vm125_vm5, %v5513_v39 }
 0x7d4   :  { %5003 = vmatprep.mubr.msk.bf16.mxu0 %vm125_vm5, %v5514_v3 }
 0x80e   :  { %v4158_v27 = vpop.permute.xlu0 %4157 }
 0x80f   :  { %4999 = vmatprep.subr.bf16.mxu0 %v4158_v27 }
 0x810   :  { %5000 = vmatpush3.bf16.msra.mxu0 %v4158_v27 }
 0x812   :  { %v4160_v57 = vpop.permute.xlu1 %4159 }
 0x813   :  { %5001 = vmatprep.subr.bf16.mxu0 %v4160_v57  ;;  %v4277_v24 = vpop.permute.xlu0 %4276 }
 0x814   :  { %5002 = vmatpush3.bf16.msra.mxu0 %v4160_v57 }
 0x815   :  { %5011 = vmatprep.subr.bf16.mxu0 %v4277_v24 }
 0x816   :  { %v4279_v4 = vpop.permute.xlu1 %4278 }
 0x817   :  { %5004 = vmatmul.mubr.msk.bf16.vlgmr.msra.gmra.mrb[8].mxu0 %vm125_vm5, %v5515_v9  ;;  %v4396_v55 = vpop.permute.xlu0 %4395 }
 0x818   :  { %5012 = vmatpush3.bf16.msra.mxu0 %v4277_v24  ;;  %5007 = vmatprep.mubr.msk.bf16.mxu0 %vm125_vm5, %v5516_v32 }
 0x819   :  { %5013 = vmatprep.subr.bf16.mxu0 %v4279_v4 }
 0x81a   :  { %v4398_v22 = vpop.permute.xlu1 %4397 }
 0x81c   :  { %5014 = vmatpush3.bf16.msra.mxu0 %v4279_v4 }
 0x81d   :  { %5023 = vmatprep.subr.bf16.mxu0 %v4396_v55 }
 0x81f   :  { %5008 = vmatmul.mubr.msk.bf16.gmra.mrb[12].mxu0 %vm125_vm5, %v5517_v29 }
 0x820   :  { %5015 = vmatprep.mubr.msk.bf16.mxu0 %vm125_vm5, %v5518_v54 }
 0x827   :  { %5016 = vmatmul.mubr.msk.bf16.vlgmr.msra.gmra.mrb[8].mxu0 %vm125_vm5, %v5519_v41 }
 0x828   :  { %5024 = vmatpush3.bf16.msra.mxu0 %v4396_v55  ;;  %5019 = vmatprep.mubr.msk.bf16.mxu0 %vm125_vm5, %v5520_v53  ;;  %v2393_v15 = vpop.permute.xlu0 %2392 }
 0x829   :  { %5025 = vmatprep.subr.bf16.mxu0 %v4398_v22 }
 0x82b   :  { %v2398_v46 = vpop.permute.xlu1 %2397 }
 0x82c   :  { %5026 = vmatpush3.bf16.msra.mxu0 %v4398_v22  ;;  %v2403_v52 = vpop.permute.xlu0 %2402 }
 0x82f   :  { %5020 = vmatmul.mubr.msk.bf16.gmra.mrb[12].mxu0 %vm125_vm5, %v5521_v36  ;;  %v2408_v25 = vpop.permute.xlu1 %2407 }
 0x830   :  { %5027 = vmatprep.mubr.msk.bf16.mxu0 %vm125_vm5, %v5522_v58  ;;  %v2413_v40 = vpop.permute.xlu0 %2412 }
 0x833   :  { %v2418_v56 = vpop.permute.xlu1 %2417 }
 0x834   :  { %v2423_v49 = vpop.permute.xlu0 %2422 }
 0x837   :  { %5028 = vmatmul.mubr.msk.bf16.vlgmr.msra.gmra.mrb[8].mxu0 %vm125_vm5, %v5523_v50  ;;  %v2428_v44 = vpop.permute.xlu1 %2427 }
 0x838   :  { %5031 = vmatprep.mubr.msk.bf16.mxu0 %vm125_vm5, %v5524_v14  ;;  %v4503_v45 = vpop.permute.xlu0 %4502 }
 0x839   :  { %v4508_v43 = vrot.slane %v4503_v45, %v5610_v5 }
 0x83f   :  { %5032 = vmatmul.mubr.msk.bf16.gmra.mrb[12].mxu0 %vm125_vm5, %v5525_v34 }
 0x90a   :  { %v5029_v61 = vpop.f32.mrb[8].mxu0 }
 0x90b   :  { %v5071_v23 = vadd.f32 %v5029_v61, %v2403_v52  ;;  %v4447_v37 = vpop.f32.mrb[9].mxu0 }
 0x90c   :  { %v5072_v26 = vadd.f32 %v4447_v37, %v2393_v15  ;;  %v5030_v7 = vpop.f32.mrb[10].mxu0 }
 0x90d   :  { %v5073_v60 = vadd.f32 %v5030_v7, %v2408_v25  ;;  %v4450_v11 = vpop.f32.mrb[11].mxu0  ;;  %v4488_v2 = vmax.f32 %v5071_v23, 0.0 }
 0x90e   :  { %v5074_v31 = vadd.f32 %v4450_v11, %v2398_v46  ;;  %v4486_v21 = vmax.f32 %v5072_v26, 0.0 }
 0x90f   :  { %v4489_v48 = vmax.f32 %v5073_v60, 0.0 }
 0x910   :  { %v4487_v10 = vmax.f32 %v5074_v31, 0.0 }
 0x911   :  { %v4496_v62 = vpack.c.bf16 %v4489_v48, %v4488_v2 }
 0x912   :  { %v4495_v38 = vpack.c.bf16 %v4487_v10, %v4486_v21  ;;  %v5033_v51 = vpop.f32.mrb[12].mxu0 }
 0x913   :  { %v5075_v63 = vadd.f32 %v5033_v51, %v2423_v49  ;;  %v4463_v20 = vpop.f32.mrb[13].mxu0 }
 0x914   :  { %v5076_v6 = vadd.f32 %v4463_v20, %v2413_v40  ;;  %v5034_v28 = vpop.f32.mrb[14].mxu0  ;;  %5036 = vmatpush3.bf16.msra.mxu1 %v4495_v38 }
 0x915   :  { %v5077_v30 = vadd.f32 %v5034_v28, %v2428_v44  ;;  %v4466_v8 = vpop.f32.mrb[15].mxu0  ;;  %5037 = vmatprep.subr.bf16.mxu1 %v7050_v47  ;;  %v4492_v1 = vmax.f32 %v5075_v63, 0.0 }
 0x916   :  { %v5078_v13 = vadd.f32 %v4466_v8, %v2418_v56  ;;  %v4490_v17 = vmax.f32 %v5076_v6, 0.0 }
 0x917   :  { %v4493_v12 = vmax.f32 %v5077_v30, 0.0 }
 0x918   :  { %v4491_v33 = vmax.f32 %v5078_v13, 0.0  ;;  %5038 = vmatpush3.bf16.msra.mxu1 %v4496_v62 }
 0x919   :  { %v4498_v18 = vpack.c.bf16 %v4493_v12, %v4492_v1  ;;  %5039 = vmatprep.subr.bf16.mxu1 %v7050_v47 }
 0x91a   :  { %v4497_v0 = vpack.c.bf16 %v4491_v33, %v4490_v17 }
 0x91c   :  { %5040 = vmatpush3.bf16.msra.mxu1 %v4497_v0 }
 0x91d   :  { %5041 = vmatprep.subr.bf16.mxu1 %v7050_v47 }
 0x920   :  { %5042 = vmatpush3.bf16.msra.mxu1 %v4498_v18 }
 0x923   :  { %5044 = vmatmul.mubr.msk.bf16.vlgmr.msra.gmra.mrb[16].mxu1 %vm129_vm3, %v4494_v19 }
 0x9f6   :  { %v4546_v16 = vpop.f32.mrb[16].mxu1 }
 0x9f7   :  { %v4547_v59 = vadd.f32 %v4546_v16, %v4508_v43  ;;  %v5045_v42 = vpop.f32.mrb[17].mxu1 }
 0x9f8   :  { %v4549_v35 = vpop.f32.mrb[18].mxu1 }
 0x9f9   :  { %5526 = vtanh.f32 %v4547_v59  ;;  %v5046_v39 = vpop.f32.mrb[19].mxu1 }
 0xa03   :  { %v5527_v3 = vpop.eup %5526 }
 0xa04   :  { %4554 = vst.msk [vmem:[%s7006_s9] sm:$0x1] %vm4553_vm0, %v5527_v3 }

</bundles_post_ra>
